<compile_context>
chip_gen: v7x
topology: tpu7x:2x2x1
jax: 0.10.0
libtpu: 0.0.40
codegen_flags: <defaults>
</compile_context>

<pallas_src>
import math

import jax
import jax.numpy as jnp
from jax.experimental import pallas as pl
from jax.experimental.pallas import tpu as pltpu


# ----------------------------- in-kernel helpers (traced) ---------------------

def _dot_bf16(x, w):
    # f32 activations x bf16 weights -> MXU matmul with f32 accumulation.
    return jnp.dot(x.astype(jnp.bfloat16), w, preferred_element_type=jnp.float32)


def _layernorm(x, g, b, eps=1e-5):
    m = jnp.mean(x, axis=-1, keepdims=True)
    c = x - m
    v = jnp.mean(c * c, axis=-1, keepdims=True)
    return c * jax.lax.rsqrt(v + eps) * g + b


def _to_heads(x2d, H, hd):
    # (T, H*hd) -> (H, T, hd) without per-head lane slicing:
    # 2-D transpose + leading/sublane-dim split + batched minor-dim transpose.
    T = x2d.shape[0]
    return jnp.transpose(x2d.T.reshape(H, hd, T), (0, 2, 1))


def _from_heads(ctx, H, hd):
    # (H, T, hd) -> (T, H*hd); identical column order to PyTorch's head concat.
    T = ctx.shape[1]
    return jnp.transpose(ctx, (0, 2, 1)).reshape(H * hd, T).T


def _attn(q2d, k2d, v2d, H, hd, scale):
    # q2d: (T, D); k2d/v2d: (S, D).  Single head-batched einsums (no head loop).
    qh = _to_heads(q2d, H, hd)                       # (H, T, hd)
    kh = _to_heads(k2d, H, hd)                       # (H, S, hd)
    vh = _to_heads(v2d, H, hd)                       # (H, S, hd)
    s = jnp.einsum("htd,hsd->hts",
                   qh.astype(jnp.bfloat16), kh.astype(jnp.bfloat16),
                   preferred_element_type=jnp.float32) * scale
    s = s - jnp.max(s, axis=-1, keepdims=True)
    p = jnp.exp(s)
    p = p * pl.reciprocal(jnp.sum(p, axis=-1, keepdims=True), approx=True)
    ctx = jnp.einsum("hts,hsd->htd",
                     p.astype(jnp.bfloat16), vh.astype(jnp.bfloat16),
                     preferred_element_type=jnp.float32)
    return _from_heads(ctx, H, hd)                   # (T, D)


def _vmem_limit(per_step_bytes):
    # Resident + double-buffered streamed blocks, plus headroom for in-kernel
    # intermediates; clamped so the budget is valid on v7x (64 MiB physical).
    need = 2 * per_step_bytes + (4 << 20)
    return int(min(max(need, 8 << 20), 64 << 20))


# ----------------------------- encoder stack kernel ---------------------------

def make_encoder_kernel(S, D, H, F, L):
    hd = D // H
    scale = 1.0 / math.sqrt(hd)

    def kernel(x_in, w_qkv, b_qkv, w_out, w_ff1, b_ff1, w_ff2, vecs, out_ref):
        l = pl.program_id(1)

        @pl.when(l == 0)
        def _():
            out_ref[...] = x_in[...]

        x = out_ref[...]                             # (S, D) f32, layer carry
        vv = vecs[...]                               # (6, D) f32
        b_out, b_ff2 = vv[0:1], vv[1:2]
        g1, be1, g2, be2 = vv[2:3], vv[3:4], vv[4:5], vv[5:6]

        # --- self-attention (fused QKV; one K=D output projection) ---
        qkv = _dot_bf16(x, w_qkv[...]) + b_qkv[...]  # (S, 3D)
        sa = _dot_bf16(
            _attn(qkv[:, :D], qkv[:, D:2 * D], qkv[:, 2 * D:], H, hd, scale),
            w_out[...]) + b_out
        x = _layernorm(x + sa, g1, be1)

        # --- feed-forward (ReLU), hidden kept in bf16 ---
        h1 = jnp.maximum(_dot_bf16(x, w_ff1[...]) + b_ff1[...], 0.0
                         ).astype(jnp.bfloat16)
        ff = jnp.dot(h1, w_ff2[...], preferred_element_type=jnp.float32) + b_ff2
        x = _layernorm(x + ff, g2, be2)

        out_ref[...] = x

    return kernel


def encoder_stack(x, p, *, B, S, D, H, F, L):
    per_step = (2 * (D * 3 * D + D * D + D * F + F * D)      # bf16 weights
                + 4 * (3 * D + F + 6 * D)                     # f32 bias/vec rows
                + 4 * 2 * S * D)                              # resident activations
    return pl.pallas_call(
        make_encoder_kernel(S, D, H, F, L),
        out_shape=jax.ShapeDtypeStruct((B, S, D), jnp.float32),
        grid=(B, L),
        in_specs=[
            pl.BlockSpec((None, S, D), lambda b, l: (b, 0, 0)),          # x (resident per b)
            pl.BlockSpec((None, D, 3 * D), lambda b, l: (l, 0, 0)),      # w_qkv
            pl.BlockSpec((None, 1, 3 * D), lambda b, l: (l, 0, 0)),      # b_qkv
            pl.BlockSpec((None, D, D), lambda b, l: (l, 0, 0)),          # w_out
            pl.BlockSpec((None, D, F), lambda b, l: (l, 0, 0)),          # w_ff1
            pl.BlockSpec((None, 1, F), lambda b, l: (l, 0, 0)),          # b_ff1
            pl.BlockSpec((None, F, D), lambda b, l: (l, 0, 0)),          # w_ff2
            pl.BlockSpec((None, 6, D), lambda b, l: (l, 0, 0)),          # packed vectors
        ],
        out_specs=pl.BlockSpec((None, S, D), lambda b, l: (b, 0, 0)),
        compiler_params=pltpu.CompilerParams(
            dimension_semantics=("parallel", "arbitrary"),
            vmem_limit_bytes=_vmem_limit(per_step)),
    )(x, p["w_qkv"], p["b_qkv"], p["w_out"], p["w_ff1"], p["b_ff1"],
      p["w_ff2"], p["vecs"])


# ----------------------------- decoder stack kernel ---------------------------

def make_decoder_kernel(T, S, D, H, F, L):
    hd = D // H
    scale = 1.0 / math.sqrt(hd)

    def kernel(tgt_in, mem_in,
               w_qkv1, b_qkv1, w_out1,
               w_q2, w_kv2, b_kv2, w_out2,
               w_ff1, b_ff1, w_ff2, vecs,
               out_ref):
        l = pl.program_id(1)

        @pl.when(l == 0)
        def _():
            out_ref[...] = tgt_in[...]

        x = out_ref[...]                             # (T, D) f32, layer carry
        mem = mem_in[...]                            # (S, D) f32
        vv = vecs[...]                               # (10, D) f32
        b_out1, b_q2, b_out2, b_ff2 = vv[0:1], vv[1:2], vv[2:3], vv[3:4]
        g1, be1, g2, be2, g3, be3 = (vv[4:5], vv[5:6], vv[6:7],
                                     vv[7:8], vv[8:9], vv[9:10])

        # --- self-attention (unmasked; Transformer2.forward passes no masks) ---
        qkv = _dot_bf16(x, w_qkv1[...]) + b_qkv1[...]          # (T, 3D)
        sa = _dot_bf16(
            _attn(qkv[:, :D], qkv[:, D:2 * D], qkv[:, 2 * D:], H, hd, scale),
            w_out1[...]) + b_out1
        x = _layernorm(x + sa, g1, be1)

        # --- cross-attention (Q from tgt, K/V from encoder memory) ---
        q2 = _dot_bf16(x, w_q2[...]) + b_q2                    # (T, D)
        kv2 = _dot_bf16(mem, w_kv2[...]) + b_kv2[...]          # (S, 2D)
        ca = _dot_bf16(
            _attn(q2, kv2[:, :D], kv2[:, D:], H, hd, scale),
            w_out2[...]) + b_out2
        x = _layernorm(x + ca, g2, be2)

        # --- feed-forward (ReLU), hidden kept in bf16 ---
        h1 = jnp.maximum(_dot_bf16(x, w_ff1[...]) + b_ff1[...], 0.0
                         ).astype(jnp.bfloat16)
        ff = jnp.dot(h1, w_ff2[...], preferred_element_type=jnp.float32) + b_ff2
        x = _layernorm(x + ff, g3, be3)

        out_ref[...] = x

    return kernel


def decoder_stack(tgt, mem, p, *, B, T, S, D, H, F, L):
    per_step = (2 * (D * 3 * D + 3 * D * D + D * 2 * D + D * F + F * D)  # bf16 weights
                + 4 * (3 * D + 2 * D + F + 10 * D)                       # f32 bias/vec rows
                + 4 * (2 * T * D + S * D))                               # resident activations
    return pl.pallas_call(
        make_decoder_kernel(T, S, D, H, F, L),
        out_shape=jax.ShapeDtypeStruct((B, T, D), jnp.float32),
        grid=(B, L),
        in_specs=[
            pl.BlockSpec((None, T, D), lambda b, l: (b, 0, 0)),          # tgt (resident per b)
            pl.BlockSpec((None, S, D), lambda b, l: (b, 0, 0)),          # memory (resident per b)
            pl.BlockSpec((None, D, 3 * D), lambda b, l: (l, 0, 0)),      # w_qkv1
            pl.BlockSpec((None, 1, 3 * D), lambda b, l: (l, 0, 0)),      # b_qkv1
            pl.BlockSpec((None, D, D), lambda b, l: (l, 0, 0)),          # w_out1
            pl.BlockSpec((None, D, D), lambda b, l: (l, 0, 0)),          # w_q2
            pl.BlockSpec((None, D, 2 * D), lambda b, l: (l, 0, 0)),      # w_kv2
            pl.BlockSpec((None, 1, 2 * D), lambda b, l: (l, 0, 0)),      # b_kv2
            pl.BlockSpec((None, D, D), lambda b, l: (l, 0, 0)),          # w_out2
            pl.BlockSpec((None, D, F), lambda b, l: (l, 0, 0)),          # w_ff1
            pl.BlockSpec((None, 1, F), lambda b, l: (l, 0, 0)),          # b_ff1
            pl.BlockSpec((None, F, D), lambda b, l: (l, 0, 0)),          # w_ff2
            pl.BlockSpec((None, 10, D), lambda b, l: (l, 0, 0)),         # packed vectors
        ],
        out_specs=pl.BlockSpec((None, T, D), lambda b, l: (b, 0, 0)),
        compiler_params=pltpu.CompilerParams(
            dimension_semantics=("parallel", "arbitrary"),
            vmem_limit_bytes=_vmem_limit(per_step)),
    )(tgt, mem, p["w_qkv1"], p["b_qkv1"], p["w_out1"], p["w_q2"], p["w_kv2"],
      p["b_kv2"], p["w_out2"], p["w_ff1"], p["b_ff1"], p["w_ff2"], p["vecs"])


# ----------------------------- tied-embedding vocab projection ----------------

def _vocab_proj_kernel(x_ref, w_ref, b_ref, o_ref):
    o_ref[...] = (jnp.dot(x_ref[...].astype(jnp.bfloat16), w_ref[...],
                          preferred_element_type=jnp.float32) + b_ref[...])


def vocab_projection(x_flat, emb_t, out_bias, *, V):
    # Separate V-tiled kernel (lane-dense 128-multiple output blocks); keeps the
    # tied embedding / f32 logits out of the decoder's layer-streaming grid.
    N, D = x_flat.shape
    tv = 128 if V % 128 == 0 else V
    per_step = 4 * N * D + 2 * D * tv + 4 * tv + 4 * N * tv
    return pl.pallas_call(
        _vocab_proj_kernel,
        out_shape=jax.ShapeDtypeStruct((N, V), jnp.float32),
        grid=(V // tv,),
        in_specs=[
            pl.BlockSpec((N, D), lambda j: (0, 0)),
            pl.BlockSpec((D, tv), lambda j: (0, j)),
            pl.BlockSpec((1, tv), lambda j: (0, j)),
        ],
        out_specs=pl.BlockSpec((N, tv), lambda j: (0, j)),
        compiler_params=pltpu.CompilerParams(
            dimension_semantics=("parallel",),
            vmem_limit_bytes=_vmem_limit(per_step)),
    )(x_flat, emb_t, out_bias)


# ----------------------------- parameters (synthetic, deterministic) ----------

def init_params(key, *, S, D, F, V, L_enc, L_dec):
    k_emb, k_bias, k_enc, k_dec = jax.random.split(key, 4)

    def winit(k, shape):
        return (0.02 * jax.random.normal(k, shape, jnp.float32)).astype(jnp.bfloat16)

    embedding = jax.random.normal(k_emb, (V, D), jnp.float32)
    bound = 1.0 / math.sqrt(D)                       # fan_in of the (V, D) embedding
    output_bias = jax.random.uniform(k_bias, (1, V), jnp.float32, -bound, bound)

    # PositionalEncoding buffer: (max_len, 1, D), mean-centered (max_len = S)
    pos = jnp.arange(S, dtype=jnp.float32)[:, None]
    div = jnp.exp(jnp.arange(0, D, 2, dtype=jnp.float32) / D * math.log(1.0 / 10000.0))
    pe = jnp.zeros((S, D), jnp.float32)
    pe = pe.at[:, 0::2].set(jnp.sin(pos * div))
    pe = pe.at[:, 1::2].set(jnp.cos(pos * div))
    pe = pe[None].transpose(1, 0, 2)
    pe = pe - jnp.mean(pe)

    z, o = jnp.zeros((D,), jnp.float32), jnp.ones((D,), jnp.float32)

    def enc_layer(k):
        ks = jax.random.split(k, 4)
        return dict(
            w_qkv=winit(ks[0], (D, 3 * D)),
            b_qkv=jnp.zeros((1, 3 * D), jnp.float32),
            w_out=winit(ks[1], (D, D)),
            w_ff1=winit(ks[2], (D, F)),
            b_ff1=jnp.zeros((1, F), jnp.float32),
            w_ff2=winit(ks[3], (F, D)),
            # rows: b_out, b_ff2, ln1_g, ln1_b, ln2_g, ln2_b
            vecs=jnp.stack([z, z, o, z, o, z]),
        )

    def dec_layer(k):
        ks = jax.random.split(k, 7)
        return dict(
            w_qkv1=winit(ks[0], (D, 3 * D)),
            b_qkv1=jnp.zeros((1, 3 * D), jnp.float32),
            w_out1=winit(ks[1], (D, D)),
            w_q2=winit(ks[2], (D, D)),
            w_kv2=winit(ks[3], (D, 2 * D)),
            b_kv2=jnp.zeros((1, 2 * D), jnp.float32),
            w_out2=winit(ks[4], (D, D)),
            w_ff1=winit(ks[5], (D, F)),
            b_ff1=jnp.zeros((1, F), jnp.float32),
            w_ff2=winit(ks[6], (F, D)),
            # rows: b_out1, b_q2, b_out2, b_ff2, ln1_g, ln1_b, ln2_g, ln2_b, ln3_g, ln3_b
            vecs=jnp.stack([z, z, z, z, o, z, o, z, o, z]),
        )

    def stack(layers):
        return jax.tree_util.tree_map(lambda *xs: jnp.stack(xs, axis=0), *layers)

    encoder = stack([enc_layer(k) for k in jax.random.split(k_enc, L_enc)])
    decoder = stack([dec_layer(k) for k in jax.random.split(k_dec, L_dec)])

    return dict(embedding=embedding, output_bias=output_bias, pos_encoding=pe,
                encoder=encoder, decoder=decoder)


# ----------------------------- Transformer2.forward ---------------------------

def make_forward(*, B, S, T, D, H, F, V, L_enc, L_dec):
    @jax.jit
    def forward(params, src_tok, tgt_tok):
        emb = params["embedding"]                                        # (V, D)

        # embedding gather + positional encoding (src only), plain XLA
        src_e = jnp.take(emb, src_tok, axis=0) + params["pos_encoding"]  # (S, B, D)
        tgt_e = jnp.take(emb, tgt_tok, axis=0)                           # (T, B, D)

        # batch-major layout for the kernels
        x = jnp.transpose(src_e, (1, 0, 2))                              # (B, S, D)
        y = jnp.transpose(tgt_e, (1, 0, 2))                              # (B, T, D)

        memory = encoder_stack(x, params["encoder"],
                               B=B, S=S, D=D, H=H, F=F, L=L_enc)         # (B, S, D)
        dec = decoder_stack(y, memory, params["decoder"],
                            B=B, T=T, S=S, D=D, H=H, F=F, L=L_dec)       # (B, T, D)

        emb_t = jnp.transpose(emb).astype(jnp.bfloat16)                  # tied (D, V)
        logits_flat = vocab_projection(dec.reshape(B * T, D), emb_t,
                                       params["output_bias"], V=V)       # (B*T, V)

        # back to PyTorch layout (T, B, V)
        return jnp.transpose(logits_flat.reshape(B, T, V), (1, 0, 2))

    return forward


# ----------------------------- main --------------------------------------------

if __name__ == "__main__":
    B, S, T = 2, 8, 8                  # batch, src seq (= max_len), tgt seq
    D, H, V = 32, 4, 128               # d_model, nhead, vocab_size
    F = 2048                           # dim_feedforward (nn.Transformer*Layer default)
    L_ENC, L_DEC = 2, 2                # num_encoder_layers, num_decoder_layers

    key = jax.random.PRNGKey(0)
    k_par, k_src, k_tgt = jax.random.split(key, 3)

    params = init_params(k_par, S=S, D=D, F=F, V=V, L_enc=L_ENC, L_dec=L_DEC)
    src = jax.random.randint(k_src, (S, B), 0, V, dtype=jnp.int32)   # token ids (seq, batch)
    tgt = jax.random.randint(k_tgt, (T, B), 0, V, dtype=jnp.int32)

    forward = make_forward(B=B, S=S, T=T, D=D, H=H, F=F, V=V,
                           L_enc=L_ENC, L_dec=L_DEC)
    logits = jax.block_until_ready(forward(params, src, tgt))

    assert logits.shape == (T, B, V)
    assert bool(jnp.all(jnp.isfinite(logits)))
    print("KERNEL_OK")
</pallas_src>

<mosaic_0001>
module attributes {stable_mosaic.version = 11 : i64} {
  func.func @kernel(%arg0: i32, %arg1: i32, %arg2: memref<1x8x32xf32, #tpu.memory_space<vmem>>, %arg3: memref<1x32x96xbf16, #tpu.memory_space<vmem>>, %arg4: memref<1x1x96xf32, #tpu.memory_space<vmem>>, %arg5: memref<1x32x32xbf16, #tpu.memory_space<vmem>>, %arg6: memref<1x32x2048xbf16, #tpu.memory_space<vmem>>, %arg7: memref<1x1x2048xf32, #tpu.memory_space<vmem>>, %arg8: memref<1x2048x32xbf16, #tpu.memory_space<vmem>>, %arg9: memref<1x6x32xf32, #tpu.memory_space<vmem>>, %arg10: memref<1x8x32xf32, #tpu.memory_space<vmem>>) attributes {dimension_semantics = [#tpu.dimension_semantics<parallel>, #tpu.dimension_semantics<arbitrary>], iteration_bounds = array<i64: 2, 2>, scalar_prefetch = 0 : i64, scratch_operands = 0 : i64, tpu.core_type = #tpu.core_type<tc>, window_params = [{transform_indices = @transform_0, window_bounds = array<i64: 1, 8, 32>}, {transform_indices = @transform_1, window_bounds = array<i64: 1, 32, 96>}, {transform_indices = @transform_2, window_bounds = array<i64: 1, 1, 96>}, {transform_indices = @transform_3, window_bounds = array<i64: 1, 32, 32>}, {transform_indices = @transform_4, window_bounds = array<i64: 1, 32, 2048>}, {transform_indices = @transform_5, window_bounds = array<i64: 1, 1, 2048>}, {transform_indices = @transform_6, window_bounds = array<i64: 1, 2048, 32>}, {transform_indices = @transform_7, window_bounds = array<i64: 1, 6, 32>}, {transform_indices = @transform_8, window_bounds = array<i64: 1, 8, 32>}]} {
    %c0_i32 = arith.constant 0 : i32
    %0 = arith.cmpi eq, %arg1, %c0_i32 : i32
    %1 = arith.extui %0 : i1 to i32
    %c0_i32_0 = arith.constant 0 : i32
    %2 = arith.cmpi ne, %1, %c0_i32_0 : i32
    scf.if %2 {
      %c0_46 = arith.constant 0 : index
      %c0_47 = arith.constant 0 : index
      %c0_48 = arith.constant 0 : index
      %121 = vector.load %arg2[%c0_46, %c0_47, %c0_48] : memref<1x8x32xf32, #tpu.memory_space<vmem>>, vector<1x8x32xf32>
      %122 = vector.shape_cast %121 : vector<1x8x32xf32> to vector<8x32xf32>
      %c0_49 = arith.constant 0 : index
      %c0_50 = arith.constant 0 : index
      %c0_51 = arith.constant 0 : index
      %123 = vector.load %arg10[%c0_49, %c0_50, %c0_51] : memref<1x8x32xf32, #tpu.memory_space<vmem>>, vector<1x8x32xf32>
      %124 = vector.shape_cast %123 : vector<1x8x32xf32> to vector<8x32xf32>
      %125 = vector.shape_cast %122 : vector<8x32xf32> to vector<1x8x32xf32>
      tpu.vector_store %arg10[%c0_49, %c0_50, %c0_51], %125 {strides = array<i32>} : memref<1x8x32xf32, #tpu.memory_space<vmem>>, vector<1x8x32xf32>,
    } else {
    }
    %c0 = arith.constant 0 : index
    %c0_1 = arith.constant 0 : index
    %c0_2 = arith.constant 0 : index
    %3 = vector.load %arg10[%c0, %c0_1, %c0_2] : memref<1x8x32xf32, #tpu.memory_space<vmem>>, vector<1x8x32xf32>
    %4 = vector.shape_cast %3 : vector<1x8x32xf32> to vector<8x32xf32>
    %c0_3 = arith.constant 0 : index
    %c0_4 = arith.constant 0 : index
    %c0_5 = arith.constant 0 : index
    %5 = vector.load %arg9[%c0_3, %c0_4, %c0_5] : memref<1x6x32xf32, #tpu.memory_space<vmem>>, vector<1x6x32xf32>
    %6 = vector.shape_cast %5 : vector<1x6x32xf32> to vector<6x32xf32>
    %7 = vector.extract_strided_slice %6 {offsets = [0, 0], sizes = [1, 32], strides = [1, 1]} : vector<6x32xf32> to vector<1x32xf32>
    %8 = vector.extract_strided_slice %6 {offsets = [1, 0], sizes = [1, 32], strides = [1, 1]} : vector<6x32xf32> to vector<1x32xf32>
    %9 = vector.extract_strided_slice %6 {offsets = [2, 0], sizes = [1, 32], strides = [1, 1]} : vector<6x32xf32> to vector<1x32xf32>
    %10 = vector.extract_strided_slice %6 {offsets = [3, 0], sizes = [1, 32], strides = [1, 1]} : vector<6x32xf32> to vector<1x32xf32>
    %11 = vector.extract_strided_slice %6 {offsets = [4, 0], sizes = [1, 32], strides = [1, 1]} : vector<6x32xf32> to vector<1x32xf32>
    %12 = vector.extract_strided_slice %6 {offsets = [5, 0], sizes = [1, 32], strides = [1, 1]} : vector<6x32xf32> to vector<1x32xf32>
    %c0_6 = arith.constant 0 : index
    %c0_7 = arith.constant 0 : index
    %c0_8 = arith.constant 0 : index
    %13 = vector.load %arg3[%c0_6, %c0_7, %c0_8] : memref<1x32x96xbf16, #tpu.memory_space<vmem>>, vector<1x32x96xbf16>
    %14 = vector.shape_cast %13 : vector<1x32x96xbf16> to vector<32x96xbf16>
    %15 = arith.truncf %4 : vector<8x32xf32> to vector<8x32xbf16>
    %cst = arith.constant dense<0.000000e+00> : vector<8x96xf32>
    %16 = tpu.matmul %15, %14, %cst {dimension_numbers = #tpu.dot_dimension_numbers<[1], [0], [0], [1], [0, 0, 1, 1], [], []>} : vector<8x32xbf16>, vector<32x96xbf16>, vector<8x96xf32> -> vector<8x96xf32>
    %c0_9 = arith.constant 0 : index
    %c0_10 = arith.constant 0 : index
    %c0_11 = arith.constant 0 : index
    %17 = vector.load %arg4[%c0_9, %c0_10, %c0_11] : memref<1x1x96xf32, #tpu.memory_space<vmem>>, vector<1x1x96xf32>
    %18 = vector.shape_cast %17 : vector<1x1x96xf32> to vector<1x96xf32>
    %19 = vector.broadcast %18 : vector<1x96xf32> to vector<8x96xf32>
    %20 = arith.addf %16, %19 : vector<8x96xf32>
    %21 = vector.extract_strided_slice %20 {offsets = [0, 0], sizes = [8, 32], strides = [1, 1]} : vector<8x96xf32> to vector<8x32xf32>
    %22 = vector.extract_strided_slice %20 {offsets = [0, 32], sizes = [8, 32], strides = [1, 1]} : vector<8x96xf32> to vector<8x32xf32>
    %23 = vector.extract_strided_slice %20 {offsets = [0, 64], sizes = [8, 32], strides = [1, 1]} : vector<8x96xf32> to vector<8x32xf32>
    %24 = tpu.transpose %21, [1, 0] : vector<8x32xf32> -> vector<32x8xf32>
    %25 = vector.shape_cast %24 : vector<32x8xf32> to vector<4x8x8xf32>
    %26 = tpu.transpose %25, [0, 2, 1] : vector<4x8x8xf32> -> vector<4x8x8xf32>
    %27 = tpu.transpose %22, [1, 0] : vector<8x32xf32> -> vector<32x8xf32>
    %28 = vector.shape_cast %27 : vector<32x8xf32> to vector<4x8x8xf32>
    %29 = tpu.transpose %28, [0, 2, 1] : vector<4x8x8xf32> -> vector<4x8x8xf32>
    %30 = tpu.transpose %23, [1, 0] : vector<8x32xf32> -> vector<32x8xf32>
    %31 = vector.shape_cast %30 : vector<32x8xf32> to vector<4x8x8xf32>
    %32 = tpu.transpose %31, [0, 2, 1] : vector<4x8x8xf32> -> vector<4x8x8xf32>
    %33 = arith.truncf %26 : vector<4x8x8xf32> to vector<4x8x8xbf16>
    %34 = arith.truncf %29 : vector<4x8x8xf32> to vector<4x8x8xbf16>
    "tpu.trace_start"() <{level = 10 : i32, message = "htd,hsd->hts"}> : () -> ()
    %cst_12 = arith.constant dense<0.000000e+00> : vector<4x8x8xf32>
    %35 = tpu.matmul %33, %34, %cst_12 {dimension_numbers = #tpu.dot_dimension_numbers<[2], [2], [1], [1], [0, 0, 0, 1, 1, 1], [0], [0]>} : vector<4x8x8xbf16>, vector<4x8x8xbf16>, vector<4x8x8xf32> -> vector<4x8x8xf32>
    "tpu.trace_stop"() : () -> ()
    %cst_13 = arith.constant 0.353553385 : f32
    %36 = vector.broadcast %cst_13 : f32 to vector<4x8x8xf32>
    %37 = arith.mulf %35, %36 : vector<4x8x8xf32>
    %cst_14 = arith.constant dense<0xFF800000> : vector<4x8xf32>
    %38 = vector.multi_reduction <maximumf>, %37, %cst_14 [2] : vector<4x8x8xf32> to vector<4x8xf32>
    %39 = vector.shape_cast %38 : vector<4x8xf32> to vector<4x8x1xf32>
    %40 = vector.broadcast %39 : vector<4x8x1xf32> to vector<4x8x8xf32>
    %41 = arith.subf %37, %40 : vector<4x8x8xf32>
    %42 = math.exp %41 : vector<4x8x8xf32>
    %cst_15 = arith.constant dense<0.000000e+00> : vector<4x8xf32>
    %43 = vector.multi_reduction <add>, %42, %cst_15 [2] : vector<4x8x8xf32> to vector<4x8xf32>
    %44 = vector.shape_cast %43 : vector<4x8xf32> to vector<4x8x1xf32>
    %45 = tpu.reciprocal %44 {approx = true} : vector<4x8x1xf32> -> vector<4x8x1xf32>
    %46 = vector.broadcast %45 : vector<4x8x1xf32> to vector<4x8x8xf32>
    %47 = arith.mulf %42, %46 : vector<4x8x8xf32>
    %48 = arith.truncf %47 : vector<4x8x8xf32> to vector<4x8x8xbf16>
    %49 = arith.truncf %32 : vector<4x8x8xf32> to vector<4x8x8xbf16>
    "tpu.trace_start"() <{level = 10 : i32, message = "hts,hsd->htd"}> : () -> ()
    %cst_16 = arith.constant dense<0.000000e+00> : vector<4x8x8xf32>
    %50 = tpu.matmul %48, %49, %cst_16 {dimension_numbers = #tpu.dot_dimension_numbers<[2], [1], [1], [2], [0, 0, 0, 1, 1, 2], [0], [0]>} : vector<4x8x8xbf16>, vector<4x8x8xbf16>, vector<4x8x8xf32> -> vector<4x8x8xf32>
    "tpu.trace_stop"() : () -> ()
    %51 = tpu.transpose %50, [0, 2, 1] : vector<4x8x8xf32> -> vector<4x8x8xf32>
    %52 = vector.shape_cast %51 : vector<4x8x8xf32> to vector<32x8xf32>
    %53 = tpu.transpose %52, [1, 0] : vector<32x8xf32> -> vector<8x32xf32>
    %c0_17 = arith.constant 0 : index
    %c0_18 = arith.constant 0 : index
    %c0_19 = arith.constant 0 : index
    %54 = vector.load %arg5[%c0_17, %c0_18, %c0_19] : memref<1x32x32xbf16, #tpu.memory_space<vmem>>, vector<1x32x32xbf16>
    %55 = vector.shape_cast %54 : vector<1x32x32xbf16> to vector<32x32xbf16>
    %56 = arith.truncf %53 : vector<8x32xf32> to vector<8x32xbf16>
    %cst_20 = arith.constant dense<0.000000e+00> : vector<8x32xf32>
    %57 = tpu.matmul %56, %55, %cst_20 {dimension_numbers = #tpu.dot_dimension_numbers<[1], [0], [0], [1], [0, 0, 1, 1], [], []>} : vector<8x32xbf16>, vector<32x32xbf16>, vector<8x32xf32> -> vector<8x32xf32>
    %58 = vector.broadcast %7 : vector<1x32xf32> to vector<8x32xf32>
    %59 = arith.addf %57, %58 : vector<8x32xf32>
    %60 = arith.addf %4, %59 : vector<8x32xf32>
    %cst_21 = arith.constant dense<0.000000e+00> : vector<8xf32>
    %61 = vector.multi_reduction <add>, %60, %cst_21 [1] : vector<8x32xf32> to vector<8xf32>
    %62 = vector.shape_cast %61 : vector<8xf32> to vector<8x1xf32>
    %cst_22 = arith.constant 3.200000e+01 : f32
    %63 = vector.broadcast %cst_22 : f32 to vector<8x1xf32>
    %64 = arith.divf %62, %63 : vector<8x1xf32>
    %65 = vector.broadcast %64 : vector<8x1xf32> to vector<8x32xf32>
    %66 = arith.subf %60, %65 : vector<8x32xf32>
    %67 = arith.mulf %66, %66 : vector<8x32xf32>
    %cst_23 = arith.constant dense<0.000000e+00> : vector<8xf32>
    %68 = vector.multi_reduction <add>, %67, %cst_23 [1] : vector<8x32xf32> to vector<8xf32>
    %69 = vector.shape_cast %68 : vector<8xf32> to vector<8x1xf32>
    %cst_24 = arith.constant 3.200000e+01 : f32
    %70 = vector.broadcast %cst_24 : f32 to vector<8x1xf32>
    %71 = arith.divf %69, %70 : vector<8x1xf32>
    %cst_25 = arith.constant 9.99999974E-6 : f32
    %72 = vector.broadcast %cst_25 : f32 to vector<8x1xf32>
    %73 = arith.addf %71, %72 : vector<8x1xf32>
    %74 = math.rsqrt %73 : vector<8x1xf32>
    %75 = vector.broadcast %74 : vector<8x1xf32> to vector<8x32xf32>
    %76 = arith.mulf %66, %75 : vector<8x32xf32>
    %77 = vector.broadcast %9 : vector<1x32xf32> to vector<8x32xf32>
    %78 = arith.mulf %76, %77 : vector<8x32xf32>
    %79 = vector.broadcast %10 : vector<1x32xf32> to vector<8x32xf32>
    %80 = arith.addf %78, %79 : vector<8x32xf32>
    %c0_26 = arith.constant 0 : index
    %c0_27 = arith.constant 0 : index
    %c0_28 = arith.constant 0 : index
    %81 = vector.load %arg6[%c0_26, %c0_27, %c0_28] : memref<1x32x2048xbf16, #tpu.memory_space<vmem>>, vector<1x32x2048xbf16>
    %82 = vector.shape_cast %81 : vector<1x32x2048xbf16> to vector<32x2048xbf16>
    %83 = arith.truncf %80 : vector<8x32xf32> to vector<8x32xbf16>
    %cst_29 = arith.constant dense<0.000000e+00> : vector<8x2048xf32>
    %84 = tpu.matmul %83, %82, %cst_29 {dimension_numbers = #tpu.dot_dimension_numbers<[1], [0], [0], [1], [0, 0, 1, 1], [], []>} : vector<8x32xbf16>, vector<32x2048xbf16>, vector<8x2048xf32> -> vector<8x2048xf32>
    %c0_30 = arith.constant 0 : index
    %c0_31 = arith.constant 0 : index
    %c0_32 = arith.constant 0 : index
    %85 = vector.load %arg7[%c0_30, %c0_31, %c0_32] : memref<1x1x2048xf32, #tpu.memory_space<vmem>>, vector<1x1x2048xf32>
    %86 = vector.shape_cast %85 : vector<1x1x2048xf32> to vector<1x2048xf32>
    %87 = vector.broadcast %86 : vector<1x2048xf32> to vector<8x2048xf32>
    %88 = arith.addf %84, %87 : vector<8x2048xf32>
    %cst_33 = arith.constant 0.000000e+00 : f32
    %89 = vector.broadcast %cst_33 : f32 to vector<8x2048xf32>
    %90 = arith.maximumf %88, %89 : vector<8x2048xf32>
    %91 = arith.truncf %90 : vector<8x2048xf32> to vector<8x2048xbf16>
    %c0_34 = arith.constant 0 : index
    %c0_35 = arith.constant 0 : index
    %c0_36 = arith.constant 0 : index
    %92 = vector.load %arg8[%c0_34, %c0_35, %c0_36] : memref<1x2048x32xbf16, #tpu.memory_space<vmem>>, vector<1x2048x32xbf16>
    %93 = vector.shape_cast %92 : vector<1x2048x32xbf16> to vector<2048x32xbf16>
    %cst_37 = arith.constant dense<0.000000e+00> : vector<8x32xf32>
    %94 = tpu.matmul %91, %93, %cst_37 {dimension_numbers = #tpu.dot_dimension_numbers<[1], [0], [0], [1], [0, 0, 1, 1], [], []>} : vector<8x2048xbf16>, vector<2048x32xbf16>, vector<8x32xf32> -> vector<8x32xf32>
    %95 = vector.broadcast %8 : vector<1x32xf32> to vector<8x32xf32>
    %96 = arith.addf %94, %95 : vector<8x32xf32>
    %97 = arith.addf %80, %96 : vector<8x32xf32>
    %cst_38 = arith.constant dense<0.000000e+00> : vector<8xf32>
    %98 = vector.multi_reduction <add>, %97, %cst_38 [1] : vector<8x32xf32> to vector<8xf32>
    %99 = vector.shape_cast %98 : vector<8xf32> to vector<8x1xf32>
    %cst_39 = arith.constant 3.200000e+01 : f32
    %100 = vector.broadcast %cst_39 : f32 to vector<8x1xf32>
    %101 = arith.divf %99, %100 : vector<8x1xf32>
    %102 = vector.broadcast %101 : vector<8x1xf32> to vector<8x32xf32>
    %103 = arith.subf %97, %102 : vector<8x32xf32>
    %104 = arith.mulf %103, %103 : vector<8x32xf32>
    %cst_40 = arith.constant dense<0.000000e+00> : vector<8xf32>
    %105 = vector.multi_reduction <add>, %104, %cst_40 [1] : vector<8x32xf32> to vector<8xf32>
    %106 = vector.shape_cast %105 : vector<8xf32> to vector<8x1xf32>
    %cst_41 = arith.constant 3.200000e+01 : f32
    %107 = vector.broadcast %cst_41 : f32 to vector<8x1xf32>
    %108 = arith.divf %106, %107 : vector<8x1xf32>
    %cst_42 = arith.constant 9.99999974E-6 : f32
    %109 = vector.broadcast %cst_42 : f32 to vector<8x1xf32>
    %110 = arith.addf %108, %109 : vector<8x1xf32>
    %111 = math.rsqrt %110 : vector<8x1xf32>
    %112 = vector.broadcast %111 : vector<8x1xf32> to vector<8x32xf32>
    %113 = arith.mulf %103, %112 : vector<8x32xf32>
    %114 = vector.broadcast %11 : vector<1x32xf32> to vector<8x32xf32>
    %115 = arith.mulf %113, %114 : vector<8x32xf32>
    %116 = vector.broadcast %12 : vector<1x32xf32> to vector<8x32xf32>
    %117 = arith.addf %115, %116 : vector<8x32xf32>
    %c0_43 = arith.constant 0 : index
    %c0_44 = arith.constant 0 : index
    %c0_45 = arith.constant 0 : index
    %118 = vector.load %arg10[%c0_43, %c0_44, %c0_45] : memref<1x8x32xf32, #tpu.memory_space<vmem>>, vector<1x8x32xf32>
    %119 = vector.shape_cast %118 : vector<1x8x32xf32> to vector<8x32xf32>
    %120 = vector.shape_cast %117 : vector<8x32xf32> to vector<1x8x32xf32>
    tpu.vector_store %arg10[%c0_43, %c0_44, %c0_45], %120 {strides = array<i32>} : memref<1x8x32xf32, #tpu.memory_space<vmem>>, vector<1x8x32xf32>,
    return
  }
  func.func @transform_0(%arg0: i32, %arg1: i32) -> (i32, i32, i32) {
    %c0_i32 = arith.constant 0 : i32
    %c0_i32_0 = arith.constant 0 : i32
    %c0_i32_1 = arith.constant 0 : i32
    return %arg0, %c0_i32, %c0_i32_0 : i32, i32, i32
  }
  func.func @transform_1(%arg0: i32, %arg1: i32) -> (i32, i32, i32) {
    %c0_i32 = arith.constant 0 : i32
    %c0_i32_0 = arith.constant 0 : i32
    %c0_i32_1 = arith.constant 0 : i32
    return %arg1, %c0_i32, %c0_i32_0 : i32, i32, i32
  }
  func.func @transform_2(%arg0: i32, %arg1: i32) -> (i32, i32, i32) {
    %c0_i32 = arith.constant 0 : i32
    %c0_i32_0 = arith.constant 0 : i32
    %c0_i32_1 = arith.constant 0 : i32
    return %arg1, %c0_i32, %c0_i32_0 : i32, i32, i32
  }
  func.func @transform_3(%arg0: i32, %arg1: i32) -> (i32, i32, i32) {
    %c0_i32 = arith.constant 0 : i32
    %c0_i32_0 = arith.constant 0 : i32
    %c0_i32_1 = arith.constant 0 : i32
    return %arg1, %c0_i32, %c0_i32_0 : i32, i32, i32
  }
  func.func @transform_4(%arg0: i32, %arg1: i32) -> (i32, i32, i32) {
    %c0_i32 = arith.constant 0 : i32
    %c0_i32_0 = arith.constant 0 : i32
    %c0_i32_1 = arith.constant 0 : i32
    return %arg1, %c0_i32, %c0_i32_0 : i32, i32, i32
  }
  func.func @transform_5(%arg0: i32, %arg1: i32) -> (i32, i32, i32) {
    %c0_i32 = arith.constant 0 : i32
    %c0_i32_0 = arith.constant 0 : i32
    %c0_i32_1 = arith.constant 0 : i32
    return %arg1, %c0_i32, %c0_i32_0 : i32, i32, i32
  }
  func.func @transform_6(%arg0: i32, %arg1: i32) -> (i32, i32, i32) {
    %c0_i32 = arith.constant 0 : i32
    %c0_i32_0 = arith.constant 0 : i32
    %c0_i32_1 = arith.constant 0 : i32
    return %arg1, %c0_i32, %c0_i32_0 : i32, i32, i32
  }
  func.func @transform_7(%arg0: i32, %arg1: i32) -> (i32, i32, i32) {
    %c0_i32 = arith.constant 0 : i32
    %c0_i32_0 = arith.constant 0 : i32
    %c0_i32_1 = arith.constant 0 : i32
    return %arg1, %c0_i32, %c0_i32_0 : i32, i32, i32
  }
  func.func @transform_8(%arg0: i32, %arg1: i32) -> (i32, i32, i32) {
    %c0_i32 = arith.constant 0 : i32
    %c0_i32_0 = arith.constant 0 : i32
    %c0_i32_1 = arith.constant 0 : i32
    return %arg0, %c0_i32, %c0_i32_0 : i32, i32, i32
  }
}

module attributes {stable_mosaic.version = 11 : i64} {
  func.func @kernel(%arg0: i32, %arg1: i32, %arg2: memref<1x8x32xf32, #tpu.memory_space<vmem>>, %arg3: memref<1x8x32xf32, #tpu.memory_space<vmem>>, %arg4: memref<1x32x96xbf16, #tpu.memory_space<vmem>>, %arg5: memref<1x1x96xf32, #tpu.memory_space<vmem>>, %arg6: memref<1x32x32xbf16, #tpu.memory_space<vmem>>, %arg7: memref<1x32x32xbf16, #tpu.memory_space<vmem>>, %arg8: memref<1x32x64xbf16, #tpu.memory_space<vmem>>, %arg9: memref<1x1x64xf32, #tpu.memory_space<vmem>>, %arg10: memref<1x32x32xbf16, #tpu.memory_space<vmem>>, %arg11: memref<1x32x2048xbf16, #tpu.memory_space<vmem>>, %arg12: memref<1x1x2048xf32, #tpu.memory_space<vmem>>, %arg13: memref<1x2048x32xbf16, #tpu.memory_space<vmem>>, %arg14: memref<1x10x32xf32, #tpu.memory_space<vmem>>, %arg15: memref<1x8x32xf32, #tpu.memory_space<vmem>>) attributes {dimension_semantics = [#tpu.dimension_semantics<parallel>, #tpu.dimension_semantics<arbitrary>], iteration_bounds = array<i64: 2, 2>, scalar_prefetch = 0 : i64, scratch_operands = 0 : i64, tpu.core_type = #tpu.core_type<tc>, window_params = [{transform_indices = @transform_0, window_bounds = array<i64: 1, 8, 32>}, {transform_indices = @transform_1, window_bounds = array<i64: 1, 8, 32>}, {transform_indices = @transform_2, window_bounds = array<i64: 1, 32, 96>}, {transform_indices = @transform_3, window_bounds = array<i64: 1, 1, 96>}, {transform_indices = @transform_4, window_bounds = array<i64: 1, 32, 32>}, {transform_indices = @transform_5, window_bounds = array<i64: 1, 32, 32>}, {transform_indices = @transform_6, window_bounds = array<i64: 1, 32, 64>}, {transform_indices = @transform_7, window_bounds = array<i64: 1, 1, 64>}, {transform_indices = @transform_8, window_bounds = array<i64: 1, 32, 32>}, {transform_indices = @transform_9, window_bounds = array<i64: 1, 32, 2048>}, {transform_indices = @transform_10, window_bounds = array<i64: 1, 1, 2048>}, {transform_indices = @transform_11, window_bounds = array<i64: 1, 2048, 32>}, {transform_indices = @transform_12, window_bounds = array<i64: 1, 10, 32>}, {transform_indices = @transform_13, window_bounds = array<i64: 1, 8, 32>}]} {
    %c0_i32 = arith.constant 0 : i32
    %0 = arith.cmpi eq, %arg1, %c0_i32 : i32
    %1 = arith.extui %0 : i1 to i32
    %c0_i32_0 = arith.constant 0 : i32
    %2 = arith.cmpi ne, %1, %c0_i32_0 : i32
    scf.if %2 {
      %c0_74 = arith.constant 0 : index
      %c0_75 = arith.constant 0 : index
      %c0_76 = arith.constant 0 : index
      %200 = vector.load %arg2[%c0_74, %c0_75, %c0_76] : memref<1x8x32xf32, #tpu.memory_space<vmem>>, vector<1x8x32xf32>
      %201 = vector.shape_cast %200 : vector<1x8x32xf32> to vector<8x32xf32>
      %c0_77 = arith.constant 0 : index
      %c0_78 = arith.constant 0 : index
      %c0_79 = arith.constant 0 : index
      %202 = vector.load %arg15[%c0_77, %c0_78, %c0_79] : memref<1x8x32xf32, #tpu.memory_space<vmem>>, vector<1x8x32xf32>
      %203 = vector.shape_cast %202 : vector<1x8x32xf32> to vector<8x32xf32>
      %204 = vector.shape_cast %201 : vector<8x32xf32> to vector<1x8x32xf32>
      tpu.vector_store %arg15[%c0_77, %c0_78, %c0_79], %204 {strides = array<i32>} : memref<1x8x32xf32, #tpu.memory_space<vmem>>, vector<1x8x32xf32>,
    } else {
    }
    %c0 = arith.constant 0 : index
    %c0_1 = arith.constant 0 : index
    %c0_2 = arith.constant 0 : index
    %3 = vector.load %arg15[%c0, %c0_1, %c0_2] : memref<1x8x32xf32, #tpu.memory_space<vmem>>, vector<1x8x32xf32>
    %4 = vector.shape_cast %3 : vector<1x8x32xf32> to vector<8x32xf32>
    %c0_3 = arith.constant 0 : index
    %c0_4 = arith.constant 0 : index
    %c0_5 = arith.constant 0 : index
    %5 = vector.load %arg3[%c0_3, %c0_4, %c0_5] : memref<1x8x32xf32, #tpu.memory_space<vmem>>, vector<1x8x32xf32>
    %6 = vector.shape_cast %5 : vector<1x8x32xf32> to vector<8x32xf32>
    %c0_6 = arith.constant 0 : index
    %c0_7 = arith.constant 0 : index
    %c0_8 = arith.constant 0 : index
    %7 = vector.load %arg14[%c0_6, %c0_7, %c0_8] : memref<1x10x32xf32, #tpu.memory_space<vmem>>, vector<1x10x32xf32>
    %8 = vector.shape_cast %7 : vector<1x10x32xf32> to vector<10x32xf32>
    %9 = vector.extract_strided_slice %8 {offsets = [0, 0], sizes = [1, 32], strides = [1, 1]} : vector<10x32xf32> to vector<1x32xf32>
    %10 = vector.extract_strided_slice %8 {offsets = [1, 0], sizes = [1, 32], strides = [1, 1]} : vector<10x32xf32> to vector<1x32xf32>
    %11 = vector.extract_strided_slice %8 {offsets = [2, 0], sizes = [1, 32], strides = [1, 1]} : vector<10x32xf32> to vector<1x32xf32>
    %12 = vector.extract_strided_slice %8 {offsets = [3, 0], sizes = [1, 32], strides = [1, 1]} : vector<10x32xf32> to vector<1x32xf32>
    %13 = vector.extract_strided_slice %8 {offsets = [4, 0], sizes = [1, 32], strides = [1, 1]} : vector<10x32xf32> to vector<1x32xf32>
    %14 = vector.extract_strided_slice %8 {offsets = [5, 0], sizes = [1, 32], strides = [1, 1]} : vector<10x32xf32> to vector<1x32xf32>
    %15 = vector.extract_strided_slice %8 {offsets = [6, 0], sizes = [1, 32], strides = [1, 1]} : vector<10x32xf32> to vector<1x32xf32>
    %16 = vector.extract_strided_slice %8 {offsets = [7, 0], sizes = [1, 32], strides = [1, 1]} : vector<10x32xf32> to vector<1x32xf32>
    %17 = vector.extract_strided_slice %8 {offsets = [8, 0], sizes = [1, 32], strides = [1, 1]} : vector<10x32xf32> to vector<1x32xf32>
    %18 = vector.extract_strided_slice %8 {offsets = [9, 0], sizes = [1, 32], strides = [1, 1]} : vector<10x32xf32> to vector<1x32xf32>
    %c0_9 = arith.constant 0 : index
    %c0_10 = arith.constant 0 : index
    %c0_11 = arith.constant 0 : index
    %19 = vector.load %arg4[%c0_9, %c0_10, %c0_11] : memref<1x32x96xbf16, #tpu.memory_space<vmem>>, vector<1x32x96xbf16>
    %20 = vector.shape_cast %19 : vector<1x32x96xbf16> to vector<32x96xbf16>
    %21 = arith.truncf %4 : vector<8x32xf32> to vector<8x32xbf16>
    %cst = arith.constant dense<0.000000e+00> : vector<8x96xf32>
    %22 = tpu.matmul %21, %20, %cst {dimension_numbers = #tpu.dot_dimension_numbers<[1], [0], [0], [1], [0, 0, 1, 1], [], []>} : vector<8x32xbf16>, vector<32x96xbf16>, vector<8x96xf32> -> vector<8x96xf32>
    %c0_12 = arith.constant 0 : index
    %c0_13 = arith.constant 0 : index
    %c0_14 = arith.constant 0 : index
    %23 = vector.load %arg5[%c0_12, %c0_13, %c0_14] : memref<1x1x96xf32, #tpu.memory_space<vmem>>, vector<1x1x96xf32>
    %24 = vector.shape_cast %23 : vector<1x1x96xf32> to vector<1x96xf32>
    %25 = vector.broadcast %24 : vector<1x96xf32> to vector<8x96xf32>
    %26 = arith.addf %22, %25 : vector<8x96xf32>
    %27 = vector.extract_strided_slice %26 {offsets = [0, 0], sizes = [8, 32], strides = [1, 1]} : vector<8x96xf32> to vector<8x32xf32>
    %28 = vector.extract_strided_slice %26 {offsets = [0, 32], sizes = [8, 32], strides = [1, 1]} : vector<8x96xf32> to vector<8x32xf32>
    %29 = vector.extract_strided_slice %26 {offsets = [0, 64], sizes = [8, 32], strides = [1, 1]} : vector<8x96xf32> to vector<8x32xf32>
    %30 = tpu.transpose %27, [1, 0] : vector<8x32xf32> -> vector<32x8xf32>
    %31 = vector.shape_cast %30 : vector<32x8xf32> to vector<4x8x8xf32>
    %32 = tpu.transpose %31, [0, 2, 1] : vector<4x8x8xf32> -> vector<4x8x8xf32>
    %33 = tpu.transpose %28, [1, 0] : vector<8x32xf32> -> vector<32x8xf32>
    %34 = vector.shape_cast %33 : vector<32x8xf32> to vector<4x8x8xf32>
    %35 = tpu.transpose %34, [0, 2, 1] : vector<4x8x8xf32> -> vector<4x8x8xf32>
    %36 = tpu.transpose %29, [1, 0] : vector<8x32xf32> -> vector<32x8xf32>
    %37 = vector.shape_cast %36 : vector<32x8xf32> to vector<4x8x8xf32>
    %38 = tpu.transpose %37, [0, 2, 1] : vector<4x8x8xf32> -> vector<4x8x8xf32>
    %39 = arith.truncf %32 : vector<4x8x8xf32> to vector<4x8x8xbf16>
    %40 = arith.truncf %35 : vector<4x8x8xf32> to vector<4x8x8xbf16>
    "tpu.trace_start"() <{level = 10 : i32, message = "htd,hsd->hts"}> : () -> ()
    %cst_15 = arith.constant dense<0.000000e+00> : vector<4x8x8xf32>
    %41 = tpu.matmul %39, %40, %cst_15 {dimension_numbers = #tpu.dot_dimension_numbers<[2], [2], [1], [1], [0, 0, 0, 1, 1, 1], [0], [0]>} : vector<4x8x8xbf16>, vector<4x8x8xbf16>, vector<4x8x8xf32> -> vector<4x8x8xf32>
    "tpu.trace_stop"() : () -> ()
    %cst_16 = arith.constant 0.353553385 : f32
    %42 = vector.broadcast %cst_16 : f32 to vector<4x8x8xf32>
    %43 = arith.mulf %41, %42 : vector<4x8x8xf32>
    %cst_17 = arith.constant dense<0xFF800000> : vector<4x8xf32>
    %44 = vector.multi_reduction <maximumf>, %43, %cst_17 [2] : vector<4x8x8xf32> to vector<4x8xf32>
    %45 = vector.shape_cast %44 : vector<4x8xf32> to vector<4x8x1xf32>
    %46 = vector.broadcast %45 : vector<4x8x1xf32> to vector<4x8x8xf32>
    %47 = arith.subf %43, %46 : vector<4x8x8xf32>
    %48 = math.exp %47 : vector<4x8x8xf32>
    %cst_18 = arith.constant dense<0.000000e+00> : vector<4x8xf32>
    %49 = vector.multi_reduction <add>, %48, %cst_18 [2] : vector<4x8x8xf32> to vector<4x8xf32>
    %50 = vector.shape_cast %49 : vector<4x8xf32> to vector<4x8x1xf32>
    %51 = tpu.reciprocal %50 {approx = true} : vector<4x8x1xf32> -> vector<4x8x1xf32>
    %52 = vector.broadcast %51 : vector<4x8x1xf32> to vector<4x8x8xf32>
    %53 = arith.mulf %48, %52 : vector<4x8x8xf32>
    %54 = arith.truncf %53 : vector<4x8x8xf32> to vector<4x8x8xbf16>
    %55 = arith.truncf %38 : vector<4x8x8xf32> to vector<4x8x8xbf16>
    "tpu.trace_start"() <{level = 10 : i32, message = "hts,hsd->htd"}> : () -> ()
    %cst_19 = arith.constant dense<0.000000e+00> : vector<4x8x8xf32>
    %56 = tpu.matmul %54, %55, %cst_19 {dimension_numbers = #tpu.dot_dimension_numbers<[2], [1], [1], [2], [0, 0, 0, 1, 1, 2], [0], [0]>} : vector<4x8x8xbf16>, vector<4x8x8xbf16>, vector<4x8x8xf32> -> vector<4x8x8xf32>
    "tpu.trace_stop"() : () -> ()
    %57 = tpu.transpose %56, [0, 2, 1] : vector<4x8x8xf32> -> vector<4x8x8xf32>
    %58 = vector.shape_cast %57 : vector<4x8x8xf32> to vector<32x8xf32>
    %59 = tpu.transpose %58, [1, 0] : vector<32x8xf32> -> vector<8x32xf32>
    %c0_20 = arith.constant 0 : index
    %c0_21 = arith.constant 0 : index
    %c0_22 = arith.constant 0 : index
    %60 = vector.load %arg6[%c0_20, %c0_21, %c0_22] : memref<1x32x32xbf16, #tpu.memory_space<vmem>>, vector<1x32x32xbf16>
    %61 = vector.shape_cast %60 : vector<1x32x32xbf16> to vector<32x32xbf16>
    %62 = arith.truncf %59 : vector<8x32xf32> to vector<8x32xbf16>
    %cst_23 = arith.constant dense<0.000000e+00> : vector<8x32xf32>
    %63 = tpu.matmul %62, %61, %cst_23 {dimension_numbers = #tpu.dot_dimension_numbers<[1], [0], [0], [1], [0, 0, 1, 1], [], []>} : vector<8x32xbf16>, vector<32x32xbf16>, vector<8x32xf32> -> vector<8x32xf32>
    %64 = vector.broadcast %9 : vector<1x32xf32> to vector<8x32xf32>
    %65 = arith.addf %63, %64 : vector<8x32xf32>
    %66 = arith.addf %4, %65 : vector<8x32xf32>
    %cst_24 = arith.constant dense<0.000000e+00> : vector<8xf32>
    %67 = vector.multi_reduction <add>, %66, %cst_24 [1] : vector<8x32xf32> to vector<8xf32>
    %68 = vector.shape_cast %67 : vector<8xf32> to vector<8x1xf32>
    %cst_25 = arith.constant 3.200000e+01 : f32
    %69 = vector.broadcast %cst_25 : f32 to vector<8x1xf32>
    %70 = arith.divf %68, %69 : vector<8x1xf32>
    %71 = vector.broadcast %70 : vector<8x1xf32> to vector<8x32xf32>
    %72 = arith.subf %66, %71 : vector<8x32xf32>
    %73 = arith.mulf %72, %72 : vector<8x32xf32>
    %cst_26 = arith.constant dense<0.000000e+00> : vector<8xf32>
    %74 = vector.multi_reduction <add>, %73, %cst_26 [1] : vector<8x32xf32> to vector<8xf32>
    %75 = vector.shape_cast %74 : vector<8xf32> to vector<8x1xf32>
    %cst_27 = arith.constant 3.200000e+01 : f32
    %76 = vector.broadcast %cst_27 : f32 to vector<8x1xf32>
    %77 = arith.divf %75, %76 : vector<8x1xf32>
    %cst_28 = arith.constant 9.99999974E-6 : f32
    %78 = vector.broadcast %cst_28 : f32 to vector<8x1xf32>
    %79 = arith.addf %77, %78 : vector<8x1xf32>
    %80 = math.rsqrt %79 : vector<8x1xf32>
    %81 = vector.broadcast %80 : vector<8x1xf32> to vector<8x32xf32>
    %82 = arith.mulf %72, %81 : vector<8x32xf32>
    %83 = vector.broadcast %13 : vector<1x32xf32> to vector<8x32xf32>
    %84 = arith.mulf %82, %83 : vector<8x32xf32>
    %85 = vector.broadcast %14 : vector<1x32xf32> to vector<8x32xf32>
    %86 = arith.addf %84, %85 : vector<8x32xf32>
    %c0_29 = arith.constant 0 : index
    %c0_30 = arith.constant 0 : index
    %c0_31 = arith.constant 0 : index
    %87 = vector.load %arg7[%c0_29, %c0_30, %c0_31] : memref<1x32x32xbf16, #tpu.memory_space<vmem>>, vector<1x32x32xbf16>
    %88 = vector.shape_cast %87 : vector<1x32x32xbf16> to vector<32x32xbf16>
    %89 = arith.truncf %86 : vector<8x32xf32> to vector<8x32xbf16>
    %cst_32 = arith.constant dense<0.000000e+00> : vector<8x32xf32>
    %90 = tpu.matmul %89, %88, %cst_32 {dimension_numbers = #tpu.dot_dimension_numbers<[1], [0], [0], [1], [0, 0, 1, 1], [], []>} : vector<8x32xbf16>, vector<32x32xbf16>, vector<8x32xf32> -> vector<8x32xf32>
    %91 = vector.broadcast %10 : vector<1x32xf32> to vector<8x32xf32>
    %92 = arith.addf %90, %91 : vector<8x32xf32>
    %c0_33 = arith.constant 0 : index
    %c0_34 = arith.constant 0 : index
    %c0_35 = arith.constant 0 : index
    %93 = vector.load %arg8[%c0_33, %c0_34, %c0_35] : memref<1x32x64xbf16, #tpu.memory_space<vmem>>, vector<1x32x64xbf16>
    %94 = vector.shape_cast %93 : vector<1x32x64xbf16> to vector<32x64xbf16>
    %95 = arith.truncf %6 : vector<8x32xf32> to vector<8x32xbf16>
    %cst_36 = arith.constant dense<0.000000e+00> : vector<8x64xf32>
    %96 = tpu.matmul %95, %94, %cst_36 {dimension_numbers = #tpu.dot_dimension_numbers<[1], [0], [0], [1], [0, 0, 1, 1], [], []>} : vector<8x32xbf16>, vector<32x64xbf16>, vector<8x64xf32> -> vector<8x64xf32>
    %c0_37 = arith.constant 0 : index
    %c0_38 = arith.constant 0 : index
    %c0_39 = arith.constant 0 : index
    %97 = vector.load %arg9[%c0_37, %c0_38, %c0_39] : memref<1x1x64xf32, #tpu.memory_space<vmem>>, vector<1x1x64xf32>
    %98 = vector.shape_cast %97 : vector<1x1x64xf32> to vector<1x64xf32>
    %99 = vector.broadcast %98 : vector<1x64xf32> to vector<8x64xf32>
    %100 = arith.addf %96, %99 : vector<8x64xf32>
    %101 = vector.extract_strided_slice %100 {offsets = [0, 0], sizes = [8, 32], strides = [1, 1]} : vector<8x64xf32> to vector<8x32xf32>
    %102 = vector.extract_strided_slice %100 {offsets = [0, 32], sizes = [8, 32], strides = [1, 1]} : vector<8x64xf32> to vector<8x32xf32>
    %103 = tpu.transpose %92, [1, 0] : vector<8x32xf32> -> vector<32x8xf32>
    %104 = vector.shape_cast %103 : vector<32x8xf32> to vector<4x8x8xf32>
    %105 = tpu.transpose %104, [0, 2, 1] : vector<4x8x8xf32> -> vector<4x8x8xf32>
    %106 = tpu.transpose %101, [1, 0] : vector<8x32xf32> -> vector<32x8xf32>
    %107 = vector.shape_cast %106 : vector<32x8xf32> to vector<4x8x8xf32>
    %108 = tpu.transpose %107, [0, 2, 1] : vector<4x8x8xf32> -> vector<4x8x8xf32>
    %109 = tpu.transpose %102, [1, 0] : vector<8x32xf32> -> vector<32x8xf32>
    %110 = vector.shape_cast %109 : vector<32x8xf32> to vector<4x8x8xf32>
    %111 = tpu.transpose %110, [0, 2, 1] : vector<4x8x8xf32> -> vector<4x8x8xf32>
    %112 = arith.truncf %105 : vector<4x8x8xf32> to vector<4x8x8xbf16>
    %113 = arith.truncf %108 : vector<4x8x8xf32> to vector<4x8x8xbf16>
    "tpu.trace_start"() <{level = 10 : i32, message = "htd,hsd->hts"}> : () -> ()
    %cst_40 = arith.constant dense<0.000000e+00> : vector<4x8x8xf32>
    %114 = tpu.matmul %112, %113, %cst_40 {dimension_numbers = #tpu.dot_dimension_numbers<[2], [2], [1], [1], [0, 0, 0, 1, 1, 1], [0], [0]>} : vector<4x8x8xbf16>, vector<4x8x8xbf16>, vector<4x8x8xf32> -> vector<4x8x8xf32>
    "tpu.trace_stop"() : () -> ()
    %cst_41 = arith.constant 0.353553385 : f32
    %115 = vector.broadcast %cst_41 : f32 to vector<4x8x8xf32>
    %116 = arith.mulf %114, %115 : vector<4x8x8xf32>
    %cst_42 = arith.constant dense<0xFF800000> : vector<4x8xf32>
    %117 = vector.multi_reduction <maximumf>, %116, %cst_42 [2] : vector<4x8x8xf32> to vector<4x8xf32>
    %118 = vector.shape_cast %117 : vector<4x8xf32> to vector<4x8x1xf32>
    %119 = vector.broadcast %118 : vector<4x8x1xf32> to vector<4x8x8xf32>
    %120 = arith.subf %116, %119 : vector<4x8x8xf32>
    %121 = math.exp %120 : vector<4x8x8xf32>
    %cst_43 = arith.constant dense<0.000000e+00> : vector<4x8xf32>
    %122 = vector.multi_reduction <add>, %121, %cst_43 [2] : vector<4x8x8xf32> to vector<4x8xf32>
    %123 = vector.shape_cast %122 : vector<4x8xf32> to vector<4x8x1xf32>
    %124 = tpu.reciprocal %123 {approx = true} : vector<4x8x1xf32> -> vector<4x8x1xf32>
    %125 = vector.broadcast %124 : vector<4x8x1xf32> to vector<4x8x8xf32>
    %126 = arith.mulf %121, %125 : vector<4x8x8xf32>
    %127 = arith.truncf %126 : vector<4x8x8xf32> to vector<4x8x8xbf16>
    %128 = arith.truncf %111 : vector<4x8x8xf32> to vector<4x8x8xbf16>
    "tpu.trace_start"() <{level = 10 : i32, message = "hts,hsd->htd"}> : () -> ()
    %cst_44 = arith.constant dense<0.000000e+00> : vector<4x8x8xf32>
    %129 = tpu.matmul %127, %128, %cst_44 {dimension_numbers = #tpu.dot_dimension_numbers<[2], [1], [1], [2], [0, 0, 0, 1, 1, 2], [0], [0]>} : vector<4x8x8xbf16>, vector<4x8x8xbf16>, vector<4x8x8xf32> -> vector<4x8x8xf32>
    "tpu.trace_stop"() : () -> ()
    %130 = tpu.transpose %129, [0, 2, 1] : vector<4x8x8xf32> -> vector<4x8x8xf32>
    %131 = vector.shape_cast %130 : vector<4x8x8xf32> to vector<32x8xf32>
    %132 = tpu.transpose %131, [1, 0] : vector<32x8xf32> -> vector<8x32xf32>
    %c0_45 = arith.constant 0 : index
    %c0_46 = arith.constant 0 : index
    %c0_47 = arith.constant 0 : index
    %133 = vector.load %arg10[%c0_45, %c0_46, %c0_47] : memref<1x32x32xbf16, #tpu.memory_space<vmem>>, vector<1x32x32xbf16>
    %134 = vector.shape_cast %133 : vector<1x32x32xbf16> to vector<32x32xbf16>
    %135 = arith.truncf %132 : vector<8x32xf32> to vector<8x32xbf16>
    %cst_48 = arith.constant dense<0.000000e+00> : vector<8x32xf32>
    %136 = tpu.matmul %135, %134, %cst_48 {dimension_numbers = #tpu.dot_dimension_numbers<[1], [0], [0], [1], [0, 0, 1, 1], [], []>} : vector<8x32xbf16>, vector<32x32xbf16>, vector<8x32xf32> -> vector<8x32xf32>
    %137 = vector.broadcast %11 : vector<1x32xf32> to vector<8x32xf32>
    %138 = arith.addf %136, %137 : vector<8x32xf32>
    %139 = arith.addf %86, %138 : vector<8x32xf32>
    %cst_49 = arith.constant dense<0.000000e+00> : vector<8xf32>
    %140 = vector.multi_reduction <add>, %139, %cst_49 [1] : vector<8x32xf32> to vector<8xf32>
    %141 = vector.shape_cast %140 : vector<8xf32> to vector<8x1xf32>
    %cst_50 = arith.constant 3.200000e+01 : f32
    %142 = vector.broadcast %cst_50 : f32 to vector<8x1xf32>
    %143 = arith.divf %141, %142 : vector<8x1xf32>
    %144 = vector.broadcast %143 : vector<8x1xf32> to vector<8x32xf32>
    %145 = arith.subf %139, %144 : vector<8x32xf32>
    %146 = arith.mulf %145, %145 : vector<8x32xf32>
    %cst_51 = arith.constant dense<0.000000e+00> : vector<8xf32>
    %147 = vector.multi_reduction <add>, %146, %cst_51 [1] : vector<8x32xf32> to vector<8xf32>
    %148 = vector.shape_cast %147 : vector<8xf32> to vector<8x1xf32>
    %cst_52 = arith.constant 3.200000e+01 : f32
    %149 = vector.broadcast %cst_52 : f32 to vector<8x1xf32>
    %150 = arith.divf %148, %149 : vector<8x1xf32>
    %cst_53 = arith.constant 9.99999974E-6 : f32
    %151 = vector.broadcast %cst_53 : f32 to vector<8x1xf32>
    %152 = arith.addf %150, %151 : vector<8x1xf32>
    %153 = math.rsqrt %152 : vector<8x1xf32>
    %154 = vector.broadcast %153 : vector<8x1xf32> to vector<8x32xf32>
    %155 = arith.mulf %145, %154 : vector<8x32xf32>
    %156 = vector.broadcast %15 : vector<1x32xf32> to vector<8x32xf32>
    %157 = arith.mulf %155, %156 : vector<8x32xf32>
    %158 = vector.broadcast %16 : vector<1x32xf32> to vector<8x32xf32>
    %159 = arith.addf %157, %158 : vector<8x32xf32>
    %c0_54 = arith.constant 0 : index
    %c0_55 = arith.constant 0 : index
    %c0_56 = arith.constant 0 : index
    %160 = vector.load %arg11[%c0_54, %c0_55, %c0_56] : memref<1x32x2048xbf16, #tpu.memory_space<vmem>>, vector<1x32x2048xbf16>
    %161 = vector.shape_cast %160 : vector<1x32x2048xbf16> to vector<32x2048xbf16>
    %162 = arith.truncf %159 : vector<8x32xf32> to vector<8x32xbf16>
    %cst_57 = arith.constant dense<0.000000e+00> : vector<8x2048xf32>
    %163 = tpu.matmul %162, %161, %cst_57 {dimension_numbers = #tpu.dot_dimension_numbers<[1], [0], [0], [1], [0, 0, 1, 1], [], []>} : vector<8x32xbf16>, vector<32x2048xbf16>, vector<8x2048xf32> -> vector<8x2048xf32>
    %c0_58 = arith.constant 0 : index
    %c0_59 = arith.constant 0 : index
    %c0_60 = arith.constant 0 : index
    %164 = vector.load %arg12[%c0_58, %c0_59, %c0_60] : memref<1x1x2048xf32, #tpu.memory_space<vmem>>, vector<1x1x2048xf32>
    %165 = vector.shape_cast %164 : vector<1x1x2048xf32> to vector<1x2048xf32>
    %166 = vector.broadcast %165 : vector<1x2048xf32> to vector<8x2048xf32>
    %167 = arith.addf %163, %166 : vector<8x2048xf32>
    %cst_61 = arith.constant 0.000000e+00 : f32
    %168 = vector.broadcast %cst_61 : f32 to vector<8x2048xf32>
    %169 = arith.maximumf %167, %168 : vector<8x2048xf32>
    %170 = arith.truncf %169 : vector<8x2048xf32> to vector<8x2048xbf16>
    %c0_62 = arith.constant 0 : index
    %c0_63 = arith.constant 0 : index
    %c0_64 = arith.constant 0 : index
    %171 = vector.load %arg13[%c0_62, %c0_63, %c0_64] : memref<1x2048x32xbf16, #tpu.memory_space<vmem>>, vector<1x2048x32xbf16>
    %172 = vector.shape_cast %171 : vector<1x2048x32xbf16> to vector<2048x32xbf16>
    %cst_65 = arith.constant dense<0.000000e+00> : vector<8x32xf32>
    %173 = tpu.matmul %170, %172, %cst_65 {dimension_numbers = #tpu.dot_dimension_numbers<[1], [0], [0], [1], [0, 0, 1, 1], [], []>} : vector<8x2048xbf16>, vector<2048x32xbf16>, vector<8x32xf32> -> vector<8x32xf32>
    %174 = vector.broadcast %12 : vector<1x32xf32> to vector<8x32xf32>
    %175 = arith.addf %173, %174 : vector<8x32xf32>
    %176 = arith.addf %159, %175 : vector<8x32xf32>
    %cst_66 = arith.constant dense<0.000000e+00> : vector<8xf32>
    %177 = vector.multi_reduction <add>, %176, %cst_66 [1] : vector<8x32xf32> to vector<8xf32>
    %178 = vector.shape_cast %177 : vector<8xf32> to vector<8x1xf32>
    %cst_67 = arith.constant 3.200000e+01 : f32
    %179 = vector.broadcast %cst_67 : f32 to vector<8x1xf32>
    %180 = arith.divf %178, %179 : vector<8x1xf32>
    %181 = vector.broadcast %180 : vector<8x1xf32> to vector<8x32xf32>
    %182 = arith.subf %176, %181 : vector<8x32xf32>
    %183 = arith.mulf %182, %182 : vector<8x32xf32>
    %cst_68 = arith.constant dense<0.000000e+00> : vector<8xf32>
    %184 = vector.multi_reduction <add>, %183, %cst_68 [1] : vector<8x32xf32> to vector<8xf32>
    %185 = vector.shape_cast %184 : vector<8xf32> to vector<8x1xf32>
    %cst_69 = arith.constant 3.200000e+01 : f32
    %186 = vector.broadcast %cst_69 : f32 to vector<8x1xf32>
    %187 = arith.divf %185, %186 : vector<8x1xf32>
    %cst_70 = arith.constant 9.99999974E-6 : f32
    %188 = vector.broadcast %cst_70 : f32 to vector<8x1xf32>
    %189 = arith.addf %187, %188 : vector<8x1xf32>
    %190 = math.rsqrt %189 : vector<8x1xf32>
    %191 = vector.broadcast %190 : vector<8x1xf32> to vector<8x32xf32>
    %192 = arith.mulf %182, %191 : vector<8x32xf32>
    %193 = vector.broadcast %17 : vector<1x32xf32> to vector<8x32xf32>
    %194 = arith.mulf %192, %193 : vector<8x32xf32>
    %195 = vector.broadcast %18 : vector<1x32xf32> to vector<8x32xf32>
    %196 = arith.addf %194, %195 : vector<8x32xf32>
    %c0_71 = arith.constant 0 : index
    %c0_72 = arith.constant 0 : index
    %c0_73 = arith.constant 0 : index
    %197 = vector.load %arg15[%c0_71, %c0_72, %c0_73] : memref<1x8x32xf32, #tpu.memory_space<vmem>>, vector<1x8x32xf32>
    %198 = vector.shape_cast %197 : vector<1x8x32xf32> to vector<8x32xf32>
    %199 = vector.shape_cast %196 : vector<8x32xf32> to vector<1x8x32xf32>
    tpu.vector_store %arg15[%c0_71, %c0_72, %c0_73], %199 {strides = array<i32>} : memref<1x8x32xf32, #tpu.memory_space<vmem>>, vector<1x8x32xf32>,
    return
  }
  func.func @transform_0(%arg0: i32, %arg1: i32) -> (i32, i32, i32) {
    %c0_i32 = arith.constant 0 : i32
    %c0_i32_0 = arith.constant 0 : i32
    %c0_i32_1 = arith.constant 0 : i32
    return %arg0, %c0_i32, %c0_i32_0 : i32, i32, i32
  }
  func.func @transform_1(%arg0: i32, %arg1: i32) -> (i32, i32, i32) {
    %c0_i32 = arith.constant 0 : i32
    %c0_i32_0 = arith.constant 0 : i32
    %c0_i32_1 = arith.constant 0 : i32
    return %arg0, %c0_i32, %c0_i32_0 : i32, i32, i32
  }
  func.func @transform_2(%arg0: i32, %arg1: i32) -> (i32, i32, i32) {
    %c0_i32 = arith.constant 0 : i32
    %c0_i32_0 = arith.constant 0 : i32
    %c0_i32_1 = arith.constant 0 : i32
    return %arg1, %c0_i32, %c0_i32_0 : i32, i32, i32
  }
  func.func @transform_3(%arg0: i32, %arg1: i32) -> (i32, i32, i32) {
    %c0_i32 = arith.constant 0 : i32
    %c0_i32_0 = arith.constant 0 : i32
    %c0_i32_1 = arith.constant 0 : i32
    return %arg1, %c0_i32, %c0_i32_0 : i32, i32, i32
  }
  func.func @transform_4(%arg0: i32, %arg1: i32) -> (i32, i32, i32) {
    %c0_i32 = arith.constant 0 : i32
    %c0_i32_0 = arith.constant 0 : i32
    %c0_i32_1 = arith.constant 0 : i32
    return %arg1, %c0_i32, %c0_i32_0 : i32, i32, i32
  }
  func.func @transform_5(%arg0: i32, %arg1: i32) -> (i32, i32, i32) {
    %c0_i32 = arith.constant 0 : i32
    %c0_i32_0 = arith.constant 0 : i32
    %c0_i32_1 = arith.constant 0 : i32
    return %arg1, %c0_i32, %c0_i32_0 : i32, i32, i32
  }
  func.func @transform_6(%arg0: i32, %arg1: i32) -> (i32, i32, i32) {
    %c0_i32 = arith.constant 0 : i32
    %c0_i32_0 = arith.constant 0 : i32
    %c0_i32_1 = arith.constant 0 : i32
    return %arg1, %c0_i32, %c0_i32_0 : i32, i32, i32
  }
  func.func @transform_7(%arg0: i32, %arg1: i32) -> (i32, i32, i32) {
    %c0_i32 = arith.constant 0 : i32
    %c0_i32_0 = arith.constant 0 : i32
    %c0_i32_1 = arith.constant 0 : i32
    return %arg1, %c0_i32, %c0_i32_0 : i32, i32, i32
  }
  func.func @transform_8(%arg0: i32, %arg1: i32) -> (i32, i32, i32) {
    %c0_i32 = arith.constant 0 : i32
    %c0_i32_0 = arith.constant 0 : i32
    %c0_i32_1 = arith.constant 0 : i32
    return %arg1, %c0_i32, %c0_i32_0 : i32, i32, i32
  }
  func.func @transform_9(%arg0: i32, %arg1: i32) -> (i32, i32, i32) {
    %c0_i32 = arith.constant 0 : i32
    %c0_i32_0 = arith.constant 0 : i32
    %c0_i32_1 = arith.constant 0 : i32
    return %arg1, %c0_i32, %c0_i32_0 : i32, i32, i32
  }
  func.func @transform_10(%arg0: i32, %arg1: i32) -> (i32, i32, i32) {
    %c0_i32 = arith.constant 0 : i32
    %c0_i32_0 = arith.constant 0 : i32
    %c0_i32_1 = arith.constant 0 : i32
    return %arg1, %c0_i32, %c0_i32_0 : i32, i32, i32
  }
  func.func @transform_11(%arg0: i32, %arg1: i32) -> (i32, i32, i32) {
    %c0_i32 = arith.constant 0 : i32
    %c0_i32_0 = arith.constant 0 : i32
    %c0_i32_1 = arith.constant 0 : i32
    return %arg1, %c0_i32, %c0_i32_0 : i32, i32, i32
  }
  func.func @transform_12(%arg0: i32, %arg1: i32) -> (i32, i32, i32) {
    %c0_i32 = arith.constant 0 : i32
    %c0_i32_0 = arith.constant 0 : i32
    %c0_i32_1 = arith.constant 0 : i32
    return %arg1, %c0_i32, %c0_i32_0 : i32, i32, i32
  }
  func.func @transform_13(%arg0: i32, %arg1: i32) -> (i32, i32, i32) {
    %c0_i32 = arith.constant 0 : i32
    %c0_i32_0 = arith.constant 0 : i32
    %c0_i32_1 = arith.constant 0 : i32
    return %arg0, %c0_i32, %c0_i32_0 : i32, i32, i32
  }
}

module attributes {stable_mosaic.version = 11 : i64} {
  func.func @_vocab_proj_kernel(%arg0: i32, %arg1: memref<16x32xf32, #tpu.memory_space<vmem>>, %arg2: memref<32x128xbf16, #tpu.memory_space<vmem>>, %arg3: memref<1x128xf32, #tpu.memory_space<vmem>>, %arg4: memref<16x128xf32, #tpu.memory_space<vmem>>) attributes {dimension_semantics = [#tpu.dimension_semantics<parallel>], iteration_bounds = array<i64: 1>, scalar_prefetch = 0 : i64, scratch_operands = 0 : i64, tpu.core_type = #tpu.core_type<tc>, window_params = [{pipeline_mode = #tpu.pipeline_mode<synchronous>, transform_indices = @transform_0, window_bounds = array<i64: 16, 32>}, {transform_indices = @transform_1, window_bounds = array<i64: 32, 128>}, {transform_indices = @transform_2, window_bounds = array<i64: 1, 128>}, {transform_indices = @transform_3, window_bounds = array<i64: 16, 128>}]} {
    %c0 = arith.constant 0 : index
    %c0_0 = arith.constant 0 : index
    %0 = vector.load %arg1[%c0, %c0_0] : memref<16x32xf32, #tpu.memory_space<vmem>>, vector<16x32xf32>
    %1 = arith.truncf %0 : vector<16x32xf32> to vector<16x32xbf16>
    %c0_1 = arith.constant 0 : index
    %c0_2 = arith.constant 0 : index
    %2 = vector.load %arg2[%c0_1, %c0_2] : memref<32x128xbf16, #tpu.memory_space<vmem>>, vector<32x128xbf16>
    %cst = arith.constant dense<0.000000e+00> : vector<16x128xf32>
    %3 = tpu.matmul %1, %2, %cst {dimension_numbers = #tpu.dot_dimension_numbers<[1], [0], [0], [1], [0, 0, 1, 1], [], []>} : vector<16x32xbf16>, vector<32x128xbf16>, vector<16x128xf32> -> vector<16x128xf32>
    %c0_3 = arith.constant 0 : index
    %c0_4 = arith.constant 0 : index
    %4 = vector.load %arg3[%c0_3, %c0_4] : memref<1x128xf32, #tpu.memory_space<vmem>>, vector<1x128xf32>
    %5 = vector.broadcast %4 : vector<1x128xf32> to vector<16x128xf32>
    %6 = arith.addf %3, %5 : vector<16x128xf32>
    %c0_5 = arith.constant 0 : index
    %c0_6 = arith.constant 0 : index
    %7 = vector.load %arg4[%c0_5, %c0_6] : memref<16x128xf32, #tpu.memory_space<vmem>>, vector<16x128xf32>
    tpu.vector_store %arg4[%c0_5, %c0_6], %6 {strides = array<i32>} : memref<16x128xf32, #tpu.memory_space<vmem>>, vector<16x128xf32>,
    return
  }
  func.func @transform_0(%arg0: i32) -> (i32, i32) {
    %c0_i32 = arith.constant 0 : i32
    %c0_i32_0 = arith.constant 0 : i32
    %c0_i32_1 = arith.constant 0 : i32
    return %c0_i32, %c0_i32_0 : i32, i32
  }
  func.func @transform_1(%arg0: i32) -> (i32, i32) {
    %c0_i32 = arith.constant 0 : i32
    %c0_i32_0 = arith.constant 0 : i32
    return %c0_i32, %arg0 : i32, i32
  }
  func.func @transform_2(%arg0: i32) -> (i32, i32) {
    %c0_i32 = arith.constant 0 : i32
    %c0_i32_0 = arith.constant 0 : i32
    return %c0_i32, %arg0 : i32, i32
  }
  func.func @transform_3(%arg0: i32) -> (i32, i32) {
    %c0_i32 = arith.constant 0 : i32
    %c0_i32_0 = arith.constant 0 : i32
    return %c0_i32, %arg0 : i32, i32
  }
}

</mosaic_0001>

<bundles_post_ra>
// kernel: forward.5
= control target key start
LH: loop header
LB: loop body
LE: loop exit
PB: predicated region body
PF: predicated region fallthrough
CT: control target
= control target key end

     0   :  { %v111_v0 = vmov 0.0   ;;  %vm112_vm0 = vmmov 0   ;;  %vm41_vm1 = vcmask 261120   ;;  %s154_s1 = inlined_call_operand.vmem [shape: bf16[32,128], index: 1, kind: input, shape index: {}]   ;;  %s155_s0 = inlined_call_operand.vmem [shape: f32[16,32], index: 0, kind: input, shape index: {}]   ;;  %s156_s2 = inlined_call_operand.vmem [shape: f32[1,128], index: 2, kind: input, shape index: {}]   ;;  %s157_s3 = inlined_call_operand.vmem [shape: f32[16,128], index: 3, kind: output, shape index: {}]  }
   0x1   :  { %99 = vmatprep.subr.bf16.mxu0 %v111_v0  ;;  %v109_v1 = vld [vmem:[%s154_s1] sm:$0xff]   ;;  %103 = vmatprep.mubr.msk.bf16.mxu0 %vm112_vm0, %v111_v0  ;;  %v110_v2 = vld [vmem:[%s154_s1 + $0x8] sm:$0xff]  }
   0x2   :  { %100 = vmatpush3.bf16.msra.mxu0 %v109_v1  ;;  %v15_v3 = vld [vmem:[%s155_s0] sm:$0xff]  ;;  %v16_v4 = vld [vmem:[%s155_s0 + $0x8] sm:$0xff] }
   0x3   :  { %101 = vmatprep.subr.bf16.mxu0 %v111_v0  ;;  %v17_v5 = vpack.c.bf16 %v16_v4, %v15_v3  ;;  %v92_v6 = vld [vmem:[%s156_s2] ss:$0 sm:$0xff] }
   0x6   :  { %102 = vmatpush3.bf16.msra.mxu0 %v110_v2 }
   0x9   :  { %104 = vmatmul.mubr.msk.bf16.vlgmr.msra.gmra.mrb[0].mxu0 %vm41_vm1, %v17_v5 }
  0xdc   :  { %v79_v7 = vpop.f32.mrb[0].mxu0 }
  0xdd   :  { %v80_v8 = vadd.f32 %v92_v6, %v79_v7  ;;  %v105_v9 = vpop.f32.mrb[1].mxu0 }
  0xde   :  { %v82_v10 = vpop.f32.mrb[2].mxu0 }
  0xdf   :  { %86 = vst [vmem:[%s157_s3] sm:$0xff] %v80_v8  ;;  %v83_v11 = vadd.f32 %v92_v6, %v82_v10  ;;  %v106_v12 = vpop.f32.mrb[3].mxu0 }
  0xe1   :  { %87 = vst [vmem:[%s157_s3 + $0x8] sm:$0xff] %v83_v11 }

// kernel: forward.3
= control target key start
LH: loop header
LB: loop body
LE: loop exit
PB: predicated region body
PF: predicated region fallthrough
CT: control target
= control target key end

     0   :  { %s4618_s27 = smov 0   ;;  %s4620_s28 = smov 0   ;;  %s5101_s0 = inlined_call_operand.vmem [shape: f32[2,8,32], index: 0, kind: input, shape index: {}]   ;;  %s5102_s1 = inlined_call_operand.vmem [shape: bf16[2,32,96], index: 1, kind: input, shape index: {}]   ;;  %s5103_s2 = inlined_call_operand.vmem [shape: f32[2,1,96], index: 2, kind: input, shape index: {}]   ;;  %s5104_s3 = inlined_call_operand.vmem [shape: bf16[2,32,32], index: 3, kind: input, shape index: {}]   ;;  %s5105_s4 = inlined_call_operand.vmem [shape: bf16[2,32,2048], index: 4, kind: input, shape index: {}]   ;;  %s5106_s5 = inlined_call_operand.vmem [shape: f32[2,1,2048], index: 5, kind: input, shape index: {}]   ;;  %s5107_s6 = inlined_call_operand.vmem [shape: bf16[2,2048,32], index: 6, kind: input, shape index: {}]   ;;  %s5108_s7 = inlined_call_operand.vmem [shape: f32[2,6,32], index: 7, kind: input, shape index: {}]   ;;  %s5109_s8 = inlined_call_operand.vmem [shape: f32[2,8,32], index: 8, kind: output, shape index: {}]  }
   0x1   :  { %5110 = sst [smem:[#allocation4_spill]] %s5101_s0  ;;  %s4622_s29 = smov 0  }
   0x2   :  { %5111 = sst [smem:[#allocation5_spill]] %s5102_s1  ;;  %s4624_s30 = smov 0  }
   0x3   :  { %5112 = sst [smem:[#allocation6_spill]] %s5104_s3  ;;  %s4626_s9 = smov 0  }
   0x4 LB: > { %s27_s10 = sadd.s32 1, %s4558_s29  ;;  %s30_s11 = sadd.s32 1, %s4562_s30  ;;  %s4566_s9 = sphi %s4626_s9, %s18_s9   ;;  %s4562_s30 = sphi %s4624_s30, %s5124_s30   ;;  %s4558_s29 = sphi %s4622_s29, %s5123_s29   ;;  %s4554_s28 = sphi %s4620_s28, %s5122_s28   ;;  %s4550_s27 = sphi %s4618_s27, %s5121_s27  }
   0x5   : > { %p28_p0 = scmp.ge.s32.totalorder %s27_s10, 2  ;;  %p3851_p1 = scmp.ge.s32.totalorder %s4566_s9, 1 }
   0x6   : > { %p339_p2 = scmp.lt.s32.totalorder %s4566_s9, 5 }
   0x7   : > { %s5126_s10 = smov (%p28_p0, %s27_s10), 0  ;;  %s5128_s11 = smov (!%p28_p0, %s30_s11), %s4562_s30 }
   0x8   : > { %5113 = sst [smem:[#allocation2_spill]] %s5126_s10  ;;  %p340_p3 = pnand %p3851_p1, %p339_p2 }
   0x9   : > { %p32_p4 = scmp.ge.s32.totalorder %s5128_s11, 2  ;;  %p402_p5 = scmp.lt.s32.totalorder (!%p340_p3), %s4554_s28, 1 }
   0xa   : > { %343 = sbr.rel (%p340_p3) target bundleno = 3128 (0xc38), region = 52  ;;  %p406_p6 = scmp.lt.s32.totalorder (!%p340_p3), %s4550_s27, 1 }
   0xb   : > { %s5130_s11 = smov (%p32_p4, %s5128_s11), 0  ;;  %s5115_s0 = sld [smem:[#allocation4_spill]] (!%p340_p3) }
   0xc   : > { %5114 = sst [smem:[#allocation3_spill]] %s5130_s11  ;;  %s5116_s1 = sld [smem:[#allocation5_spill]] (!%p340_p3) }
   0xd   : > { %s5117_s3 = sld [smem:[#allocation6_spill]] (!%p340_p3)  ;;  %p3864_p7 = scmp.ne.s32.totalorder (!%p340_p3), %s4550_s27, 0 }
  0x11   : > { %s5132_s28 = smov (!%p402_p5, %s4554_s28), 1  ;;  %vm447_vm0 = vcmask (!%p3864_p7), 261120  }
  0x12   : > { %s4652_s12 = scalar_select %p406_p6, %s4550_s27, 1 }
  0x13   : > { %s3852_s13 = sshll.u32 %s5132_s28, 3  ;;  %445 = sbr.rel (%p3864_p7) target bundleno = 27 (0x1b), region = 56 }
  0x14   : > { %s405_s16 = scalar_lea.vmem %s5115_s0, %s3852_s13  ;;  %s4050_s17 = sshll.u32 %s4652_s12, 4 }
  0x15   : > { %s410_s20 = scalar_lea.vmem %s5116_s1, %s4050_s17  ;;  %s4668_s26 = scalar_lea.vmem %s5117_s3, %s4050_s17  ;;  %v446_v0 = vld [vmem:[%s405_s16] sm:$0xff] (!%p3864_p7) }
  0x16   : > { %s4052_s11 = sshll.u32 %s4652_s12, 8  ;;  %s4679_s18 = scalar_lea.vmem %s5106_s5, %s4050_s17 }
  0x17   : > { %s4674_s14 = scalar_lea.vmem %s5105_s4, %s4052_s11  ;;  %s4053_s19 = sshll.u32 %s4652_s12, 10 }
  0x18   : > { %s3862_s1 = sshll.u32 %s4652_s12, 3  ;;  %s4686_s23 = scalar_lea.vmem %s5107_s6, %s4053_s19 }
  0x19   : > { %s4691_s3 = scalar_lea.vmem %s5108_s7, %s3862_s1  ;;  %s4696_s28 = scalar_lea.vmem %s5109_s8, %s3852_s13 }
  0x1a   : > { %448 = vst.msk [vmem:[%s4696_s28] sm:$0xff] %vm447_vm0, %v446_v0 }
  0x1b PF: > { %v4375_v1 = vld [vmem:[%s410_s20] sm:$0xff]   ;;  %v4568_v2 = vmov 0.0   ;;  %v4376_v3 = vld [vmem:[%s410_s20 + $0x8] sm:$0xff]   ;;  %vm4569_vm1 = vmmov 0   ;;  %vm475_vm2 = vcmask 261120   ;;  %s5118_s27 = scalar_lea.vmem %s5103_s2, %s4652_s12  ;;  %s4570_s13 = smov 96  }
  0x1c   : > { %4252 = vmatprep.subr.bf16.mxu0 %v4568_v2  ;;  %4260 = vmatprep.subr.bf16.mxu1 %v4568_v2  ;;  %v3865_v6 = vld [vmem:[%s5118_s27] ss:$0 sm:$0xff]  ;;  %vm1014_vm3 = vcmask 64512   ;;  %s4571_s12 = smov 64   ;;  %vm1258_vm4 = vcmask 1043456  }
  0x1d   : > { %4253 = vmatpush3.bf16.msra.mxu0 %v4375_v1  ;;  %4256 = vmatprep.mubr.msk.bf16.mxu0 %vm4569_vm1, %v4568_v2 }
  0x1e   : > { %4254 = vmatprep.subr.bf16.mxu0 %v4568_v2  ;;  %4262 = vmatprep.mubr.msk.bf16.mxu1 %vm4569_vm1, %v4568_v2 }
  0x21   : > { %v4705_v4 = vld [vmem:[%s4696_s28] sm:$0xff]  ;;  %4255 = vmatpush3.bf16.msra.mxu0 %v4376_v3 }
  0x22   : > { %v455_v5 = vpack.c.bf16 %v4705_v4, %v4705_v4  ;;  %4266 = vmatprep.subr.bf16.mxu0 %v4568_v2 }
  0x24   : > { %4257 = vmatmul.mubr.msk.bf16.vlgmr.msra.gmra.mrb[0].mxu0 %vm475_vm2, %v455_v5 }
  0x25   : > { %4268 = vmatprep.mubr.msk.bf16.mxu0 %vm4569_vm1, %v4568_v2 }
  0xf7   : > { %v513_v7 = vpop.f32.mrb[0].mxu0 }
  0xf8   : > { %v4721_v8 = vadd.f32 %v3865_v6, %v513_v7  ;;  %v4258_v9 = vpop.f32.mrb[1].mxu0 }
  0xf9   : > { %v516_v10 = vpop.f32.mrb[2].mxu0 }
  0xfa   : > { %519 = vxpose.xlu1.b32.start.end [1/1] (short) (narrow) %v4721_v8, 32  ;;  %680 = vrot.lane.b32.xlu0 %v4721_v8, %s4570_s13  ;;  %v4259_v11 = vpop.f32.mrb[3].mxu0 }
 0x16c   : > { %v681_v12 = vpop.permute.xlu0 %680 }
 0x16d   : > { %683 = vxpose.xlu0.b32.start.end [1/1] (short) (narrow) %v681_v12, 32 }
 0x17a   : > { %v535_v15 = vpop.trf.xlu1 }
 0x17e   : > { %v536_v18 = vpop.trf.xlu1 }
 0x182   : > { %v537_v21 = vpop.trf.xlu1 }
 0x186   : > { %v538_v22 = vpop.trf.xlu1 }
 0x1ed   : > { %v699_v13 = vpop.trf.xlu0 }
 0x1ee   : > { %715 = vxpose.xlu1.b32.start.end [1/1] (short) (narrow) %v699_v13, 8 }
 0x1f1   : > { %v700_v14 = vpop.trf.xlu0 }
 0x1f2   : > { %747 = vxpose.xlu1.b32.start.end [1/1] (short) (narrow) %v700_v14, 8 }
 0x1f5   : > { %v701_v16 = vpop.trf.xlu0 }
 0x1f6   : > { %v4361_v17 = vpack.i.bf16 %v701_v16, %v535_v15 }
 0x1f8   : > { %4362 = vxpose.xlu1.b32.start.end [1/1] (short) (narrow) %v4361_v17, 8 }
 0x1f9   : > { %v702_v19 = vpop.trf.xlu0 }
 0x1fa   : > { %v4368_v20 = vpack.i.bf16 %v702_v19, %v536_v18 }
 0x1fc   : > { %4369 = vxpose.xlu1.b32.start.end [1/1] (short) (narrow) %v4368_v20, 8 }
 0x200   : > { %615 = vxpose.xlu1.b32.start.end [1/1] (short) (narrow) %v537_v21, 8 }
 0x204   : > { %647 = vxpose.xlu1.b32.start.end [1/1] (short) (narrow) %v538_v22, 8 }
 0x26e   : > { %v731_v23 = vpop.trf.xlu1 }
 0x26f   : > { %v1010_v24 = vpack.c.bf16 %v731_v23, %v731_v23 }
 0x271   : > { %v1019_v25 = vsel %vm1014_vm3, %v1010_v24, 0 }
 0x272   : > { %4261 = vmatpush3.bf16.xpose.msra.mxu1 %v1019_v25  ;;  %v763_v26 = vpop.trf.xlu1 }
 0x273   : > { %v1011_v27 = vpack.c.bf16 %v763_v26, %v763_v26  ;;  %4272 = vmatprep.subr.bf16.mxu1 %v4568_v2 }
 0x275   : > { %v1065_v28 = vsel %vm1014_vm3, %v1011_v27, 0 }
 0x276   : > { %4267 = vmatpush3.bf16.xpose.msra.mxu0 %v1065_v28 }
 0x277   : > { %4278 = vmatprep.subr.bf16.mxu0 %v4568_v2 }
 0x278   : > { %v4363_v29 = vpop.trf.xlu1 }
 0x279   : > { %v4367_v30 = vunpack.i.h.bf16 %v4363_v29  ;;  %v4364_v31 = vunpack.i.l.bf16 %v4363_v29 }
 0x27b   : > { %v1006_v32 = vpack.c.bf16 %v4364_v31, %v4364_v31  ;;  %v1012_v33 = vpack.c.bf16 %v4367_v30, %v4367_v30 }
 0x27c   : > { %v4370_v34 = vpop.trf.xlu1 }
 0x27d   : > { %v4374_v35 = vunpack.i.h.bf16 %v4370_v34  ;;  %v4371_v36 = vunpack.i.l.bf16 %v4370_v34  ;;  %4263 = vmatmul.mubr.msk.bf16.vlgmr.msra.gmra.mrb[0].mxu1 %vm1014_vm3, %v1006_v32  ;;  %v1111_v37 = vsel %vm1014_vm3, %v1012_v33, 0 }
 0x27e   : > { %4274 = vmatprep.mubr.msk.bf16.mxu1 %vm4569_vm1, %v4568_v2  ;;  %4273 = vmatpush3.bf16.xpose.msra.mxu1 %v1111_v37 }
 0x27f   : > { %v1007_v38 = vpack.c.bf16 %v4371_v36, %v4371_v36  ;;  %v1013_v39 = vpack.c.bf16 %v4374_v35, %v4374_v35  ;;  %4284 = vmatprep.subr.bf16.mxu1 %v4568_v2 }
 0x280   : > { %v631_v40 = vpop.trf.xlu1 }
 0x281   : > { %4269 = vmatmul.mubr.msk.bf16.vlgmr.msra.gmra.mrb[4].mxu0 %vm1014_vm3, %v1007_v38  ;;  %v1157_v41 = vsel %vm1014_vm3, %v1013_v39, 0  ;;  %v1008_v42 = vpack.c.bf16 %v631_v40, %v631_v40 }
 0x282   : > { %4279 = vmatpush3.bf16.xpose.msra.mxu0 %v1157_v41  ;;  %4280 = vmatprep.mubr.msk.bf16.mxu0 %vm4569_vm1, %v4568_v2 }
 0x283   : > { %4290 = vmatprep.subr.bf16.mxu0 %v4568_v2 }
 0x284   : > { %v663_v43 = vpop.trf.xlu1 }
 0x285   : > { %v1009_v44 = vpack.c.bf16 %v663_v43, %v663_v43  ;;  %4275 = vmatmul.mubr.msk.bf16.vlgmr.msra.gmra.mrb[4].mxu1 %vm1014_vm3, %v1008_v42 }
 0x286   : > { %4286 = vmatprep.mubr.msk.bf16.mxu1 %vm4569_vm1, %v4568_v2 }
 0x289   : > { %4281 = vmatmul.mubr.msk.bf16.vlgmr.msra.gmra.mrb[8].mxu0 %vm1014_vm3, %v1009_v44 }
 0x28a   : > { %4292 = vmatprep.mubr.msk.bf16.mxu0 %vm4569_vm1, %v4568_v2 }
 0x350   : > { %v1055_v45 = vpop.f32.mrb[0].mxu1 }
 0x351   : > { %v1199_v46 = vmul.f32 0.35355338, %v1055_v45  ;;  %v4264_v47 = vpop.f32.mrb[1].mxu1 }
 0x352   : > { %v1058_v48 = vpop.f32.mrb[2].mxu1 }
 0x353   : > { %v4265_v49 = vpop.f32.mrb[3].mxu1  ;;  %v1203_v50 = vsel %vm1014_vm3, %v1199_v46, -inf }
 0x354   : > { %1204 = vmax.xlane.f32.xlu0 %v1203_v50  ;;  %v1101_v51 = vpop.f32.mrb[4].mxu0 }
 0x355   : > { %v1200_v52 = vmul.f32 0.35355338, %v1101_v51  ;;  %v4270_v53 = vpop.f32.mrb[5].mxu0 }
 0x356   : > { %v1104_v54 = vpop.f32.mrb[6].mxu0 }
 0x357   : > { %v4271_v55 = vpop.f32.mrb[7].mxu0  ;;  %v1206_v56 = vsel %vm1014_vm3, %v1200_v52, -inf }
 0x358   : > { %1207 = vmax.xlane.f32.xlu1 %v1206_v56  ;;  %v1147_v57 = vpop.f32.mrb[4].mxu1 }
 0x359   : > { %v1201_v58 = vmul.f32 0.35355338, %v1147_v57  ;;  %v4276_v59 = vpop.f32.mrb[5].mxu1 }
 0x35a   : > { %v1150_v60 = vpop.f32.mrb[6].mxu1 }
 0x35b   : > { %v4277_v61 = vpop.f32.mrb[7].mxu1  ;;  %v1209_v62 = vsel %vm1014_vm3, %v1201_v58, -inf }
 0x35c   : > { %v1193_v63 = vpop.f32.mrb[8].mxu0  ;;  %1210 = vmax.xlane.f32.xlu1 %v1209_v62 }
 0x35d   : > { %v1202_v0 = vmul.f32 0.35355338, %v1193_v63  ;;  %v4282_v1 = vpop.f32.mrb[9].mxu0 }
 0x35e   : > { %v1196_v3 = vpop.f32.mrb[10].mxu0 }
 0x35f   : > { %v4283_v5 = vpop.f32.mrb[11].mxu0  ;;  %v1212_v6 = vsel %vm1014_vm3, %v1202_v0, -inf }
 0x360   : > { %1213 = vmax.xlane.f32.xlu1 %v1212_v6 }
 0x371   : > { %843 = vrot.lane.b32.xlu1 %v4721_v8, %s4571_s12 }
 0x3e1   : > { %v1205_v16 = vpop.xlane.xlu0 %1204 }
 0x3e2   : > { %v1215_v17 = vsub.f32 %v1199_v46, %v1205_v16  ;;  %v4378_v16 = vld [vmem:[%s4668_s26 + $0x8] sm:$0xff]  }
 0x3e4   : > { %v1219_v18 = vmul.f32 1.442695, %v1215_v17 }
 0x3e5   : > { %v1208_v7 = vpop.xlane.xlu1 %1207 }
 0x3e6   : > { %v1216_v19 = vsub.f32 %v1200_v52, %v1208_v7 }
 0x3e8   : > { %v1221_v8 = vmul.f32 1.442695, %v1216_v19 }
 0x3e9   : > { %v1211_v9 = vpop.xlane.xlu1 %1210 }
 0x3ea   : > { %v1217_v20 = vsub.f32 %v1201_v58, %v1211_v9 }
 0x3ec   : > { %v1223_v21 = vmul.f32 1.442695, %v1217_v20 }
 0x3ed   : > { %v1214_v10 = vpop.xlane.xlu1 %1213 }
 0x3ee   : > { %v1218_v11 = vsub.f32 %v1202_v0, %v1214_v10 }
 0x3f0   : > { %v1225_v12 = vmul.f32 1.442695, %v1218_v11 }
 0x3f1   : > { %v844_v13 = vpop.permute.xlu1 %843 }
 0x3f2   : > { %4507 = vpow2.f32 %v1225_v12  ;;  %846 = vxpose.xlu0.b32.start.end [1/1] (short) (narrow) %v844_v13, 32 }
 0x3f3   : > { %4509 = vpow2.f32 %v1219_v18 }
 0x3f4   : > { %4511 = vpow2.f32 %v1221_v8 }
 0x3f5   : > { %4513 = vpow2.f32 %v1223_v21 }
 0x3fc   : > { %v4750_v14 = vpop.eup %4507 }
 0x3fd   : > { %v1236_v15 = vsel %vm1014_vm3, %v4750_v14, 0.0  ;;  %v4510_v22 = vpop.eup %4509 }
 0x3fe   : > { %1237 = vadd.xlane.f32.xlu1 %v1236_v15  ;;  %v1227_v23 = vsel %vm1014_vm3, %v4510_v22, 0.0  ;;  %v4512_v24 = vpop.eup %4511 }
 0x3ff   : > { %v1230_v25 = vsel %vm1014_vm3, %v4512_v24, 0.0  ;;  %v4514_v26 = vpop.eup %4513 }
 0x400   : > { %v1233_v27 = vsel %vm1014_vm3, %v4514_v26, 0.0 }
 0x42b   : > { %1228 = vadd.xlane.f32.xlu0 %v1227_v23 }
 0x42f   : > { %1231 = vadd.xlane.f32.xlu0 %v1230_v25 }
 0x433   : > { %1234 = vadd.xlane.f32.xlu0 %v1233_v27 }
 0x472   : > { %v862_v28 = vpop.trf.xlu0 }
 0x473   : > { %878 = vxpose.xlu1.b32.start.end [1/1] (short) (narrow) %v862_v28, 8 }
 0x476   : > { %v863_v29 = vpop.trf.xlu0 }
 0x477   : > { %910 = vxpose.xlu0.b32.start.end [1/1] (short) (narrow) %v863_v29, 8 }
 0x47a   : > { %v864_v30 = vpop.trf.xlu0 }
 0x47b   : > { %942 = vxpose.xlu0.b32.start.end [1/1] (short) (narrow) %v864_v30, 8 }
 0x47e   : > { %v865_v31 = vpop.trf.xlu0 }
 0x47f   : > { %974 = vxpose.xlu0.b32.start.end [1/1] (short) (narrow) %v865_v31, 8 }
 0x48b   : > { %v1238_v35 = vpop.xlane.xlu1 %1237 }
 0x4b8   : > { %v1229_v32 = vpop.xlane.xlu0 %1228 }
 0x4b9   : > { %4515 = vrcp.f32 %v1229_v32 }
 0x4bc   : > { %v1232_v33 = vpop.xlane.xlu0 %1231 }
 0x4bd   : > { %4517 = vrcp.f32 %v1232_v33 }
 0x4c0   : > { %v1235_v34 = vpop.xlane.xlu0 %1234 }
 0x4c1   : > { %4519 = vrcp.f32 %v1235_v34 }
 0x4c2   : > { %4521 = vrcp.f32 %v1238_v35 }
 0x4c3   : > { %v4516_v36 = vpop.eup %4515 }
 0x4c4   : > { %v1243_v38 = vmul.f32 %v4516_v36, %v4510_v22  ;;  %v1605_v22 = vlaneseq }
 0x4c6   : > { %v1247_v45 = vpack.c.bf16 %v1243_v38, %v1243_v38  ;;  %v4779_v23 = vshrl.u32 %v1605_v22, 7  ;;  %v1689_v38 = vld [vmem:[%s4674_s14] sm:$0xff] }
 0x4c7   : > { %v4518_v40 = vpop.eup %4517 }
 0x4c8   : > { %v1244_v43 = vmul.f32 %v4518_v40, %v4512_v24  ;;  %v4782_v24 = vsub.s32 0, %v4779_v23  ;;  %v1690_v40 = vld [vmem:[%s4674_s14 + $0x8] sm:$0xff] }
 0x4ca   : > { %v1248_v51 = vpack.c.bf16 %v1244_v43, %v1244_v43 }
 0x4cb   : > { %v4520_v46 = vpop.eup %4519 }
 0x4cc   : > { %v1245_v49 = vmul.f32 %v4520_v46, %v4514_v26  ;;  %v4522_v52 = vpop.eup %4521  ;;  %v1713_v46 = vld [vmem:[%s4674_s14 + $0xc0] sm:$0xff] }
 0x4cd   : > { %v1246_v55 = vmul.f32 %v4522_v52, %v4750_v14  ;;  %v4377_v14 = vld [vmem:[%s4668_s26] sm:$0xff]  }
 0x4ce   : > { %v1249_v57 = vpack.c.bf16 %v1245_v49, %v1245_v49  ;;  %v1714_v49 = vld [vmem:[%s4674_s14 + $0xc8] sm:$0xff] }
 0x4cf   : > { %v1250_v59 = vpack.c.bf16 %v1246_v55, %v1246_v55  ;;  %v1692_v55 = vld [vmem:[%s4674_s14 + $0x18] sm:$0xff] }
 0x4f3   : > { %v894_v37 = vpop.trf.xlu1 }
 0x4f4   : > { %v1251_v39 = vpack.c.bf16 %v894_v37, %v894_v37 }
 0x4f6   : > { %v1260_v41 = vsel %vm1258_vm4, %v1251_v39, 0  ;;  %v1697_v39 = vld [vmem:[%s4674_s14 + $0x40] sm:$0xff] }
 0x4f7   : > { %4285 = vmatpush3.bf16.msra.mxu1 %v1260_v41  ;;  %v926_v42 = vpop.trf.xlu0  ;;  %v3881_v41 = vcombine.high %v1689_v38, %v1697_v39 }
 0x4f8   : > { %v1252_v44 = vpack.c.bf16 %v926_v42, %v926_v42  ;;  %4296 = vmatprep.subr.bf16.mxu1 %v4568_v2  ;;  %v1698_v42 = vld [vmem:[%s4674_s14 + $0x48] sm:$0xff] }
 0x4f9   : > { %v3882_v43 = vcombine.low %v1690_v40, %v1698_v42 }
 0x4fa   : > { %v1306_v47 = vsel %vm1258_vm4, %v1252_v44, 0  ;;  %4287 = vmatmul.mubr.msk.bf16.vlgmr.msra.gmra.mrb[8].mxu1 %vm1014_vm3, %v1247_v45  ;;  %v3883_v44 = vcombine.high %v1690_v40, %v1698_v42  ;;  %v1705_v45 = vld [vmem:[%s4674_s14 + $0x80] sm:$0xff] }
 0x4fb   : > { %4291 = vmatpush3.bf16.msra.mxu0 %v1306_v47  ;;  %v958_v48 = vpop.trf.xlu0  ;;  %4298 = vmatprep.mubr.msk.bf16.mxu1 %vm4569_vm1, %v4568_v2  ;;  %v1706_v47 = vld [vmem:[%s4674_s14 + $0x88] sm:$0xff] }
 0x4fc   : > { %v1253_v50 = vpack.c.bf16 %v958_v48, %v958_v48  ;;  %4302 = vmatprep.subr.bf16.mxu0 %v4568_v2  ;;  %v3897_v48 = vcombine.high %v1705_v45, %v1713_v46  ;;  %v3899_v52 = vcombine.high %v1706_v47, %v1714_v49 }
 0x4fe   : > { %v1352_v53 = vsel %vm1258_vm4, %v1253_v50, 0  ;;  %4293 = vmatmul.mubr.msk.bf16.vlgmr.msra.gmra.mrb[12].mxu0 %vm1014_vm3, %v1248_v51  ;;  %v3896_v50 = vcombine.low %v1705_v45, %v1713_v46  ;;  %v3898_v51 = vcombine.low %v1706_v47, %v1714_v49  ;;  %v1720_v45 = vld [vmem:[%s4674_s14 + $0xf8] sm:$0xff] }
 0x4ff   : > { %4297 = vmatpush3.bf16.msra.mxu1 %v1352_v53  ;;  %v990_v54 = vpop.trf.xlu0  ;;  %4304 = vmatprep.mubr.msk.bf16.mxu0 %vm4569_vm1, %v4568_v2  ;;  %v1691_v53 = vld [vmem:[%s4674_s14 + $0x10] sm:$0xff] }
 0x500   : > { %v1254_v56 = vpack.c.bf16 %v990_v54, %v990_v54  ;;  %4308 = vmatprep.subr.bf16.mxu1 %v4568_v2  ;;  %v1699_v54 = vld [vmem:[%s4674_s14 + $0x50] sm:$0xff] }
 0x502   : > { %v1398_v58 = vsel %vm1258_vm4, %v1254_v56, 0  ;;  %4299 = vmatmul.mubr.msk.bf16.vlgmr.msra.gmra.mrb[12].mxu1 %vm1014_vm3, %v1249_v57  ;;  %v3885_v56 = vcombine.high %v1691_v53, %v1699_v54  ;;  %v1700_v57 = vld [vmem:[%s4674_s14 + $0x58] sm:$0xff] }
 0x503   : > { %4303 = vmatpush3.bf16.msra.mxu0 %v1398_v58  ;;  %4312 = vmatprep.mubr.msk.bf16.mxu1 %vm4569_vm1, %v4568_v2  ;;  %v4572_v58 = vmov 0  }
 0x504   : > { %4309 = vmatpush3.bf16.msra.mxu1 %v4377_v14  ;;  %1969 = vmatprep.subr.bf16.mxu0 %v3881_v41  ;;  %v1716_v14 = vld [vmem:[%s4674_s14 + $0xd8] sm:$0xff] }
 0x505   : > { %4310 = vmatprep.subr.bf16.mxu1 %v4568_v2  ;;  %v4785_v2 = vld [vmem:[%s4691_s3] sm:$0x3f] }
 0x506   : > { %4305 = vmatmul.mubr.msk.bf16.vlgmr.msra.gmra.mrb[16].mxu0 %vm1014_vm3, %v1250_v59  ;;  %v1608_v25 = vrot.slane %v4785_v2, %v4782_v24  ;;  %v3884_v59 = vcombine.low %v1691_v53, %v1699_v54  ;;  %v4380_v53 = vld [vmem:[%s4686_s23 + $0xc0] sm:$0xff]  }
 0x507   : > { %2001 = vmatprep.mubr.bf16.mxu0 %v4572_v58  ;;  %v4381_v54 = vld [vmem:[%s4686_s23] sm:$0xff]  }
 0x508   : > { %4311 = vmatpush3.bf16.msra.mxu1 %v4378_v16 }
 0x509   : > { %2010 = vmatprep.subr.bf16.mxu1 %v3883_v44  ;;  %v1712_v44 = vld [vmem:[%s4674_s14 + $0xb8] sm:$0xff] }
 0x50a   : > { %v3911_v49 = vcombine.high %v1712_v44, %v1720_v45 }
 0x5cd   : > { %v1296_v60 = vpop.f32.mrb[8].mxu1 }
 0x5ce   : > { %1440 = vxpose.xlu0.b32.start.end [1/1] (short) (narrow) %v1296_v60, 8  ;;  %v4288_v61 = vpop.f32.mrb[9].mxu1  ;;  %v3886_v60 = vcombine.low %v1692_v55, %v1700_v57 }
 0x5cf   : > { %v1299_v62 = vpop.f32.mrb[10].mxu1  ;;  %v3887_v61 = vcombine.high %v1692_v55, %v1700_v57  ;;  %v4382_v55 = vld [vmem:[%s4686_s23 + $0x80] sm:$0xff]   ;;  %v4384_v57 = vld [vmem:[%s4686_s23 + $0xc8] sm:$0xff]  }
 0x5d0   : > { %v4289_v63 = vpop.f32.mrb[11].mxu1 }
 0x5d1   : > { %v1342_v0 = vpop.f32.mrb[12].mxu0 }
 0x5d2   : > { %1472 = vxpose.xlu0.b32.start.end [1/1] (short) (narrow) %v1342_v0, 8  ;;  %v4294_v1 = vpop.f32.mrb[13].mxu0 }
 0x5d3   : > { %v1345_v3 = vpop.f32.mrb[14].mxu0  ;;  %v4807_v1 = vsub.s32 2, %v4779_v23 }
 0x5d4   : > { %v4295_v5 = vpop.f32.mrb[15].mxu0  ;;  %v4810_v3 = vsub.s32 3, %v4779_v23 }
 0x5d5   : > { %v1388_v6 = vpop.f32.mrb[12].mxu1  ;;  %v1682_v5 = vrot.slane %v4785_v2, %v4807_v1 }
 0x5d6   : > { %v4300_v7 = vpop.f32.mrb[13].mxu1  ;;  %1504 = vxpose.xlu0.b32.start.end [1/1] (short) (narrow) %v1388_v6, 8 }
 0x5d7   : > { %v1391_v9 = vpop.f32.mrb[14].mxu1  ;;  %v1687_v7 = vrot.slane %v4785_v2, %v4810_v3 }
 0x5d8   : > { %v4301_v10 = vpop.f32.mrb[15].mxu1 }
 0x5d9   : > { %v1434_v11 = vpop.f32.mrb[16].mxu0 }
 0x5da   : > { %1536 = vxpose.xlu0.b32.start.end [1/1] (short) (narrow) %v1434_v11, 8  ;;  %v4306_v12 = vpop.f32.mrb[17].mxu0  ;;  %v1707_v11 = vld [vmem:[%s4674_s14 + $0x90] sm:$0xff] }
 0x5db   : > { %v1437_v13 = vpop.f32.mrb[18].mxu0  ;;  %v1715_v12 = vld [vmem:[%s4674_s14 + $0xd0] sm:$0xff] }
 0x5dc   : > { %v4307_v15 = vpop.f32.mrb[19].mxu0  ;;  %v1708_v13 = vld [vmem:[%s4674_s14 + $0x98] sm:$0xff]  ;;  %v3900_v22 = vcombine.low %v1707_v11, %v1715_v12 }
 0x5dd   : > { %v3902_v2 = vcombine.low %v1708_v13, %v1716_v14 }
 0x64e   : > { %v1456_v17 = vpop.trf.xlu0 }
 0x64f   : > { %1568 = vxpose.xlu0.b32.start [1/4] (short) (narrow) %v1456_v17, 8  ;;  %v3901_v17 = vcombine.high %v1707_v11, %v1715_v12  ;;  %v4397_v11 = vld [vmem:[%s4686_s23 + $0x20] sm:$0xff]  }
 0x650   : > { %v4398_v12 = vld [vmem:[%s4686_s23 + $0xa0] sm:$0xff]  }
 0x652   : > { %v1488_v18 = vpop.trf.xlu0 }
 0x653   : > { %1569 = vxpose.xlu0.b32.cont [2/4] (short) (narrow) %v1488_v18, 8  ;;  %v3903_v18 = vcombine.high %v1708_v13, %v1716_v14  ;;  %v4399_v13 = vld [vmem:[%s4686_s23 + $0x68] sm:$0xff]  }
 0x654   : > { %v4400_v14 = vld [vmem:[%s4686_s23 + $0xe8] sm:$0xff]  }
 0x656   : > { %v1520_v19 = vpop.trf.xlu0 }
 0x657   : > { %1570 = vxpose.xlu0.b32.cont [3/4] (short) (narrow) %v1520_v19, 8  ;;  %v1693_v19 = vld [vmem:[%s4674_s14 + $0x20] sm:$0xff] }
 0x65a   : > { %v1552_v8 = vpop.trf.xlu0 }
 0x65b   : > { %1571 = vxpose.xlu0.b32.end [4/4] (short) (narrow) %v1552_v8, 8  ;;  %v1701_v8 = vld [vmem:[%s4674_s14 + $0x60] sm:$0xff] }
 0x6cf   : > { %v1584_v20 = vpop.trf.xlu0 }
 0x6d0   : > { %v1604_v21 = vpack.c.bf16 %v1584_v20, %v1584_v20  ;;  %v1694_v20 = vld [vmem:[%s4674_s14 + $0x28] sm:$0xff] }
 0x6d2   : > { %4313 = vmatmul.mubr.msk.bf16.vlgmr.msra.gmra.mrb[16].mxu1 %vm475_vm2, %v1604_v21  ;;  %v1702_v21 = vld [vmem:[%s4674_s14 + $0x68] sm:$0xff] }
 0x6d3   : > { %2011 = vmatpush1.bf16.msra.mxu1 %v3882_v43  ;;  %2042 = vmatprep.mubr.bf16.mxu1 %v4572_v58  ;;  %v1719_v43 = vld [vmem:[%s4674_s14 + $0xf0] sm:$0xff] }
 0x6d4   : > { %2012 = vmatprep.subr.bf16.mxu1 %v3899_v52  ;;  %v4379_v52 = vld [vmem:[%s4686_s23 + $0x40] sm:$0xff]  }
 0x6d7   : > { %2013 = vmatpush1.bf16.msra.mxu1 %v3898_v51  ;;  %v3910_v51 = vcombine.low %v1712_v44, %v1720_v45 }
 0x6d8   : > { %2092 = vmatprep.subr.bf16.mxu1 %v3887_v61  ;;  %v4388_v61 = vld [vmem:[%s4686_s23 + $0xd0] sm:$0xff]  }
 0x7a5   : > { %v1658_v26 = vpop.f32.mrb[16].mxu1 }
 0x7a6   : > { %v1659_v27 = vadd.f32 %v1658_v26, %v1608_v25  ;;  %v4314_v28 = vpop.f32.mrb[17].mxu1  ;;  %v3889_v25 = vcombine.high %v1693_v19, %v1701_v8  ;;  %v3891_v26 = vcombine.high %v1694_v20, %v1702_v21 }
 0x7a7   : > { %v1661_v29 = vpop.f32.mrb[18].mxu1  ;;  %v1717_v28 = vld [vmem:[%s4674_s14 + $0xe0] sm:$0xff] }
 0x7a8   : > { %v4315_v30 = vpop.f32.mrb[19].mxu1  ;;  %v1664_v31 = vadd.f32 %v1659_v27, %v4705_v4  ;;  %v3880_v4 = vcombine.low %v1689_v38, %v1697_v39  ;;  %v1709_v27 = vld [vmem:[%s4674_s14 + $0xa0] sm:$0xff]  ;;  %v1710_v29 = vld [vmem:[%s4674_s14 + $0xa8] sm:$0xff]  ;;  %v1704_v38 = vld [vmem:[%s4674_s14 + $0x78] sm:$0xff] }
 0x7a9   : > { %v1718_v30 = vld [vmem:[%s4674_s14 + $0xe8] sm:$0xff]  ;;  %v3904_v39 = vcombine.low %v1709_v27, %v1717_v28 }
 0x7aa   : > { %v1665_v32 = vsel %vm475_vm2, %v1664_v31, 0.0  ;;  %1970 = vmatpush1.bf16.msra.mxu0 %v3880_v4  ;;  %v3906_v40 = vcombine.low %v1710_v29, %v1718_v30  ;;  %v1711_v4 = vld [vmem:[%s4674_s14 + $0xb0] sm:$0xff] }
 0x7ab   : > { %1666 = vadd.xlane.f32.xlu1 %v1665_v32  ;;  %1971 = vmatprep.subr.bf16.mxu0 %v3897_v48  ;;  %v3890_v32 = vcombine.low %v1694_v20, %v1702_v21  ;;  %v3909_v48 = vcombine.high %v1711_v4, %v1719_v43  ;;  %v4406_v20 = vld [vmem:[%s4686_s23 + $0xb0] sm:$0xff]   ;;  %v4407_v21 = vld [vmem:[%s4686_s23 + $0x78] sm:$0xff]  }
 0x7ae   : > { %1972 = vmatpush1.bf16.msra.mxu0 %v3896_v50  ;;  %v3908_v50 = vcombine.low %v1711_v4, %v1719_v43 }
 0x7af   : > { %2051 = vmatprep.subr.bf16.mxu0 %v3885_v56  ;;  %v4383_v56 = vld [vmem:[%s4686_s23 + $0x48] sm:$0xff]  }
 0x838   : > { %v1667_v33 = vpop.xlane.xlu1 %1666 }
 0x839   : > { %v1669_v34 = vmul.f32 0.03125, %v1667_v33  ;;  %v3905_v33 = vcombine.high %v1709_v27, %v1717_v28  ;;  %v4412_v27 = vld [vmem:[%s4686_s23 + $0x1c0] sm:$0xff]   ;;  %v1752_v28 = vsub.s32 6, %v4779_v23 }
 0x83b   : > { %v1670_v35 = vsub.f32 %v1664_v31, %v1669_v34  ;;  %v3888_v31 = vcombine.low %v1693_v19, %v1701_v8  ;;  %v3907_v34 = vcombine.high %v1710_v29, %v1718_v30  ;;  %v4404_v19 = vld [vmem:[%s4686_s23 + $0xf0] sm:$0xff]   ;;  %v4900_v29 = vld [vmem:[%s4679_s18 + $0x8] sm:$0xff] }
 0x83c   : > { %v4405_v8 = vld [vmem:[%s4686_s23 + $0x30] sm:$0xff]   ;;  %v4905_v30 = vrot.slane %v4900_v29, %v1752_v28 }
 0x83d   : > { %v1671_v36 = vmul.f32 %v1670_v35, %v1670_v35 }
 0x83f   : > { %v1672_v37 = vsel %vm475_vm2, %v1671_v36, 0.0  ;;  %v1703_v36 = vld [vmem:[%s4674_s14 + $0x70] sm:$0xff] }
 0x840   : > { %1673 = vadd.xlane.f32.xlu0 %v1672_v37  ;;  %v1696_v37 = vld [vmem:[%s4674_s14 + $0x38] sm:$0xff] }
 0x841   : > { %v3895_v42 = vcombine.high %v1696_v37, %v1704_v38  ;;  %v3894_v47 = vcombine.low %v1696_v37, %v1704_v38 }
 0x8cd   : > { %v1674_v62 = vpop.xlane.xlu0 %1673 }
 0x8ce   : > { %v1675_v63 = vmul.f32 0.03125, %v1674_v62  ;;  %v4389_v62 = vld [vmem:[%s4686_s23 + $0x10] sm:$0xff]  }
 0x8d0   : > { %v1676_v0 = vadd.f32 1e-05, %v1675_v63  ;;  %v4390_v63 = vld [vmem:[%s4686_s23 + $0x90] sm:$0xff]  }
 0x8d2   : > { %4523 = vrsqrt.f32 %v1676_v0  ;;  %v4391_v0 = vld [vmem:[%s4686_s23 + $0x58] sm:$0xff]  }
 0x8dc   : > { %v4524_v6 = vpop.eup %4523 }
 0x8dd   : > { %v1678_v9 = vmul.f32 %v4524_v6, %v1670_v35  ;;  %v1695_v35 = vld [vmem:[%s4674_s14 + $0x30] sm:$0xff]  ;;  %v4393_v6 = vld [vmem:[%s4686_s23 + $0x18] sm:$0xff]  }
 0x8de   : > { %v3893_v41 = vcombine.high %v1695_v35, %v1703_v36  ;;  %v3892_v46 = vcombine.low %v1695_v35, %v1703_v36 }
 0x8df   : > { %v1683_v10 = vmul.f32 %v1682_v5, %v1678_v9  ;;  %v4392_v5 = vld [vmem:[%s4686_s23 + $0xd8] sm:$0xff]   ;;  %v4395_v9 = vld [vmem:[%s4686_s23 + $0x60] sm:$0xff]  }
 0x8e1   : > { %v4820_v15 = vadd.f32 %v1687_v7, %v1683_v10  ;;  %v4394_v7 = vld [vmem:[%s4686_s23 + $0x98] sm:$0xff]   ;;  %v4396_v10 = vld [vmem:[%s4686_s23 + $0xe0] sm:$0xff]  }
 0x8e3   : > { %v4824_v16 = vpack.c.bf16 %v4820_v15, %v4820_v15 }
 0x8e5   : > { %3912 = vmatmul.mubr.msk.bf16.vlgmr.msra.gmra.mrb[20].mxu0 %vm475_vm2, %v4824_v16  ;;  %3913 = vmatmul.mubr.msk.bf16.vlgmr.msra.gmra.mrb[20].mxu1 %vm475_vm2, %v4824_v16 }
 0x8e6   : > { %2052 = vmatpush1.bf16.msra.mxu0 %v3884_v59  ;;  %2093 = vmatpush1.bf16.msra.mxu1 %v3886_v60  ;;  %v4386_v59 = vld [vmem:[%s4686_s23 + $0x88] sm:$0xff]   ;;  %v4387_v60 = vld [vmem:[%s4686_s23 + $0x50] sm:$0xff]  }
 0x8e7   : > { %2053 = vmatprep.subr.bf16.mxu0 %v3901_v17  ;;  %2094 = vmatprep.subr.bf16.mxu1 %v3903_v18  ;;  %v4402_v17 = vld [vmem:[%s4686_s23 + $0xa8] sm:$0xff]   ;;  %v4403_v18 = vld [vmem:[%s4686_s23 + $0x70] sm:$0xff]  }
 0x8e8   : > { %2083 = vmatprep.mubr.bf16.mxu0 %v4572_v58  ;;  %2124 = vmatprep.mubr.bf16.mxu1 %v4572_v58 }
 0x8ea   : > { %2054 = vmatpush1.bf16.msra.mxu0 %v3900_v22  ;;  %2095 = vmatpush1.bf16.msra.mxu1 %v3902_v2  ;;  %v4408_v22 = vld [vmem:[%s4686_s23 + $0xf8] sm:$0xff]  }
 0x8eb   : > { %2133 = vmatprep.subr.bf16.mxu0 %v3889_v25  ;;  %2174 = vmatprep.subr.bf16.mxu1 %v3891_v26  ;;  %v4409_v2 = vld [vmem:[%s4686_s23 + $0x38] sm:$0xff]   ;;  %v4411_v26 = vld [vmem:[%s4686_s23 + $0x140] sm:$0xff]  }
 0x8ec   : > { %v4410_v25 = vld [vmem:[%s4686_s23 + $0xb8] sm:$0xff]  }
 0x8ed   : > { %3914 = vmatmul.mubr.msk.bf16.vlgmr.msra.gmra.mrb[24].mxu0 %vm475_vm2, %v4824_v16  ;;  %3915 = vmatmul.mubr.msk.bf16.vlgmr.msra.gmra.mrb[24].mxu1 %vm475_vm2, %v4824_v16 }
 0x8ee   : > { %2134 = vmatpush1.bf16.msra.mxu0 %v3888_v31  ;;  %2175 = vmatpush1.bf16.msra.mxu1 %v3890_v32  ;;  %v4908_v31 = vld [vmem:[%s4679_s18] sm:$0xff]  ;;  %v4911_v32 = vsub.s32 1, %v4779_v23 }
 0x8ef   : > { %2135 = vmatprep.subr.bf16.mxu0 %v3905_v33  ;;  %2176 = vmatprep.subr.bf16.mxu1 %v3907_v34  ;;  %v1729_v33 = vrot.slane %v4908_v31, %v4782_v24  ;;  %v1737_v34 = vrot.slane %v4908_v31, %v4807_v1  ;;  %v1741_v36 = vrot.slane %v4908_v31, %v4810_v3 }
 0x8f0   : > { %2165 = vmatprep.mubr.bf16.mxu0 %v4572_v58  ;;  %2206 = vmatprep.mubr.bf16.mxu1 %v4572_v58  ;;  %v1733_v35 = vrot.slane %v4908_v31, %v4911_v32 }
 0x8f2   : > { %2136 = vmatpush1.bf16.msra.mxu0 %v3904_v39  ;;  %2177 = vmatpush1.bf16.msra.mxu1 %v3906_v40 }
 0x8f3   : > { %2215 = vmatprep.subr.bf16.mxu0 %v3893_v41  ;;  %2256 = vmatprep.subr.bf16.mxu1 %v3895_v42 }
 0x8f5   : > { %3916 = vmatmul.mubr.msk.bf16.vlgmr.msra.gmra.mrb[28].mxu0 %vm475_vm2, %v4824_v16  ;;  %3917 = vmatmul.mubr.msk.bf16.vlgmr.msra.gmra.mrb[28].mxu1 %vm475_vm2, %v4824_v16 }
 0x8f6   : > { %2216 = vmatpush1.bf16.msra.mxu0 %v3892_v46  ;;  %2257 = vmatpush1.bf16.msra.mxu1 %v3894_v47  ;;  %v4922_v46 = vsub.s32 5, %v4779_v23  ;;  %v1756_v47 = vsub.s32 7, %v4779_v23 }
 0x8f7   : > { %2217 = vmatprep.subr.bf16.mxu0 %v3909_v48  ;;  %2258 = vmatprep.subr.bf16.mxu1 %v3911_v49 }
 0x8f8   : > { %2247 = vmatprep.mubr.bf16.mxu0 %v4572_v58  ;;  %2288 = vmatprep.mubr.bf16.mxu1 %v4572_v58  ;;  %v4385_v58 = vld [vmem:[%s4686_s23 + $0x8] sm:$0xff]  }
 0x8fa   : > { %2218 = vmatpush1.bf16.msra.mxu0 %v3908_v50  ;;  %2259 = vmatpush1.bf16.msra.mxu1 %v3910_v51 }
 0x8fb   : > { %4076 = vmatprep.subr.bf16.mxu0 %v4379_v52  ;;  %4098 = vmatprep.subr.bf16.mxu1 %v4380_v53 }
 0x8fd   : > { %3918 = vmatmul.mubr.msk.bf16.vlgmr.msra.gmra.mrb[32].mxu0 %vm475_vm2, %v4824_v16  ;;  %3919 = vmatmul.mubr.msk.bf16.vlgmr.msra.gmra.mrb[32].mxu1 %vm475_vm2, %v4824_v16  ;;  %v4401_v16 = vld [vmem:[%s4686_s23 + $0x28] sm:$0xff]  }
 0x8fe   : > { %4077 = vmatpush3.bf16.msra.mxu0 %v4381_v54  ;;  %4099 = vmatpush3.bf16.msra.mxu1 %v4382_v55 }
 0x8ff   : > { %4078 = vmatprep.subr.bf16.mxu0 %v4383_v56  ;;  %4100 = vmatprep.subr.bf16.mxu1 %v4384_v57  ;;  %v1749_v56 = vrot.slane %v4908_v31, %v4922_v46  ;;  %v1757_v57 = vrot.slane %v4908_v31, %v1756_v47 }
 0x902   : > { %4079 = vmatpush3.bf16.msra.mxu0 %v4385_v58  ;;  %4101 = vmatpush3.bf16.msra.mxu1 %v4386_v59  ;;  %v4413_v58 = vld [vmem:[%s4686_s23 + $0x100] sm:$0xff]  }
 0x903   : > { %4080 = vmatprep.subr.bf16.mxu0 %v4387_v60  ;;  %4102 = vmatprep.subr.bf16.mxu1 %v4388_v61  ;;  %v4414_v59 = vld [vmem:[%s4686_s23 + $0x180] sm:$0xff]  }
 0x906   : > { %4081 = vmatpush3.bf16.msra.mxu0 %v4389_v62  ;;  %4103 = vmatpush3.bf16.msra.mxu1 %v4390_v63  ;;  %v4415_v62 = vld [vmem:[%s4686_s23 + $0x148] sm:$0xff]  }
 0x907   : > { %4082 = vmatprep.subr.bf16.mxu0 %v4391_v0  ;;  %4104 = vmatprep.subr.bf16.mxu1 %v4392_v5  ;;  %v4416_v63 = vld [vmem:[%s4686_s23 + $0x1c8] sm:$0xff]  }
 0x90a   : > { %4083 = vmatpush3.bf16.msra.mxu0 %v4393_v6  ;;  %4105 = vmatpush3.bf16.msra.mxu1 %v4394_v7 }
 0x90b   : > { %4084 = vmatprep.subr.bf16.mxu0 %v4395_v9  ;;  %4106 = vmatprep.subr.bf16.mxu1 %v4396_v10 }
 0x90e   : > { %4085 = vmatpush3.bf16.msra.mxu0 %v4397_v11  ;;  %4107 = vmatpush3.bf16.msra.mxu1 %v4398_v12 }
 0x90f   : > { %4086 = vmatprep.subr.bf16.mxu0 %v4399_v13  ;;  %4108 = vmatprep.subr.bf16.mxu1 %v4400_v14  ;;  %v4417_v13 = vld [vmem:[%s4686_s23 + $0x108] sm:$0xff]  }
 0x910   : > { %v4418_v14 = vld [vmem:[%s4686_s23 + $0x188] sm:$0xff]  }
 0x912   : > { %4087 = vmatpush3.bf16.msra.mxu0 %v4401_v16  ;;  %4109 = vmatpush3.bf16.msra.mxu1 %v4402_v17 }
 0x913   : > { %4088 = vmatprep.subr.bf16.mxu0 %v4403_v18  ;;  %4110 = vmatprep.subr.bf16.mxu1 %v4404_v19  ;;  %v4419_v18 = vld [vmem:[%s4686_s23 + $0x150] sm:$0xff]  }
 0x914   : > { %v4420_v19 = vld [vmem:[%s4686_s23 + $0x1d0] sm:$0xff]  }
 0x916   : > { %4089 = vmatpush3.bf16.msra.mxu0 %v4405_v8  ;;  %4111 = vmatpush3.bf16.msra.mxu1 %v4406_v20 }
 0x917   : > { %4090 = vmatprep.subr.bf16.mxu0 %v4407_v21  ;;  %4112 = vmatprep.subr.bf16.mxu1 %v4408_v22 }
 0x91a   : > { %4091 = vmatpush3.bf16.msra.mxu0 %v4409_v2  ;;  %4113 = vmatpush3.bf16.msra.mxu1 %v4410_v25  ;;  %v4421_v2 = vld [vmem:[%s4686_s23 + $0x110] sm:$0xff]  }
 0x91b   : > { %4120 = vmatprep.subr.bf16.mxu0 %v4411_v26  ;;  %4142 = vmatprep.subr.bf16.mxu1 %v4412_v27  ;;  %v4422_v25 = vld [vmem:[%s4686_s23 + $0x190] sm:$0xff]   ;;  %v4423_v26 = vld [vmem:[%s4686_s23 + $0x158] sm:$0xff]  }
 0x91c   : > { %v4424_v27 = vld [vmem:[%s4686_s23 + $0x1d8] sm:$0xff]  }
 0x9b8   : > { %v2003_v37 = vpop.f32.mrb[20].mxu0  ;;  %v2044_v38 = vpop.f32.mrb[20].mxu1 }
 0x9b9   : > { %v2004_v39 = vadd.f32 %v2003_v37, %v1729_v33  ;;  %v2045_v40 = vadd.f32 %v2044_v38, %v1737_v34  ;;  %v2005_v41 = vpop.f32.mrb[21].mxu0  ;;  %v2046_v42 = vpop.f32.mrb[21].mxu1 }
 0x9ba   : > { %v2006_v4 = vadd.f32 %v2005_v41, %v1733_v35  ;;  %v2047_v43 = vadd.f32 %v2046_v42, %v1741_v36  ;;  %v2007_v44 = vpop.f32.mrb[22].mxu0  ;;  %v2048_v45 = vpop.f32.mrb[22].mxu1  ;;  %v4953_v41 = vsub.s32 4, %v4779_v23 }
 0x9bb   : > { %v2297_v48 = vmax.f32 %v2004_v39, 0.0  ;;  %v2299_v49 = vmax.f32 %v2045_v40, 0.0  ;;  %v2008_v50 = vpop.f32.mrb[23].mxu0  ;;  %v2049_v51 = vpop.f32.mrb[23].mxu1  ;;  %v4425_v39 = vld [vmem:[%s4686_s23 + $0x118] sm:$0xff]   ;;  %v4428_v44 = vld [vmem:[%s4686_s23 + $0x1e0] sm:$0xff]  }
 0x9bc   : > { %v2298_v52 = vmax.f32 %v2006_v4, 0.0  ;;  %v2300_v53 = vmax.f32 %v2047_v43, 0.0  ;;  %v4426_v40 = vld [vmem:[%s4686_s23 + $0x198] sm:$0xff]   ;;  %v4427_v43 = vld [vmem:[%s4686_s23 + $0x160] sm:$0xff]   ;;  %v1777_v45 = vrot.slane %v4900_v29, %v4953_v41  ;;  %v4431_v50 = vld [vmem:[%s4686_s23 + $0x168] sm:$0xff]  }
 0x9bd   : > { %v2313_v60 = vpack.c.bf16 %v2297_v48, %v2297_v48  ;;  %v2315_v61 = vpack.c.bf16 %v2299_v49, %v2299_v49  ;;  %v4429_v48 = vld [vmem:[%s4686_s23 + $0x120] sm:$0xff]   ;;  %v4432_v51 = vld [vmem:[%s4686_s23 + $0x1e8] sm:$0xff]  }
 0x9be   : > { %v2314_v54 = vpack.c.bf16 %v2298_v52, %v2298_v52  ;;  %v2316_v55 = vpack.c.bf16 %v2300_v53, %v2300_v53  ;;  %v4430_v49 = vld [vmem:[%s4686_s23 + $0x1a0] sm:$0xff]  }
 0x9c0   : > { %v4934_v0 = vpop.f32.mrb[24].mxu0  ;;  %v4936_v5 = vpop.f32.mrb[24].mxu1  ;;  %3389 = vmatprep.mubr.bf16.mxu0 %v2314_v54  ;;  %3429 = vmatprep.mubr.bf16.mxu1 %v2316_v55 }
 0x9c1   : > { %v2087_v6 = vpop.f32.mrb[25].mxu0  ;;  %v2128_v7 = vpop.f32.mrb[25].mxu1  ;;  %3390 = vmatmul.mubr.bf16.vlgmr.msra.gmra.mrb[36].mxu0 %v2313_v60  ;;  %3430 = vmatmul.mubr.bf16.vlgmr.msra.gmra.mrb[36].mxu1 %v2315_v61  ;;  %v4433_v60 = vld [vmem:[%s4686_s23 + $0x128] sm:$0xff]  }
 0x9c2   : > { %v2088_v9 = vadd.f32 %v2087_v6, %v1749_v56  ;;  %v2129_v10 = vadd.f32 %v2128_v7, %v1757_v57  ;;  %4121 = vmatpush3.bf16.msra.mxu0 %v4413_v58  ;;  %4143 = vmatpush3.bf16.msra.mxu1 %v4414_v59  ;;  %v2089_v11 = vpop.f32.mrb[26].mxu0  ;;  %v2130_v12 = vpop.f32.mrb[26].mxu1  ;;  %v4434_v61 = vld [vmem:[%s4686_s23 + $0x1a8] sm:$0xff]   ;;  %v4435_v7 = vld [vmem:[%s4686_s23 + $0x170] sm:$0xff]  }
 0x9c3   : > { %v2090_v16 = vpop.f32.mrb[27].mxu0  ;;  %v2131_v17 = vpop.f32.mrb[27].mxu1  ;;  %4122 = vmatprep.subr.bf16.mxu0 %v4415_v62  ;;  %4144 = vmatprep.subr.bf16.mxu1 %v4416_v63  ;;  %v1745_v62 = vrot.slane %v4908_v31, %v4953_v41  ;;  %v1773_v11 = vrot.slane %v4900_v29, %v4810_v3  ;;  %v4437_v12 = vld [vmem:[%s4686_s23 + $0x130] sm:$0xff]   ;;  %v4441_v3 = vld [vmem:[%s4686_s23 + $0x138] sm:$0xff]  }
 0x9c4   : > { %v2302_v8 = vmax.f32 %v2088_v9, 0.0  ;;  %v2304_v20 = vmax.f32 %v2129_v10, 0.0  ;;  %v4436_v9 = vld [vmem:[%s4686_s23 + $0x1f0] sm:$0xff]   ;;  %v1765_v10 = vrot.slane %v4900_v29, %v4911_v32  ;;  %v4440_v16 = vld [vmem:[%s4686_s23 + $0x1f8] sm:$0xff]  }
 0x9c6   : > { %v2318_v21 = vpack.c.bf16 %v2302_v8, %v2302_v8  ;;  %v2320_v22 = vpack.c.bf16 %v2304_v20, %v2304_v20  ;;  %4123 = vmatpush3.bf16.msra.mxu0 %v4417_v13  ;;  %4145 = vmatpush3.bf16.msra.mxu1 %v4418_v14  ;;  %v4439_v14 = vld [vmem:[%s4686_s23 + $0x178] sm:$0xff]  }
 0x9c7   : > { %4124 = vmatprep.subr.bf16.mxu0 %v4419_v18  ;;  %4146 = vmatprep.subr.bf16.mxu1 %v4420_v19  ;;  %v4442_v19 = vld [vmem:[%s4686_s23 + $0x1b8] sm:$0xff]  }
 0x9c8   : > { %v4946_v33 = vpop.f32.mrb[28].mxu0  ;;  %v4948_v34 = vpop.f32.mrb[28].mxu1  ;;  %3469 = vmatprep.mubr.bf16.mxu0 %v2318_v21  ;;  %3509 = vmatprep.mubr.bf16.mxu1 %v2320_v22 }
 0x9c9   : > { %v2169_v35 = vpop.f32.mrb[29].mxu0  ;;  %v2210_v36 = vpop.f32.mrb[29].mxu1 }
 0x9ca   : > { %4125 = vmatpush3.bf16.msra.mxu0 %v4421_v2  ;;  %4147 = vmatpush3.bf16.msra.mxu1 %v4422_v25  ;;  %v2171_v37 = vpop.f32.mrb[30].mxu0  ;;  %v2212_v38 = vpop.f32.mrb[30].mxu1  ;;  %v2170_v17 = vadd.f32 %v2169_v35, %v1765_v10  ;;  %v2211_v18 = vadd.f32 %v2210_v36, %v1773_v11  ;;  %v4445_v2 = vld [vmem:[%s4686_s23 + $0x200] sm:$0xff]   ;;  %v4447_v36 = vld [vmem:[%s4686_s23 + $0x248] sm:$0xff]   ;;  %v1789_v10 = vrot.slane %v4900_v29, %v1756_v47  ;;  %v4473_v47 = vld [vmem:[%s4686_s23 + $0x238] sm:$0xff]  }
 0x9cb   : > { %v2172_v42 = vpop.f32.mrb[31].mxu0  ;;  %v2213_v4 = vpop.f32.mrb[31].mxu1  ;;  %4126 = vmatprep.subr.bf16.mxu0 %v4423_v26  ;;  %4148 = vmatprep.subr.bf16.mxu1 %v4424_v27  ;;  %v4446_v27 = vld [vmem:[%s4686_s23 + $0x280] sm:$0xff]   ;;  %v4448_v37 = vld [vmem:[%s4686_s23 + $0x2c8] sm:$0xff]  }
 0x9cc   : > { %v2306_v21 = vmax.f32 %v2170_v17, 0.0  ;;  %v2308_v22 = vmax.f32 %v2211_v18, 0.0  ;;  %v4451_v42 = vld [vmem:[%s4686_s23 + $0x250] sm:$0xff]  }
 0x9cd   : > { %v4452_v4 = vld [vmem:[%s4686_s23 + $0x2d0] sm:$0xff]  }
 0x9ce   : > { %4127 = vmatpush3.bf16.msra.mxu0 %v4425_v39  ;;  %4149 = vmatpush3.bf16.msra.mxu1 %v4426_v40  ;;  %v2322_v35 = vpack.c.bf16 %v2306_v21, %v2306_v21  ;;  %v2324_v38 = vpack.c.bf16 %v2308_v22, %v2308_v22  ;;  %v4449_v39 = vld [vmem:[%s4686_s23 + $0x208] sm:$0xff]  }
 0x9cf   : > { %4128 = vmatprep.subr.bf16.mxu0 %v4427_v43  ;;  %4150 = vmatprep.subr.bf16.mxu1 %v4428_v44  ;;  %v4450_v40 = vld [vmem:[%s4686_s23 + $0x288] sm:$0xff]   ;;  %v4453_v43 = vld [vmem:[%s4686_s23 + $0x210] sm:$0xff]  }
 0x9d0   : > { %v2249_v52 = vpop.f32.mrb[32].mxu0  ;;  %v2290_v53 = vpop.f32.mrb[32].mxu1  ;;  %v4454_v44 = vld [vmem:[%s4686_s23 + $0x290] sm:$0xff]   ;;  %v4481_v21 = vld [vmem:[%s4686_s23 + $0x308] sm:$0xff]  }
 0x9d1   : > { %v4963_v54 = vadd.f32 %v2249_v52, %v1777_v45  ;;  %v4966_v55 = vadd.f32 %v2290_v53, %v4905_v30  ;;  %v4968_v56 = vpop.f32.mrb[33].mxu0  ;;  %v4970_v57 = vpop.f32.mrb[33].mxu1  ;;  %v1753_v30 = vrot.slane %v4908_v31, %v1752_v28  ;;  %v4438_v28 = vld [vmem:[%s4686_s23 + $0x1b0] sm:$0xff]   ;;  %v2086_v31 = vadd.f32 %v4934_v0, %v1745_v62  ;;  %v4443_v0 = vld [vmem:[%s4686_s23 + $0x240] sm:$0xff]   ;;  %v4455_v45 = vld [vmem:[%s4686_s23 + $0x258] sm:$0xff]  }
 0x9d2   : > { %4129 = vmatpush3.bf16.msra.mxu0 %v4429_v48  ;;  %4151 = vmatpush3.bf16.msra.mxu1 %v4430_v49  ;;  %v2253_v58 = vpop.f32.mrb[34].mxu0  ;;  %v2294_v59 = vpop.f32.mrb[34].mxu1  ;;  %v4456_v48 = vld [vmem:[%s4686_s23 + $0x2d8] sm:$0xff]   ;;  %v4460_v52 = vld [vmem:[%s4686_s23 + $0x2e0] sm:$0xff]   ;;  %v1761_v62 = vrot.slane %v4900_v29, %v4782_v24  ;;  %v4469_v24 = vld [vmem:[%s4686_s23 + $0x230] sm:$0xff]  }
 0x9d3   : > { %v2254_v63 = vpop.f32.mrb[35].mxu0  ;;  %v2295_v6 = vpop.f32.mrb[35].mxu1  ;;  %4130 = vmatprep.subr.bf16.mxu0 %v4431_v50  ;;  %4152 = vmatprep.subr.bf16.mxu1 %v4432_v51  ;;  %v2127_v13 = vadd.f32 %v4936_v5, %v1753_v30  ;;  %v2301_v8 = vmax.f32 %v2086_v31, 0.0  ;;  %v4444_v5 = vld [vmem:[%s4686_s23 + $0x2c0] sm:$0xff]   ;;  %v4457_v49 = vld [vmem:[%s4686_s23 + $0x218] sm:$0xff]   ;;  %v4463_v59 = vld [vmem:[%s4686_s23 + $0x268] sm:$0xff]  }
 0x9d4   : > { %v4458_v50 = vld [vmem:[%s4686_s23 + $0x298] sm:$0xff]   ;;  %v4459_v51 = vld [vmem:[%s4686_s23 + $0x260] sm:$0xff]   ;;  %v4466_v30 = vld [vmem:[%s4686_s23 + $0x2a8] sm:$0xff]   ;;  %v1769_v6 = vrot.slane %v4900_v29, %v4807_v1  ;;  %v2168_v11 = vadd.f32 %v4946_v33, %v1761_v62  ;;  %v2311_v62 = vmax.f32 %v4966_v55, 0.0 }
 0x9d5   : > { %v2303_v20 = vmax.f32 %v2127_v13, 0.0  ;;  %v2317_v25 = vpack.c.bf16 %v2301_v8, %v2301_v8  ;;  %v4461_v53 = vld [vmem:[%s4686_s23 + $0x220] sm:$0xff]   ;;  %v4467_v63 = vld [vmem:[%s4686_s23 + $0x270] sm:$0xff]   ;;  %v4471_v1 = vld [vmem:[%s4686_s23 + $0x278] sm:$0xff]  }
 0x9d6   : > { %4131 = vmatpush3.bf16.msra.mxu0 %v4433_v60  ;;  %4153 = vmatpush3.bf16.msra.mxu1 %v4434_v61  ;;  %v4462_v58 = vld [vmem:[%s4686_s23 + $0x2a0] sm:$0xff]   ;;  %v4464_v60 = vld [vmem:[%s4686_s23 + $0x2e8] sm:$0xff]   ;;  %v4472_v31 = vld [vmem:[%s4686_s23 + $0x2f8] sm:$0xff]   ;;  %v2305_v13 = vmax.f32 %v2168_v11, 0.0 }
 0x9d7   : > { %4132 = vmatprep.subr.bf16.mxu0 %v4435_v7  ;;  %4154 = vmatprep.subr.bf16.mxu1 %v4436_v9  ;;  %v2319_v26 = vpack.c.bf16 %v2303_v20, %v2303_v20  ;;  %v4465_v61 = vld [vmem:[%s4686_s23 + $0x228] sm:$0xff]   ;;  %v4468_v7 = vld [vmem:[%s4686_s23 + $0x2f0] sm:$0xff]   ;;  %v1781_v9 = vrot.slane %v4900_v29, %v4922_v46  ;;  %v2293_v29 = vadd.f32 %v4970_v57, %v1789_v10  ;;  %v4474_v33 = vld [vmem:[%s4686_s23 + $0x2b8] sm:$0xff]  }
 0x9d8   : > { %v4478_v57 = vld [vmem:[%s4686_s23 + $0x380] sm:$0xff]   ;;  %v4479_v8 = vld [vmem:[%s4686_s23 + $0x348] sm:$0xff]  }
 0x9d9   : > { %v2252_v23 = vadd.f32 %v4968_v56, %v1781_v9  ;;  %v2312_v18 = vmax.f32 %v2293_v29, 0.0  ;;  %v4477_v56 = vld [vmem:[%s4686_s23 + $0x300] sm:$0xff]   ;;  %v4482_v22 = vld [vmem:[%s4686_s23 + $0x388] sm:$0xff]  }
 0x9da   : > { %4133 = vmatpush3.bf16.msra.mxu0 %v4437_v12  ;;  %4155 = vmatpush3.bf16.msra.mxu1 %v4438_v28  ;;  %v4470_v12 = vld [vmem:[%s4686_s23 + $0x2b0] sm:$0xff]   ;;  %v2209_v28 = vadd.f32 %v4948_v34, %v1769_v6  ;;  %v4476_v34 = vld [vmem:[%s4686_s23 + $0x3c0] sm:$0xff]  }
 0x9db   : > { %4134 = vmatprep.subr.bf16.mxu0 %v4439_v14  ;;  %4156 = vmatprep.subr.bf16.mxu1 %v4440_v16  ;;  %v4475_v14 = vld [vmem:[%s4686_s23 + $0x340] sm:$0xff]   ;;  %v2310_v17 = vmax.f32 %v2252_v23, 0.0 }
 0x9dc   : > { %v2307_v16 = vmax.f32 %v2209_v28, 0.0  ;;  %v5073_v9 = vld [vmem:[%s4691_s3] sm:$0x3f] }
 0x9dd   : > { %v2326_v20 = vpack.c.bf16 %v2310_v17, %v2310_v17  ;;  %v2588_v10 = vrot.slane %v5073_v9, %v4911_v32 }
 0x9de   : > { %4135 = vmatpush3.bf16.msra.mxu0 %v4441_v3  ;;  %4157 = vmatpush3.bf16.msra.mxu1 %v4442_v19  ;;  %v2321_v3 = vpack.c.bf16 %v2305_v13, %v2305_v13  ;;  %v2323_v19 = vpack.c.bf16 %v2307_v16, %v2307_v16 }
 0x9df   : > { %4164 = vmatprep.subr.bf16.mxu0 %v4443_v0  ;;  %4186 = vmatprep.subr.bf16.mxu1 %v4444_v5  ;;  %v4480_v0 = vld [vmem:[%s4686_s23 + $0x3c8] sm:$0xff]   ;;  %v2328_v5 = vpack.c.bf16 %v2312_v18, %v2312_v18 }
 0x9e1   : > { %3470 = vmatmul.mubr.bf16.vlgmr.msra.gmra.mrb[40].mxu0 %v2317_v25  ;;  %3510 = vmatmul.mubr.bf16.vlgmr.msra.gmra.mrb[40].mxu1 %v2319_v26  ;;  %v4484_v25 = vld [vmem:[%s4686_s23 + $0x3d0] sm:$0xff]  }
 0x9e2   : > { %4165 = vmatpush3.bf16.msra.mxu0 %v4445_v2  ;;  %3549 = vmatprep.mubr.bf16.mxu0 %v2322_v35  ;;  %v4483_v2 = vld [vmem:[%s4686_s23 + $0x350] sm:$0xff]   ;;  %v4487_v35 = vld [vmem:[%s4686_s23 + $0x358] sm:$0xff]  }
 0x9e3   : > { %4187 = vmatpush3.bf16.msra.mxu1 %v4446_v27  ;;  %3589 = vmatprep.mubr.bf16.mxu1 %v2324_v38  ;;  %v4485_v26 = vld [vmem:[%s4686_s23 + $0x310] sm:$0xff]   ;;  %v4490_v38 = vld [vmem:[%s4686_s23 + $0x398] sm:$0xff]  }
 0x9e4   : > { %4166 = vmatprep.subr.bf16.mxu0 %v4447_v36  ;;  %4188 = vmatprep.subr.bf16.mxu1 %v4448_v37  ;;  %v4486_v27 = vld [vmem:[%s4686_s23 + $0x390] sm:$0xff]   ;;  %v4488_v36 = vld [vmem:[%s4686_s23 + $0x3d8] sm:$0xff]  }
 0x9e5   : > { %v4489_v37 = vld [vmem:[%s4686_s23 + $0x318] sm:$0xff]  }
 0x9e6   : > { %4167 = vmatpush3.bf16.msra.mxu0 %v4449_v39  ;;  %v4491_v39 = vld [vmem:[%s4686_s23 + $0x360] sm:$0xff]  }
 0x9e7   : > { %4189 = vmatpush3.bf16.msra.mxu1 %v4450_v40  ;;  %4168 = vmatprep.subr.bf16.mxu0 %v4451_v42  ;;  %v4492_v40 = vld [vmem:[%s4686_s23 + $0x3e0] sm:$0xff]  }
 0x9e8   : > { %4190 = vmatprep.subr.bf16.mxu1 %v4452_v4  ;;  %v4493_v42 = vld [vmem:[%s4686_s23 + $0x320] sm:$0xff]  }
 0x9e9   : > { %v4494_v4 = vld [vmem:[%s4686_s23 + $0x3a0] sm:$0xff]  }
 0x9ea   : > { %4169 = vmatpush3.bf16.msra.mxu0 %v4453_v43  ;;  %v4495_v43 = vld [vmem:[%s4686_s23 + $0x368] sm:$0xff]  }
 0x9eb   : > { %4191 = vmatpush3.bf16.msra.mxu1 %v4454_v44  ;;  %4170 = vmatprep.subr.bf16.mxu0 %v4455_v45  ;;  %v4496_v44 = vld [vmem:[%s4686_s23 + $0x3e8] sm:$0xff]  }
 0x9ec   : > { %4192 = vmatprep.subr.bf16.mxu1 %v4456_v48  ;;  %v4497_v45 = vld [vmem:[%s4686_s23 + $0x328] sm:$0xff]  }
 0x9ed   : > { %v4498_v48 = vld [vmem:[%s4686_s23 + $0x3a8] sm:$0xff]  }
 0x9ee   : > { %4171 = vmatpush3.bf16.msra.mxu0 %v4457_v49  ;;  %v4499_v49 = vld [vmem:[%s4686_s23 + $0x370] sm:$0xff]  }
 0x9ef   : > { %4193 = vmatpush3.bf16.msra.mxu1 %v4458_v50  ;;  %4172 = vmatprep.subr.bf16.mxu0 %v4459_v51  ;;  %v4500_v50 = vld [vmem:[%s4686_s23 + $0x3f0] sm:$0xff]  }
 0x9f0   : > { %4194 = vmatprep.subr.bf16.mxu1 %v4460_v52  ;;  %v4501_v51 = vld [vmem:[%s4686_s23 + $0x330] sm:$0xff]  }
 0x9f1   : > { %v4502_v52 = vld [vmem:[%s4686_s23 + $0x3b0] sm:$0xff]  }
 0x9f2   : > { %4173 = vmatpush3.bf16.msra.mxu0 %v4461_v53  ;;  %v4503_v53 = vld [vmem:[%s4686_s23 + $0x378] sm:$0xff]  }
 0x9f3   : > { %4195 = vmatpush3.bf16.msra.mxu1 %v4462_v58  ;;  %4174 = vmatprep.subr.bf16.mxu0 %v4463_v59  ;;  %v4504_v58 = vld [vmem:[%s4686_s23 + $0x3f8] sm:$0xff]  }
 0x9f4   : > { %4196 = vmatprep.subr.bf16.mxu1 %v4464_v60  ;;  %v4505_v59 = vld [vmem:[%s4686_s23 + $0x338] sm:$0xff]   ;;  %v2309_v60 = vmax.f32 %v4963_v54, 0.0 }
 0x9f6   : > { %4175 = vmatpush3.bf16.msra.mxu0 %v4465_v61  ;;  %v4506_v61 = vld [vmem:[%s4686_s23 + $0x3b8] sm:$0xff]  }
 0x9f7   : > { %4197 = vmatpush3.bf16.msra.mxu1 %v4466_v30  ;;  %4176 = vmatprep.subr.bf16.mxu0 %v4467_v63  ;;  %v2325_v30 = vpack.c.bf16 %v2309_v60, %v2309_v60  ;;  %v2327_v63 = vpack.c.bf16 %v2311_v62, %v2311_v62 }
 0x9f8   : > { %4198 = vmatprep.subr.bf16.mxu1 %v4468_v7 }
 0x9fa   : > { %4177 = vmatpush3.bf16.msra.mxu0 %v4469_v24 }
 0x9fb   : > { %4199 = vmatpush3.bf16.msra.mxu1 %v4470_v12  ;;  %4178 = vmatprep.subr.bf16.mxu0 %v4471_v1 }
 0x9fc   : > { %4200 = vmatprep.subr.bf16.mxu1 %v4472_v31 }
 0x9fe   : > { %4179 = vmatpush3.bf16.msra.mxu0 %v4473_v47 }
 0x9ff   : > { %4201 = vmatpush3.bf16.msra.mxu1 %v4474_v33  ;;  %4208 = vmatprep.subr.bf16.mxu0 %v4475_v14 }
 0xa00   : > { %4230 = vmatprep.subr.bf16.mxu1 %v4476_v34 }
 0xa01   : > { %3550 = vmatmul.mubr.bf16.vlgmr.msra.gmra.mrb[44].mxu0 %v2321_v3 }
 0xa02   : > { %3590 = vmatmul.mubr.bf16.vlgmr.msra.gmra.mrb[44].mxu1 %v2323_v19  ;;  %4209 = vmatpush3.bf16.msra.mxu0 %v4477_v56 }
 0xa03   : > { %3629 = vmatprep.mubr.bf16.mxu0 %v2326_v20  ;;  %4231 = vmatpush3.bf16.msra.mxu1 %v4478_v57 }
 0xa04   : > { %3669 = vmatprep.mubr.bf16.mxu1 %v2328_v5  ;;  %4210 = vmatprep.subr.bf16.mxu0 %v4479_v8 }
 0xa05   : > { %4232 = vmatprep.subr.bf16.mxu1 %v4480_v0 }
 0xa06   : > { %4211 = vmatpush3.bf16.msra.mxu0 %v4481_v21 }
 0xa07   : > { %4233 = vmatpush3.bf16.msra.mxu1 %v4482_v22  ;;  %4212 = vmatprep.subr.bf16.mxu0 %v4483_v2 }
 0xa08   : > { %4234 = vmatprep.subr.bf16.mxu1 %v4484_v25 }
 0xa0a   : > { %4213 = vmatpush3.bf16.msra.mxu0 %v4485_v26 }
 0xa0b   : > { %4235 = vmatpush3.bf16.msra.mxu1 %v4486_v27  ;;  %4214 = vmatprep.subr.bf16.mxu0 %v4487_v35 }
 0xa0c   : > { %4236 = vmatprep.subr.bf16.mxu1 %v4488_v36 }
 0xa0e   : > { %4215 = vmatpush3.bf16.msra.mxu0 %v4489_v37 }
 0xa0f   : > { %4237 = vmatpush3.bf16.msra.mxu1 %v4490_v38  ;;  %4216 = vmatprep.subr.bf16.mxu0 %v4491_v39 }
 0xa10   : > { %4238 = vmatprep.subr.bf16.mxu1 %v4492_v40 }
 0xa12   : > { %4217 = vmatpush3.bf16.msra.mxu0 %v4493_v42 }
 0xa13   : > { %4239 = vmatpush3.bf16.msra.mxu1 %v4494_v4  ;;  %4218 = vmatprep.subr.bf16.mxu0 %v4495_v43 }
 0xa14   : > { %4240 = vmatprep.subr.bf16.mxu1 %v4496_v44 }
 0xa16   : > { %4219 = vmatpush3.bf16.msra.mxu0 %v4497_v45 }
 0xa17   : > { %4241 = vmatpush3.bf16.msra.mxu1 %v4498_v48  ;;  %4220 = vmatprep.subr.bf16.mxu0 %v4499_v49 }
 0xa18   : > { %4242 = vmatprep.subr.bf16.mxu1 %v4500_v50 }
 0xa1a   : > { %4221 = vmatpush3.bf16.msra.mxu0 %v4501_v51 }
 0xa1b   : > { %4243 = vmatpush3.bf16.msra.mxu1 %v4502_v52  ;;  %4222 = vmatprep.subr.bf16.mxu0 %v4503_v53 }
 0xa1c   : > { %4244 = vmatprep.subr.bf16.mxu1 %v4504_v58 }
 0xa1e   : > { %4223 = vmatpush3.bf16.msra.mxu0 %v4505_v59 }
 0xa1f   : > { %4245 = vmatpush3.bf16.msra.mxu1 %v4506_v61 }
 0xa21   : > { %3630 = vmatmul.mubr.bf16.vlgmr.msra.gmra.mrb[48].mxu0 %v2325_v30 }
 0xa22   : > { %3670 = vmatmul.mubr.bf16.vlgmr.msra.gmra.mrb[48].mxu1 %v2327_v63  ;;  %v3694_v63 = vrot.slane %v5073_v9, %v4953_v41 }
 0xa94   : > { %v4092_v6 = vpop.f32.mrb[36].mxu0  ;;  %v4114_v7 = vpop.f32.mrb[36].mxu1 }
 0xa95   : > { %v4093_v54 = vpop.f32.mrb[37].mxu0  ;;  %v4115_v24 = vpop.f32.mrb[37].mxu1 }
 0xa96   : > { %v4094_v11 = vadd.f32 %v4093_v54, %v4092_v6  ;;  %v4116_v12 = vadd.f32 %v4115_v24, %v4114_v7  ;;  %v4095_v1 = vpop.f32.mrb[38].mxu0  ;;  %v4117_v55 = vpop.f32.mrb[38].mxu1 }
 0xa97   : > { %v4096_v28 = vpop.f32.mrb[39].mxu0  ;;  %v4118_v31 = vpop.f32.mrb[39].mxu1 }
 0xa98   : > { %v3392_v23 = vadd.f32 %v4094_v11, %v2588_v10 }
 0xa9a   : > { %v3432_v29 = vadd.f32 %v4116_v12, %v3392_v23 }
 0xab4   : > { %v4136_v47 = vpop.f32.mrb[40].mxu0  ;;  %v4158_v13 = vpop.f32.mrb[40].mxu1 }
 0xab5   : > { %v4137_v33 = vpop.f32.mrb[41].mxu0  ;;  %v4159_v14 = vpop.f32.mrb[41].mxu1 }
 0xab6   : > { %v4138_v16 = vadd.f32 %v4137_v33, %v4136_v47  ;;  %v4160_v34 = vadd.f32 %v4159_v14, %v4158_v13  ;;  %v4139_v17 = vpop.f32.mrb[42].mxu0  ;;  %v4161_v18 = vpop.f32.mrb[42].mxu1 }
 0xab7   : > { %v4140_v56 = vpop.f32.mrb[43].mxu0  ;;  %v4162_v32 = vpop.f32.mrb[43].mxu1 }
 0xab8   : > { %v3472_v3 = vadd.f32 %v4138_v16, %v3432_v29 }
 0xaba   : > { %v3512_v57 = vadd.f32 %v4160_v34, %v3472_v3 }
 0xad4   : > { %v4180_v19 = vpop.f32.mrb[44].mxu0 }
 0xad5   : > { %v4202_v8 = vpop.f32.mrb[44].mxu1  ;;  %v4181_v20 = vpop.f32.mrb[45].mxu0 }
 0xad6   : > { %v4182_v0 = vadd.f32 %v4181_v20, %v4180_v19  ;;  %v4203_v5 = vpop.f32.mrb[45].mxu1  ;;  %v4183_v21 = vpop.f32.mrb[46].mxu0 }
 0xad7   : > { %v4204_v22 = vadd.f32 %v4203_v5, %v4202_v8  ;;  %v4205_v2 = vpop.f32.mrb[46].mxu1  ;;  %v4184_v25 = vpop.f32.mrb[47].mxu0 }
 0xad8   : > { %v3552_v26 = vadd.f32 %v4182_v0, %v3512_v57  ;;  %v4206_v27 = vpop.f32.mrb[47].mxu1 }
 0xada   : > { %v3592_v35 = vadd.f32 %v4204_v22, %v3552_v26 }
 0xaf4   : > { %v4224_v36 = vpop.f32.mrb[48].mxu0 }
 0xaf5   : > { %v4246_v37 = vpop.f32.mrb[48].mxu1  ;;  %v4225_v38 = vpop.f32.mrb[49].mxu0 }
 0xaf6   : > { %v4226_v39 = vadd.f32 %v4225_v38, %v4224_v36  ;;  %v4247_v40 = vpop.f32.mrb[49].mxu1  ;;  %v4227_v42 = vpop.f32.mrb[50].mxu0 }
 0xaf7   : > { %v4248_v4 = vadd.f32 %v4247_v40, %v4246_v37  ;;  %v4249_v43 = vpop.f32.mrb[50].mxu1  ;;  %v4228_v44 = vpop.f32.mrb[51].mxu0 }
 0xaf8   : > { %v3632_v45 = vadd.f32 %v4226_v39, %v3592_v35  ;;  %v4250_v48 = vpop.f32.mrb[51].mxu1 }
 0xafa   : > { %v3672_v49 = vadd.f32 %v4248_v4, %v3632_v45 }
 0xafc   : > { %v3677_v50 = vadd.f32 %v3672_v49, %v4820_v15  ;;  %v3699_v15 = vrot.slane %v5073_v9, %v4922_v46 }
 0xafe   : > { %v3678_v51 = vsel %vm475_vm2, %v3677_v50, 0.0 }
 0xaff   : > { %3679 = vadd.xlane.f32.xlu1 %v3678_v51 }
 0xb8c   : > { %v3680_v52 = vpop.xlane.xlu1 %3679 }
 0xb8d   : > { %v3681_v53 = vmul.f32 0.03125, %v3680_v52 }
 0xb8f   : > { %v3682_v58 = vsub.f32 %v3677_v50, %v3681_v53 }
 0xb91   : > { %v3683_v59 = vmul.f32 %v3682_v58, %v3682_v58 }
 0xb93   : > { %v3684_v60 = vsel %vm475_vm2, %v3683_v59, 0.0 }
 0xb94   : > { %3685 = vadd.xlane.f32.xlu1 %v3684_v60 }
 0xc21   : > { %v3686_v61 = vpop.xlane.xlu1 %3685 }
 0xc22   : > { %v3687_v62 = vmul.f32 0.03125, %v3686_v61 }
 0xc24   : > { %v3688_v30 = vadd.f32 1e-05, %v3687_v62 }
 0xc26   : > { %4525 = vrsqrt.f32 %v3688_v30 }
 0xc30   : > { %v4526_v6 = vpop.eup %4525 }
 0xc31   : > { %v3690_v7 = vmul.f32 %v4526_v6, %v3682_v58 }
 0xc33   : > { %v3695_v10 = vmul.f32 %v3694_v63, %v3690_v7 }
 0xc35   : > { %v3700_v54 = vadd.f32 %v3699_v15, %v3695_v10 }
 0xc37   : > { %3701 = vst.msk [vmem:[%s4696_s28] sm:$0xff] %vm475_vm2, %v3700_v54 }
 0xc38 PF: > { %s18_s9 = sadd.s32 1, %s4566_s9   ;;  %s5119_s3 = sld [smem:[#allocation2_spill]] }
 0xc39   : > { %p15_p8 = scmp.ge.s32.totalorder %s18_s9, 6   ;;  %s5120_s16 = sld [smem:[#allocation3_spill]] }
 0xc3a   : > { %s5121_s27 = smov %s4558_s29  ;;  %s5122_s28 = smov %s4562_s30 }
 0xc3b   :  { %17 = sbr.rel (!%p15_p8) target bundleno = 4 (0x4), region = 107 }
 0xc3e   : > { %s5123_s29 = smov %s5119_s3 }
 0xc3f   : > { %s5124_s30 = smov %s5120_s16 }

// kernel: forward.4
= control target key start
LH: loop header
LB: loop body
LE: loop exit
PB: predicated region body
PF: predicated region fallthrough
CT: control target
= control target key end

     0   :  { %s6392_s25 = smov 0   ;;  %s6394_s26 = smov 0   ;;  %s6990_s0 = inlined_call_operand.vmem [shape: f32[2,8,32], index: 0, kind: input, shape index: {}]   ;;  %s6991_s1 = inlined_call_operand.vmem [shape: f32[2,8,32], index: 1, kind: input, shape index: {}]   ;;  %s6992_s2 = inlined_call_operand.vmem [shape: bf16[2,32,96], index: 2, kind: input, shape index: {}]   ;;  %s6993_s3 = inlined_call_operand.vmem [shape: f32[2,1,96], index: 3, kind: input, shape index: {}]   ;;  %s6994_s4 = inlined_call_operand.vmem [shape: bf16[2,32,32], index: 4, kind: input, shape index: {}]   ;;  %s6995_s5 = inlined_call_operand.vmem [shape: bf16[2,32,32], index: 5, kind: input, shape index: {}]   ;;  %s6996_s6 = inlined_call_operand.vmem [shape: bf16[2,32,64], index: 6, kind: input, shape index: {}]   ;;  %s6997_s7 = inlined_call_operand.vmem [shape: f32[2,1,64], index: 7, kind: input, shape index: {}]   ;;  %s6998_s8 = inlined_call_operand.vmem [shape: bf16[2,32,32], index: 8, kind: input, shape index: {}]   ;;  %s6999_s9 = inlined_call_operand.vmem [shape: bf16[2,32,2048], index: 9, kind: input, shape index: {}]   ;;  %s7000_s10 = inlined_call_operand.vmem [shape: f32[2,1,2048], index: 10, kind: input, shape index: {}]   ;;  %s7001_s11 = inlined_call_operand.vmem [shape: bf16[2,2048,32], index: 11, kind: input, shape index: {}]   ;;  %s7002_s12 = inlined_call_operand.vmem [shape: f32[2,10,32], index: 12, kind: input, shape index: {}]   ;;  %s7003_s13 = inlined_call_operand.vmem [shape: f32[2,8,32], index: 13, kind: output, shape index: {}]  }
   0x1   :  { %7008 = sst [smem:[#allocation8_spill]] %s6990_s0  ;;  %s6396_s27 = smov 0  }
   0x2   :  { %7009 = sst [smem:[#allocation9_spill]] %s6991_s1  ;;  %s6398_s28 = smov 0  }
   0x3   :  { %7010 = sst [smem:[#allocation10_spill]] %s6992_s2  ;;  %s6400_s29 = smov 0  }
   0x4   :  { %7011 = sst [smem:[#allocation11_spill]] %s6994_s4 }
   0x5   :  { %7012 = sst [smem:[#allocation12_spill]] %s6995_s5 }
   0x6   :  { %7013 = sst [smem:[#allocation13_spill]] %s6996_s6 }
   0x7   :  { %7014 = sst [smem:[#allocation14_spill]] %s6998_s8 }
   0x8   :  { %7015 = sst [smem:[#allocation15_spill]] %s7000_s10 }
   0x9 LB: > { %7016 = sst [smem:[#allocation2_spill]] %s6299_s25  ;;  %s32_s30 = sadd.s32 1, %s6307_s27  ;;  %s6315_s29 = sphi %s6400_s29, %s23_s29   ;;  %s6311_s28 = sphi %s6398_s28, %s7039_s28   ;;  %s6307_s27 = sphi %s6396_s27, %s7038_s27   ;;  %s6303_s26 = sphi %s6394_s26, %s7037_s26   ;;  %s6299_s25 = sphi %s6392_s25, %s7036_s25  }
   0xa   : > { %7017 = sst [smem:[#allocation3_spill]] %s6307_s27  ;;  %s35_s14 = sadd.s32 1, %s6311_s28 }
   0xb   : > { %7018 = sst [smem:[#allocation4_spill]] %s6311_s28  ;;  %p33_p0 = scmp.ge.s32.totalorder %s32_s30, 2 }
   0xc   : > { %7019 = sst [smem:[#allocation5_spill]] %s6315_s29  ;;  %p5434_p1 = scmp.ge.s32.totalorder %s6315_s29, 1 }
   0xd   : > { %p512_p2 = scmp.lt.s32.totalorder %s6315_s29, 5  ;;  %s7041_s30 = smov (%p33_p0, %s32_s30), 0 }
   0xe   : > { %7020 = sst [smem:[#allocation6_spill]] %s7041_s30  ;;  %s7043_s14 = smov (!%p33_p0, %s35_s14), %s6311_s28 }
   0xf   : > { %p513_p3 = pnand %p5434_p1, %p512_p2  ;;  %p37_p4 = scmp.ge.s32.totalorder %s7043_s14, 2 }
  0x10   : > { %p608_p5 = scmp.lt.s32.totalorder (!%p513_p3), %s6303_s26, 1  ;;  %p616_p6 = scmp.lt.s32.totalorder (!%p513_p3), %s6299_s25, 1 }
  0x11   : > { %s7045_s14 = smov (%p37_p4, %s7043_s14), 0  ;;  %516 = sbr.rel (%p513_p3) target bundleno = 5358 (0x14ee), region = 72 }
  0x12   : > { %7021 = sst [smem:[#allocation7_spill]] %s7045_s14  ;;  %s7022_s0 = sld [smem:[#allocation8_spill]] (!%p513_p3) }
  0x13   : > { %s7024_s2 = sld [smem:[#allocation10_spill]] (!%p513_p3)  ;;  %s7025_s4 = sld [smem:[#allocation11_spill]] (!%p513_p3) }
  0x14   : > { %s7026_s5 = sld [smem:[#allocation12_spill]] (!%p513_p3)  ;;  %s7027_s6 = sld [smem:[#allocation13_spill]] (!%p513_p3) }
  0x15   : > { %s7028_s8 = sld [smem:[#allocation14_spill]] (!%p513_p3)  ;;  %s7029_s10 = sld [smem:[#allocation15_spill]] (!%p513_p3) }
  0x18   : > { %s7047_s26 = smov (!%p608_p5, %s6303_s26), 1 }
  0x19   : > { %s6426_s15 = scalar_select %p616_p6, %s6299_s25, 1 }
  0x1a   : > { %s6428_s16 = sshll.u32 %s7047_s26, 3 }
  0x1b   : > { %s611_s19 = scalar_lea.vmem %s7022_s0, %s6428_s16  ;;  %s5659_s23 = sshll.u32 %s6426_s15, 4 }
  0x1c   : > { %s620_s26 = scalar_lea.vmem %s7024_s2, %s5659_s23  ;;  %s6449_s17 = scalar_lea.vmem %s7025_s4, %s5659_s23 }
  0x1d   : > { %s6454_s20 = scalar_lea.vmem %s7026_s5, %s5659_s23  ;;  %s6459_s1 = scalar_lea.vmem %s7027_s6, %s5659_s23 }
  0x1e   : > { %s6468_s25 = scalar_lea.vmem %s7028_s8, %s5659_s23  ;;  %s5664_s29 = sshll.u32 %s6426_s15, 8 }
  0x1f   : > { %s6474_s0 = scalar_lea.vmem %s7029_s10, %s5659_s23  ;;  %s6479_s22 = scalar_lea.vmem %s6999_s9, %s5664_s29 }
  0x20   : > { %s5665_s21 = sshll.u32 %s6426_s15, 10  ;;  %s6490_s27 = scalar_lea.vmem %s7002_s12, %s5659_s23 }
  0x21   : > { %s6485_s24 = scalar_lea.vmem %s7001_s11, %s5665_s21  ;;  %s6496_s4 = scalar_lea.vmem %s7003_s13, %s6428_s16 }
  0x22   : > { %s7030_s10 = sld [smem:[#allocation2_spill]] }
  0x28   : > { %p5455_p7 = scmp.ne.s32.totalorder %s7030_s10, 0 }
  0x29   : > { %v675_v0 = vld [vmem:[%s611_s19] sm:$0xff] (!%p5455_p7)  ;;  %vm676_vm0 = vcmask (!%p5455_p7), 261120  }
  0x2a   : > { %674 = sbr.rel (%p5455_p7) target bundleno = 49 (0x31), region = 76  ;;  %677 = vst.msk [vmem:[%s6496_s4] sm:$0xff] (!%p5455_p7), %vm676_vm0, %v675_v0 }
  0x31 PF: > { %v6099_v1 = vld [vmem:[%s620_s26] sm:$0xff]   ;;  %v6317_v2 = vmov 0.0   ;;  %v6100_v3 = vld [vmem:[%s620_s26 + $0x8] sm:$0xff]   ;;  %vm6318_vm1 = vmmov 0   ;;  %vm706_vm2 = vcmask 261120   ;;  %s7031_s8 = scalar_lea.vmem %s6993_s3, %s6426_s15  ;;  %s6319_s10 = smov 96  }
  0x32   : > { %5890 = vmatprep.subr.bf16.mxu0 %v6317_v2  ;;  %5898 = vmatprep.subr.bf16.mxu1 %v6317_v2  ;;  %v678_v4 = vld [vmem:[%s6496_s4] sm:$0xff]  ;;  %vm1245_vm3 = vcmask 64512   ;;  %s6320_s19 = smov 64   ;;  %vm1489_vm4 = vcmask 1043456  }
  0x33   : > { %5891 = vmatpush3.bf16.msra.mxu0 %v6099_v1  ;;  %5894 = vmatprep.mubr.msk.bf16.mxu0 %vm6318_vm1, %v6317_v2  ;;  %v686_v5 = vpack.c.bf16 %v678_v4, %v678_v4  ;;  %v5456_v6 = vld [vmem:[%s7031_s8] ss:$0 sm:$0xff] }
  0x34   : > { %5892 = vmatprep.subr.bf16.mxu0 %v6317_v2  ;;  %5900 = vmatprep.mubr.msk.bf16.mxu1 %vm6318_vm1, %v6317_v2 }
  0x37   : > { %5893 = vmatpush3.bf16.msra.mxu0 %v6100_v3 }
  0x38   : > { %5904 = vmatprep.subr.bf16.mxu0 %v6317_v2 }
  0x3a   : > { %5895 = vmatmul.mubr.msk.bf16.vlgmr.msra.gmra.mrb[0].mxu0 %vm706_vm2, %v686_v5 }
  0x3b   : > { %5906 = vmatprep.mubr.msk.bf16.mxu0 %vm6318_vm1, %v6317_v2 }
 0x10d   : > { %v744_v7 = vpop.f32.mrb[0].mxu0 }
 0x10e   : > { %v6517_v8 = vadd.f32 %v5456_v6, %v744_v7  ;;  %v5896_v9 = vpop.f32.mrb[1].mxu0 }
 0x10f   : > { %v747_v10 = vpop.f32.mrb[2].mxu0 }
 0x110   : > { %750 = vxpose.xlu1.b32.start.end [1/1] (short) (narrow) %v6517_v8, 32  ;;  %911 = vrot.lane.b32.xlu0 %v6517_v8, %s6319_s10  ;;  %v5897_v11 = vpop.f32.mrb[3].mxu0 }
 0x182   : > { %v912_v12 = vpop.permute.xlu0 %911 }
 0x183   : > { %914 = vxpose.xlu0.b32.start.end [1/1] (short) (narrow) %v912_v12, 32 }
 0x190   : > { %v766_v15 = vpop.trf.xlu1 }
 0x194   : > { %v767_v18 = vpop.trf.xlu1 }
 0x198   : > { %v768_v21 = vpop.trf.xlu1 }
 0x19c   : > { %v769_v22 = vpop.trf.xlu1 }
 0x203   : > { %v930_v13 = vpop.trf.xlu0 }
 0x204   : > { %946 = vxpose.xlu1.b32.start.end [1/1] (short) (narrow) %v930_v13, 8 }
 0x207   : > { %v931_v14 = vpop.trf.xlu0 }
 0x208   : > { %978 = vxpose.xlu1.b32.start.end [1/1] (short) (narrow) %v931_v14, 8 }
 0x20b   : > { %v932_v16 = vpop.trf.xlu0 }
 0x20c   : > { %v6071_v17 = vpack.i.bf16 %v932_v16, %v766_v15 }
 0x20e   : > { %6072 = vxpose.xlu1.b32.start.end [1/1] (short) (narrow) %v6071_v17, 8 }
 0x20f   : > { %v933_v19 = vpop.trf.xlu0 }
 0x210   : > { %v6078_v20 = vpack.i.bf16 %v933_v19, %v767_v18 }
 0x212   : > { %6079 = vxpose.xlu1.b32.start.end [1/1] (short) (narrow) %v6078_v20, 8 }
 0x216   : > { %846 = vxpose.xlu1.b32.start.end [1/1] (short) (narrow) %v768_v21, 8 }
 0x21a   : > { %878 = vxpose.xlu1.b32.start.end [1/1] (short) (narrow) %v769_v22, 8 }
 0x284   : > { %v962_v23 = vpop.trf.xlu1 }
 0x285   : > { %v1241_v24 = vpack.c.bf16 %v962_v23, %v962_v23 }
 0x287   : > { %v1250_v25 = vsel %vm1245_vm3, %v1241_v24, 0 }
 0x288   : > { %5899 = vmatpush3.bf16.xpose.msra.mxu1 %v1250_v25  ;;  %v994_v26 = vpop.trf.xlu1 }
 0x289   : > { %v1242_v27 = vpack.c.bf16 %v994_v26, %v994_v26  ;;  %5910 = vmatprep.subr.bf16.mxu1 %v6317_v2 }
 0x28b   : > { %v1296_v28 = vsel %vm1245_vm3, %v1242_v27, 0 }
 0x28c   : > { %5905 = vmatpush3.bf16.xpose.msra.mxu0 %v1296_v28 }
 0x28d   : > { %5916 = vmatprep.subr.bf16.mxu0 %v6317_v2 }
 0x28e   : > { %v6073_v29 = vpop.trf.xlu1 }
 0x28f   : > { %v6077_v30 = vunpack.i.h.bf16 %v6073_v29  ;;  %v6074_v31 = vunpack.i.l.bf16 %v6073_v29 }
 0x291   : > { %v1237_v32 = vpack.c.bf16 %v6074_v31, %v6074_v31  ;;  %v1243_v33 = vpack.c.bf16 %v6077_v30, %v6077_v30 }
 0x292   : > { %v6080_v34 = vpop.trf.xlu1 }
 0x293   : > { %v6084_v35 = vunpack.i.h.bf16 %v6080_v34  ;;  %v6081_v36 = vunpack.i.l.bf16 %v6080_v34  ;;  %5901 = vmatmul.mubr.msk.bf16.vlgmr.msra.gmra.mrb[0].mxu1 %vm1245_vm3, %v1237_v32  ;;  %v1342_v37 = vsel %vm1245_vm3, %v1243_v33, 0 }
 0x294   : > { %5912 = vmatprep.mubr.msk.bf16.mxu1 %vm6318_vm1, %v6317_v2  ;;  %5911 = vmatpush3.bf16.xpose.msra.mxu1 %v1342_v37 }
 0x295   : > { %v1238_v38 = vpack.c.bf16 %v6081_v36, %v6081_v36  ;;  %v1244_v39 = vpack.c.bf16 %v6084_v35, %v6084_v35  ;;  %5922 = vmatprep.subr.bf16.mxu1 %v6317_v2 }
 0x296   : > { %v862_v40 = vpop.trf.xlu1 }
 0x297   : > { %5907 = vmatmul.mubr.msk.bf16.vlgmr.msra.gmra.mrb[4].mxu0 %vm1245_vm3, %v1238_v38  ;;  %v1388_v41 = vsel %vm1245_vm3, %v1244_v39, 0  ;;  %v1239_v42 = vpack.c.bf16 %v862_v40, %v862_v40 }
 0x298   : > { %5917 = vmatpush3.bf16.xpose.msra.mxu0 %v1388_v41  ;;  %5918 = vmatprep.mubr.msk.bf16.mxu0 %vm6318_vm1, %v6317_v2 }
 0x299   : > { %5928 = vmatprep.subr.bf16.mxu0 %v6317_v2 }
 0x29a   : > { %v894_v43 = vpop.trf.xlu1 }
 0x29b   : > { %v1240_v44 = vpack.c.bf16 %v894_v43, %v894_v43  ;;  %5913 = vmatmul.mubr.msk.bf16.vlgmr.msra.gmra.mrb[4].mxu1 %vm1245_vm3, %v1239_v42 }
 0x29c   : > { %5924 = vmatprep.mubr.msk.bf16.mxu1 %vm6318_vm1, %v6317_v2 }
 0x29f   : > { %5919 = vmatmul.mubr.msk.bf16.vlgmr.msra.gmra.mrb[8].mxu0 %vm1245_vm3, %v1240_v44 }
 0x2a0   : > { %5930 = vmatprep.mubr.msk.bf16.mxu0 %vm6318_vm1, %v6317_v2 }
 0x366   : > { %v1286_v45 = vpop.f32.mrb[0].mxu1 }
 0x367   : > { %v1430_v46 = vmul.f32 0.35355338, %v1286_v45  ;;  %v5902_v47 = vpop.f32.mrb[1].mxu1 }
 0x368   : > { %v1289_v48 = vpop.f32.mrb[2].mxu1 }
 0x369   : > { %v5903_v49 = vpop.f32.mrb[3].mxu1  ;;  %v1434_v50 = vsel %vm1245_vm3, %v1430_v46, -inf }
 0x36a   : > { %1435 = vmax.xlane.f32.xlu0 %v1434_v50  ;;  %v1332_v51 = vpop.f32.mrb[4].mxu0 }
 0x36b   : > { %v1431_v52 = vmul.f32 0.35355338, %v1332_v51  ;;  %v5908_v53 = vpop.f32.mrb[5].mxu0 }
 0x36c   : > { %v1335_v54 = vpop.f32.mrb[6].mxu0 }
 0x36d   : > { %v5909_v55 = vpop.f32.mrb[7].mxu0  ;;  %v1437_v56 = vsel %vm1245_vm3, %v1431_v52, -inf }
 0x36e   : > { %1438 = vmax.xlane.f32.xlu1 %v1437_v56  ;;  %v1378_v57 = vpop.f32.mrb[4].mxu1 }
 0x36f   : > { %v1432_v58 = vmul.f32 0.35355338, %v1378_v57  ;;  %v5914_v59 = vpop.f32.mrb[5].mxu1 }
 0x370   : > { %v1381_v60 = vpop.f32.mrb[6].mxu1 }
 0x371   : > { %v5915_v61 = vpop.f32.mrb[7].mxu1  ;;  %v1440_v62 = vsel %vm1245_vm3, %v1432_v58, -inf }
 0x372   : > { %v1424_v63 = vpop.f32.mrb[8].mxu0  ;;  %1441 = vmax.xlane.f32.xlu1 %v1440_v62 }
 0x373   : > { %v1433_v0 = vmul.f32 0.35355338, %v1424_v63  ;;  %v5920_v1 = vpop.f32.mrb[9].mxu0 }
 0x374   : > { %v1427_v3 = vpop.f32.mrb[10].mxu0 }
 0x375   : > { %v5921_v4 = vpop.f32.mrb[11].mxu0  ;;  %v1443_v5 = vsel %vm1245_vm3, %v1433_v0, -inf }
 0x376   : > { %1444 = vmax.xlane.f32.xlu1 %v1443_v5 }
 0x387   : > { %1074 = vrot.lane.b32.xlu1 %v6517_v8, %s6320_s19 }
 0x3f7   : > { %v1436_v15 = vpop.xlane.xlu0 %1435 }
 0x3f8   : > { %v1446_v16 = vsub.f32 %v1430_v46, %v1436_v15 }
 0x3fa   : > { %v1450_v17 = vmul.f32 1.442695, %v1446_v16 }
 0x3fb   : > { %v1439_v6 = vpop.xlane.xlu1 %1438 }
 0x3fc   : > { %v1447_v18 = vsub.f32 %v1431_v52, %v1439_v6 }
 0x3fe   : > { %v1452_v8 = vmul.f32 1.442695, %v1447_v18 }
 0x3ff   : > { %v1442_v7 = vpop.xlane.xlu1 %1441 }
 0x400   : > { %v1448_v19 = vsub.f32 %v1432_v58, %v1442_v7 }
 0x402   : > { %v1454_v20 = vmul.f32 1.442695, %v1448_v19 }
 0x403   : > { %v1445_v9 = vpop.xlane.xlu1 %1444 }
 0x404   : > { %v1449_v10 = vsub.f32 %v1433_v0, %v1445_v9 }
 0x406   : > { %v1456_v11 = vmul.f32 1.442695, %v1449_v10 }
 0x407   : > { %v1075_v12 = vpop.permute.xlu1 %1074 }
 0x408   : > { %6237 = vpow2.f32 %v1456_v11  ;;  %1077 = vxpose.xlu0.b32.start.end [1/1] (short) (narrow) %v1075_v12, 32  ;;  %v6101_v12 = vld [vmem:[%s6449_s17] sm:$0xff]  }
 0x409   : > { %6239 = vpow2.f32 %v1450_v17 }
 0x40a   : > { %6241 = vpow2.f32 %v1452_v8 }
 0x40b   : > { %6243 = vpow2.f32 %v1454_v20  ;;  %v1836_v20 = vlaneseq }
 0x412   : > { %v6547_v13 = vpop.eup %6237 }
 0x413   : > { %v1467_v14 = vsel %vm1245_vm3, %v6547_v13, 0.0  ;;  %v6240_v21 = vpop.eup %6239 }
 0x414   : > { %1468 = vadd.xlane.f32.xlu1 %v1467_v14  ;;  %v1458_v22 = vsel %vm1245_vm3, %v6240_v21, 0.0  ;;  %v6242_v23 = vpop.eup %6241  ;;  %v6102_v14 = vld [vmem:[%s6449_s17 + $0x8] sm:$0xff]   ;;  %s7032_s17 = sld [smem:[#allocation9_spill]] }
 0x415   : > { %v1461_v24 = vsel %vm1245_vm3, %v6242_v23, 0.0  ;;  %v6244_v25 = vpop.eup %6243 }
 0x416   : > { %v1464_v26 = vsel %vm1245_vm3, %v6244_v25, 0.0 }
 0x41a   : > { %s7033_s29 = scalar_lea.vmem %s7032_s17, %s6428_s16 }
 0x441   : > { %1459 = vadd.xlane.f32.xlu0 %v1458_v22 }
 0x445   : > { %1462 = vadd.xlane.f32.xlu0 %v1461_v24 }
 0x449   : > { %1465 = vadd.xlane.f32.xlu0 %v1464_v26 }
 0x488   : > { %v1093_v27 = vpop.trf.xlu0 }
 0x489   : > { %1109 = vxpose.xlu1.b32.start.end [1/1] (short) (narrow) %v1093_v27, 8 }
 0x48c   : > { %v1094_v28 = vpop.trf.xlu0 }
 0x48d   : > { %1141 = vxpose.xlu0.b32.start.end [1/1] (short) (narrow) %v1094_v28, 8 }
 0x490   : > { %v1095_v29 = vpop.trf.xlu0 }
 0x491   : > { %1173 = vxpose.xlu0.b32.start.end [1/1] (short) (narrow) %v1095_v29, 8 }
 0x494   : > { %v1096_v30 = vpop.trf.xlu0 }
 0x495   : > { %1205 = vxpose.xlu0.b32.start.end [1/1] (short) (narrow) %v1096_v30, 8  ;;  %v6275_v30 = vld [vmem:[%s6496_s4] sm:$0xff] }
 0x4a1   : > { %v1469_v34 = vpop.xlane.xlu1 %1468 }
 0x4ce   : > { %v1460_v31 = vpop.xlane.xlu0 %1459 }
 0x4cf   : > { %6245 = vrcp.f32 %v1460_v31 }
 0x4d2   : > { %v1463_v32 = vpop.xlane.xlu0 %1462 }
 0x4d3   : > { %6247 = vrcp.f32 %v1463_v32 }
 0x4d6   : > { %v1466_v33 = vpop.xlane.xlu0 %1465 }
 0x4d7   : > { %6249 = vrcp.f32 %v1466_v33 }
 0x4d8   : > { %6251 = vrcp.f32 %v1469_v34 }
 0x4d9   : > { %v6246_v35 = vpop.eup %6245 }
 0x4da   : > { %v1474_v37 = vmul.f32 %v6246_v35, %v6240_v21  ;;  %v6582_v21 = vshrl.u32 %v1836_v20, 7 }
 0x4dc   : > { %v1478_v44 = vpack.c.bf16 %v1474_v37, %v1474_v37  ;;  %v6585_v22 = vsub.s32 0, %v6582_v21 }
 0x4dd   : > { %v6248_v39 = vpop.eup %6247 }
 0x4de   : > { %v1475_v42 = vmul.f32 %v6248_v39, %v6242_v23  ;;  %v6588_v23 = vld [vmem:[%s6490_s27] sm:$0xff]  ;;  %v6104_v39 = vld [vmem:[%s6459_s1 + $0x8] sm:$0xff]  }
 0x4df   : > { %v1839_v24 = vrot.slane %v6588_v23, %v6585_v22 }
 0x4e0   : > { %v1479_v50 = vpack.c.bf16 %v1475_v42, %v1475_v42  ;;  %v6105_v42 = vld [vmem:[%s6454_s20] sm:$0xff]  }
 0x4e1   : > { %v6250_v45 = vpop.eup %6249 }
 0x4e2   : > { %v1476_v48 = vmul.f32 %v6250_v45, %v6244_v25  ;;  %v6252_v51 = vpop.eup %6251 }
 0x4e3   : > { %v1477_v54 = vmul.f32 %v6252_v51, %v6547_v13 }
 0x4e4   : > { %v1480_v56 = vpack.c.bf16 %v1476_v48, %v1476_v48  ;;  %v6615_v48 = vsub.s32 5, %v6582_v21 }
 0x4e5   : > { %v1481_v58 = vpack.c.bf16 %v1477_v54, %v1477_v54 }
 0x509   : > { %v1125_v36 = vpop.trf.xlu1 }
 0x50a   : > { %v1482_v38 = vpack.c.bf16 %v1125_v36, %v1125_v36 }
 0x50c   : > { %v1491_v40 = vsel %vm1489_vm4, %v1482_v38, 0  ;;  %v6103_v38 = vld [vmem:[%s6459_s1] sm:$0xff]  }
 0x50d   : > { %5923 = vmatpush3.bf16.msra.mxu1 %v1491_v40  ;;  %v1157_v41 = vpop.trf.xlu0  ;;  %v679_v40 = vld [vmem:[%s7033_s29] sm:$0xff] }
 0x50e   : > { %v1483_v43 = vpack.c.bf16 %v1157_v41, %v1157_v41  ;;  %5934 = vmatprep.subr.bf16.mxu1 %v6317_v2  ;;  %v1988_v41 = vpack.c.bf16 %v679_v40, %v679_v40 }
 0x510   : > { %v1537_v46 = vsel %vm1489_vm4, %v1483_v43, 0  ;;  %5925 = vmatmul.mubr.msk.bf16.vlgmr.msra.gmra.mrb[8].mxu1 %vm1245_vm3, %v1478_v44  ;;  %v6106_v43 = vld [vmem:[%s6454_s20 + $0x8] sm:$0xff]   ;;  %s7034_s20 = scalar_lea.vmem %s6997_s7, %s6426_s15 }
 0x511   : > { %5929 = vmatpush3.bf16.msra.mxu0 %v1537_v46  ;;  %v1189_v47 = vpop.trf.xlu0  ;;  %5936 = vmatprep.mubr.msk.bf16.mxu1 %vm6318_vm1, %v6317_v2 }
 0x512   : > { %v1484_v49 = vpack.c.bf16 %v1189_v47, %v1189_v47  ;;  %5940 = vmatprep.subr.bf16.mxu0 %v6317_v2  ;;  %v6612_v47 = vsub.s32 4, %v6582_v21 }
 0x514   : > { %v1583_v52 = vsel %vm1489_vm4, %v1484_v49, 0  ;;  %5931 = vmatmul.mubr.msk.bf16.vlgmr.msra.gmra.mrb[12].mxu0 %vm1245_vm3, %v1479_v50  ;;  %v1913_v49 = vrot.slane %v6588_v23, %v6612_v47 }
 0x515   : > { %5935 = vmatpush3.bf16.msra.mxu1 %v1583_v52  ;;  %v1221_v53 = vpop.trf.xlu0  ;;  %5942 = vmatprep.mubr.msk.bf16.mxu0 %vm6318_vm1, %v6317_v2  ;;  %v1918_v52 = vrot.slane %v6588_v23, %v6615_v48 }
 0x516   : > { %v1485_v55 = vpack.c.bf16 %v1221_v53, %v1221_v53  ;;  %5946 = vmatprep.subr.bf16.mxu1 %v6317_v2 }
 0x518   : > { %v1629_v57 = vsel %vm1489_vm4, %v1485_v55, 0  ;;  %5937 = vmatmul.mubr.msk.bf16.vlgmr.msra.gmra.mrb[12].mxu1 %vm1245_vm3, %v1480_v56  ;;  %v5474_v56 = vld [vmem:[%s7034_s20] ss:$0 sm:$0xff] }
 0x519   : > { %5941 = vmatpush3.bf16.msra.mxu0 %v1629_v57  ;;  %5950 = vmatprep.mubr.msk.bf16.mxu1 %vm6318_vm1, %v6317_v2 }
 0x51a   : > { %5954 = vmatprep.subr.bf16.mxu0 %v6317_v2  ;;  %5947 = vmatpush3.bf16.msra.mxu1 %v6101_v12 }
 0x51b   : > { %5948 = vmatprep.subr.bf16.mxu1 %v6317_v2 }
 0x51c   : > { %5943 = vmatmul.mubr.msk.bf16.vlgmr.msra.gmra.mrb[16].mxu0 %vm1245_vm3, %v1481_v58 }
 0x51d   : > { %5958 = vmatprep.mubr.msk.bf16.mxu0 %vm6318_vm1, %v6317_v2  ;;  %5955 = vmatpush3.bf16.msra.mxu0 %v6105_v42 }
 0x51e   : > { %5949 = vmatpush3.bf16.msra.mxu1 %v6102_v14  ;;  %5956 = vmatprep.subr.bf16.mxu0 %v6317_v2 }
 0x51f   : > { %5962 = vmatprep.subr.bf16.mxu1 %v6317_v2 }
 0x521   : > { %5957 = vmatpush3.bf16.msra.mxu0 %v6106_v43 }
 0x522   : > { %5970 = vmatprep.subr.bf16.mxu0 %v6317_v2 }
 0x5e3   : > { %v1527_v59 = vpop.f32.mrb[8].mxu1 }
 0x5e4   : > { %1671 = vxpose.xlu0.b32.start.end [1/1] (short) (narrow) %v1527_v59, 8  ;;  %v5926_v60 = vpop.f32.mrb[9].mxu1 }
 0x5e5   : > { %v1530_v61 = vpop.f32.mrb[10].mxu1 }
 0x5e6   : > { %v5927_v62 = vpop.f32.mrb[11].mxu1 }
 0x5e7   : > { %v1573_v63 = vpop.f32.mrb[12].mxu0 }
 0x5e8   : > { %1703 = vxpose.xlu0.b32.start.end [1/1] (short) (narrow) %v1573_v63, 8  ;;  %v5932_v0 = vpop.f32.mrb[13].mxu0  ;;  %v6637_v63 = vsub.s32 1, %v6582_v21 }
 0x5e9   : > { %v1576_v1 = vpop.f32.mrb[14].mxu0 }
 0x5ea   : > { %v5933_v3 = vpop.f32.mrb[15].mxu0  ;;  %v1928_v0 = vrot.slane %v6588_v23, %v6637_v63 }
 0x5eb   : > { %v1619_v4 = vpop.f32.mrb[12].mxu1 }
 0x5ec   : > { %v5938_v5 = vpop.f32.mrb[13].mxu1  ;;  %1735 = vxpose.xlu0.b32.start.end [1/1] (short) (narrow) %v1619_v4, 8 }
 0x5ed   : > { %v1622_v6 = vpop.f32.mrb[14].mxu1 }
 0x5ee   : > { %v5939_v7 = vpop.f32.mrb[15].mxu1 }
 0x5ef   : > { %v1665_v9 = vpop.f32.mrb[16].mxu0 }
 0x5f0   : > { %1767 = vxpose.xlu0.b32.start.end [1/1] (short) (narrow) %v1665_v9, 8  ;;  %v5944_v10 = vpop.f32.mrb[17].mxu0 }
 0x5f1   : > { %v1668_v11 = vpop.f32.mrb[18].mxu0 }
 0x5f2   : > { %v5945_v13 = vpop.f32.mrb[19].mxu0 }
 0x664   : > { %v1687_v15 = vpop.trf.xlu0 }
 0x665   : > { %1799 = vxpose.xlu0.b32.start [1/4] (short) (narrow) %v1687_v15, 8 }
 0x668   : > { %v1719_v16 = vpop.trf.xlu0 }
 0x669   : > { %1800 = vxpose.xlu0.b32.cont [2/4] (short) (narrow) %v1719_v16, 8 }
 0x66c   : > { %v1751_v17 = vpop.trf.xlu0 }
 0x66d   : > { %1801 = vxpose.xlu0.b32.cont [3/4] (short) (narrow) %v1751_v17, 8 }
 0x670   : > { %v1783_v18 = vpop.trf.xlu0 }
 0x671   : > { %1802 = vxpose.xlu0.b32.end [4/4] (short) (narrow) %v1783_v18, 8 }
 0x6e5   : > { %v1815_v8 = vpop.trf.xlu0 }
 0x6e6   : > { %v1835_v19 = vpack.c.bf16 %v1815_v8, %v1815_v8 }
 0x6e8   : > { %5951 = vmatmul.mubr.msk.bf16.vlgmr.msra.gmra.mrb[16].mxu1 %vm706_vm2, %v1835_v19 }
 0x6e9   : > { %5966 = vmatprep.mubr.msk.bf16.mxu1 %vm6318_vm1, %v6317_v2  ;;  %5963 = vmatpush3.bf16.msra.mxu1 %v6103_v38 }
 0x6ea   : > { %5964 = vmatprep.subr.bf16.mxu1 %v6317_v2 }
 0x6ed   : > { %5965 = vmatpush3.bf16.msra.mxu1 %v6104_v39 }
 0x6ee   : > { %5976 = vmatprep.subr.bf16.mxu1 %v6317_v2 }
 0x6f0   : > { %5967 = vmatmul.mubr.msk.bf16.vlgmr.msra.gmra.mrb[20].mxu1 %vm706_vm2, %v1988_v41 }
 0x6f1   : > { %5978 = vmatprep.mubr.msk.bf16.mxu1 %vm6318_vm1, %v6317_v2 }
 0x7bb   : > { %v1889_v25 = vpop.f32.mrb[16].mxu1 }
 0x7bc   : > { %v1890_v26 = vadd.f32 %v1889_v25, %v1839_v24  ;;  %v5952_v27 = vpop.f32.mrb[17].mxu1 }
 0x7bd   : > { %v1892_v28 = vpop.f32.mrb[18].mxu1 }
 0x7be   : > { %v5953_v29 = vpop.f32.mrb[19].mxu1  ;;  %v1895_v31 = vadd.f32 %v6275_v30, %v1890_v26 }
 0x7c0   : > { %v1896_v32 = vsel %vm706_vm2, %v1895_v31, 0.0 }
 0x7c1   : > { %1897 = vadd.xlane.f32.xlu1 %v1896_v32 }
 0x7c3   : > { %v2045_v57 = vpop.f32.mrb[20].mxu1 }
 0x7c4   : > { %v6633_v58 = vadd.f32 %v5474_v56, %v2045_v57  ;;  %v5968_v59 = vpop.f32.mrb[21].mxu1 }
 0x7c5   : > { %v2048_v60 = vpop.f32.mrb[22].mxu1 }
 0x7c6   : > { %v5969_v61 = vpop.f32.mrb[23].mxu1 }
 0x7f4   : > { %2211 = vxpose.xlu1.b32.start.end [1/1] (short) (narrow) %v6633_v58, 32 }
 0x84e   : > { %v1898_v33 = vpop.xlane.xlu1 %1897 }
 0x84f   : > { %v1900_v34 = vmul.f32 0.03125, %v1898_v33 }
 0x851   : > { %v1901_v35 = vsub.f32 %v1895_v31, %v1900_v34 }
 0x853   : > { %v1902_v36 = vmul.f32 %v1901_v35, %v1901_v35 }
 0x855   : > { %v1903_v37 = vsel %vm706_vm2, %v1902_v36, 0.0 }
 0x856   : > { %1904 = vadd.xlane.f32.xlu0 %v1903_v37 }
 0x874   : > { %v2227_v62 = vpop.trf.xlu1 }
 0x875   : > { %2243 = vxpose.xlu1.b32.start.end [1/1] (short) (narrow) %v2227_v62, 8 }
 0x878   : > { %v2228_v7 = vpop.trf.xlu1 }
 0x87c   : > { %v2229_v9 = vpop.trf.xlu1 }
 0x880   : > { %v2230_v10 = vpop.trf.xlu1 }
 0x8e3   : > { %v1905_v44 = vpop.xlane.xlu0 %1904 }
 0x8e4   : > { %v1906_v45 = vmul.f32 0.03125, %v1905_v44 }
 0x8e6   : > { %v1907_v46 = vadd.f32 1e-05, %v1906_v45 }
 0x8e8   : > { %6253 = vrsqrt.f32 %v1907_v46 }
 0x8f2   : > { %v6254_v50 = vpop.eup %6253 }
 0x8f3   : > { %v1909_v51 = vmul.f32 %v6254_v50, %v1901_v35 }
 0x8f5   : > { %v1914_v53 = vmul.f32 %v1913_v49, %v1909_v51  ;;  %v2259_v11 = vpop.trf.xlu1 }
 0x8f6   : > { %v2539_v12 = vpack.c.bf16 %v2259_v11, %v2259_v11 }
 0x8f7   : > { %v6621_v54 = vadd.f32 %v1918_v52, %v1914_v53 }
 0x8f8   : > { %v2547_v13 = vsel %vm1245_vm3, %v2539_v12, 0 }
 0x8f9   : > { %v1924_v55 = vpack.c.bf16 %v6621_v54, %v6621_v54 }
 0x8fb   : > { %5959 = vmatmul.mubr.msk.bf16.vlgmr.msra.gmra.mrb[20].mxu0 %vm706_vm2, %v1924_v55 }
 0x8fc   : > { %5972 = vmatprep.mubr.msk.bf16.mxu0 %vm6318_vm1, %v6317_v2  ;;  %5971 = vmatpush3.bf16.xpose.msra.mxu0 %v2547_v13 }
 0x8fd   : > { %5982 = vmatprep.subr.bf16.mxu0 %v6317_v2 }
 0x9ce   : > { %v1978_v1 = vpop.f32.mrb[20].mxu0 }
 0x9cf   : > { %v1979_v3 = vadd.f32 %v1978_v1, %v1928_v0  ;;  %v5960_v4 = vpop.f32.mrb[21].mxu0 }
 0x9d0   : > { %v1981_v5 = vpop.f32.mrb[22].mxu0 }
 0x9d1   : > { %2051 = vxpose.xlu0.b32.start.end [1/1] (short) (narrow) %v1979_v3, 32  ;;  %v5961_v6 = vpop.f32.mrb[23].mxu0 }
 0x9de   : > { %2275 = vxpose.xlu0.b32.start.end [1/1] (short) (narrow) %v2228_v7, 8 }
 0xa51   : > { %v2067_v14 = vpop.trf.xlu0 }
 0xa52   : > { %v6085_v15 = vpack.i.bf16 %v2229_v9, %v2067_v14 }
 0xa54   : > { %6086 = vxpose.xlu1.b32.start.end [1/1] (short) (narrow) %v6085_v15, 8 }
 0xa55   : > { %v2068_v16 = vpop.trf.xlu0 }
 0xa56   : > { %v6092_v17 = vpack.i.bf16 %v2230_v10, %v2068_v16 }
 0xa58   : > { %6093 = vxpose.xlu1.b32.start.end [1/1] (short) (narrow) %v6092_v17, 8 }
 0xa59   : > { %v2069_v18 = vpop.trf.xlu0 }
 0xa5c   : > { %2147 = vxpose.xlu1.b32.start.end [1/1] (short) (narrow) %v2069_v18, 8 }
 0xa5d   : > { %v2070_v8 = vpop.trf.xlu0 }
 0xa60   : > { %2179 = vxpose.xlu1.b32.start.end [1/1] (short) (narrow) %v2070_v8, 8 }
 0xa61   : > { %v2291_v19 = vpop.trf.xlu0 }
 0xa62   : > { %v2540_v20 = vpack.c.bf16 %v2291_v19, %v2291_v19 }
 0xa64   : > { %v2593_v24 = vsel %vm1245_vm3, %v2540_v20, 0 }
 0xa65   : > { %5977 = vmatpush3.bf16.xpose.msra.mxu1 %v2593_v24 }
 0xa66   : > { %5988 = vmatprep.subr.bf16.mxu1 %v6317_v2 }
 0xad4   : > { %v6087_v25 = vpop.trf.xlu1 }
 0xad5   : > { %v6091_v26 = vunpack.i.h.bf16 %v6087_v25  ;;  %v6088_v27 = vunpack.i.l.bf16 %v6087_v25 }
 0xad7   : > { %v2535_v28 = vpack.c.bf16 %v6088_v27, %v6088_v27  ;;  %v2541_v29 = vpack.c.bf16 %v6091_v26, %v6091_v26 }
 0xad8   : > { %v6094_v30 = vpop.trf.xlu1 }
 0xad9   : > { %v6098_v31 = vunpack.i.h.bf16 %v6094_v30  ;;  %v6095_v32 = vunpack.i.l.bf16 %v6094_v30  ;;  %5973 = vmatmul.mubr.msk.bf16.vlgmr.msra.gmra.mrb[24].mxu0 %vm1245_vm3, %v2535_v28  ;;  %v2639_v33 = vsel %vm1245_vm3, %v2541_v29, 0 }
 0xada   : > { %5984 = vmatprep.mubr.msk.bf16.mxu0 %vm6318_vm1, %v6317_v2  ;;  %5983 = vmatpush3.bf16.xpose.msra.mxu0 %v2639_v33 }
 0xadb   : > { %v2536_v34 = vpack.c.bf16 %v6095_v32, %v6095_v32  ;;  %v2542_v35 = vpack.c.bf16 %v6098_v31, %v6098_v31  ;;  %5994 = vmatprep.subr.bf16.mxu0 %v6317_v2 }
 0xadc   : > { %v2163_v36 = vpop.trf.xlu1 }
 0xadd   : > { %5979 = vmatmul.mubr.msk.bf16.vlgmr.msra.gmra.mrb[24].mxu1 %vm1245_vm3, %v2536_v34  ;;  %v2685_v37 = vsel %vm1245_vm3, %v2542_v35, 0  ;;  %v2537_v38 = vpack.c.bf16 %v2163_v36, %v2163_v36 }
 0xade   : > { %5989 = vmatpush3.bf16.xpose.msra.mxu1 %v2685_v37  ;;  %5990 = vmatprep.mubr.msk.bf16.mxu1 %vm6318_vm1, %v6317_v2 }
 0xadf   : > { %6000 = vmatprep.subr.bf16.mxu1 %v6317_v2 }
 0xae0   : > { %v2195_v39 = vpop.trf.xlu1 }
 0xae1   : > { %v2538_v40 = vpack.c.bf16 %v2195_v39, %v2195_v39  ;;  %5985 = vmatmul.mubr.msk.bf16.vlgmr.msra.gmra.mrb[28].mxu0 %vm1245_vm3, %v2537_v38 }
 0xae2   : > { %5996 = vmatprep.mubr.msk.bf16.mxu0 %vm6318_vm1, %v6317_v2 }
 0xae5   : > { %5991 = vmatmul.mubr.msk.bf16.vlgmr.msra.gmra.mrb[28].mxu1 %vm1245_vm3, %v2538_v40 }
 0xae6   : > { %6002 = vmatprep.mubr.msk.bf16.mxu1 %vm6318_vm1, %v6317_v2 }
 0xbac   : > { %v2583_v41 = vpop.f32.mrb[24].mxu0 }
 0xbad   : > { %v2727_v42 = vmul.f32 0.35355338, %v2583_v41  ;;  %v5974_v43 = vpop.f32.mrb[25].mxu0 }
 0xbae   : > { %v2586_v44 = vpop.f32.mrb[26].mxu0 }
 0xbaf   : > { %v5975_v45 = vpop.f32.mrb[27].mxu0  ;;  %v2731_v46 = vsel %vm1245_vm3, %v2727_v42, -inf }
 0xbb0   : > { %v2629_v49 = vpop.f32.mrb[24].mxu1  ;;  %2732 = vmax.xlane.f32.xlu0 %v2731_v46 }
 0xbb1   : > { %v2728_v50 = vmul.f32 0.35355338, %v2629_v49  ;;  %v5980_v51 = vpop.f32.mrb[25].mxu1 }
 0xbb2   : > { %v2632_v52 = vpop.f32.mrb[26].mxu1 }
 0xbb3   : > { %v5981_v53 = vpop.f32.mrb[27].mxu1  ;;  %v2734_v55 = vsel %vm1245_vm3, %v2728_v50, -inf }
 0xbb4   : > { %2735 = vmax.xlane.f32.xlu1 %v2734_v55  ;;  %v2675_v56 = vpop.f32.mrb[28].mxu0 }
 0xbb5   : > { %v2729_v57 = vmul.f32 0.35355338, %v2675_v56  ;;  %v5986_v59 = vpop.f32.mrb[29].mxu0 }
 0xbb6   : > { %v2678_v60 = vpop.f32.mrb[30].mxu0 }
 0xbb7   : > { %v5987_v61 = vpop.f32.mrb[31].mxu0  ;;  %v2737_v62 = vsel %vm1245_vm3, %v2729_v57, -inf }
 0xbb8   : > { %v2721_v0 = vpop.f32.mrb[28].mxu1  ;;  %2738 = vmax.xlane.f32.xlu1 %v2737_v62 }
 0xbb9   : > { %v2730_v1 = vmul.f32 0.35355338, %v2721_v0  ;;  %v5992_v3 = vpop.f32.mrb[29].mxu1 }
 0xbba   : > { %v2724_v4 = vpop.f32.mrb[30].mxu1 }
 0xbbb   : > { %v2740_v5 = vsel %vm1245_vm3, %v2730_v1, -inf  ;;  %v5993_v6 = vpop.f32.mrb[31].mxu1 }
 0xbbc   : > { %2741 = vmax.xlane.f32.xlu0 %v2740_v5 }
 0xbc9   : > { %2372 = vrot.lane.b32.xlu1 %v6633_v58, %s6319_s10 }
 0xc3d   : > { %v2733_v13 = vpop.xlane.xlu0 %2732 }
 0xc3e   : > { %v2743_v14 = vsub.f32 %v2727_v42, %v2733_v13 }
 0xc40   : > { %v2747_v15 = vmul.f32 1.442695, %v2743_v14 }
 0xc41   : > { %v2736_v7 = vpop.xlane.xlu1 %2735 }
 0xc42   : > { %v2744_v16 = vsub.f32 %v2728_v50, %v2736_v7  ;;  %6255 = vpow2.f32 %v2747_v15 }
 0xc44   : > { %v2749_v17 = vmul.f32 1.442695, %v2744_v16 }
 0xc45   : > { %v2739_v9 = vpop.xlane.xlu1 %2738 }
 0xc46   : > { %v2745_v18 = vsub.f32 %v2729_v57, %v2739_v9  ;;  %6257 = vpow2.f32 %v2749_v17 }
 0xc48   : > { %v2751_v19 = vmul.f32 1.442695, %v2745_v18 }
 0xc49   : > { %v2373_v10 = vpop.permute.xlu1 %2372  ;;  %v2742_v8 = vpop.xlane.xlu0 %2741 }
 0xc4a   : > { %2375 = vxpose.xlu1.b32.start.end [1/1] (short) (narrow) %v2373_v10, 32  ;;  %v2746_v20 = vsub.f32 %v2730_v1, %v2742_v8  ;;  %6259 = vpow2.f32 %v2751_v19  ;;  %v6107_v19 = vld [vmem:[%s6468_s25] sm:$0xff]  }
 0xc4c   : > { %v2753_v58 = vmul.f32 1.442695, %v2746_v20  ;;  %v6256_v24 = vpop.eup %6255 }
 0xc4d   : > { %v2755_v25 = vsel %vm1245_vm3, %v6256_v24, 0.0 }
 0xc4e   : > { %6261 = vpow2.f32 %v2753_v58  ;;  %v6108_v58 = vld [vmem:[%s6468_s25 + $0x8] sm:$0xff]  }
 0xc50   : > { %v6258_v26 = vpop.eup %6257 }
 0xc51   : > { %v2758_v27 = vsel %vm1245_vm3, %v6258_v26, 0.0 }
 0xc54   : > { %v6260_v28 = vpop.eup %6259 }
 0xc55   : > { %v2761_v29 = vsel %vm1245_vm3, %v6260_v28, 0.0 }
 0xc58   : > { %v6262_v30 = vpop.eup %6261 }
 0xc59   : > { %v2764_v31 = vsel %vm1245_vm3, %v6262_v30, 0.0 }
 0xcca   : > { %v2391_v11 = vpop.trf.xlu1 }
 0xccb   : > { %2407 = vxpose.xlu0.b32.start.end [1/1] (short) (narrow) %v2391_v11, 8 }
 0xcce   : > { %v2392_v12 = vpop.trf.xlu1 }
 0xccf   : > { %2439 = vxpose.xlu1.b32.start.end [1/1] (short) (narrow) %v2392_v12, 8 }
 0xcd2   : > { %v2393_v32 = vpop.trf.xlu1 }
 0xcd6   : > { %v2394_v33 = vpop.trf.xlu1 }
 0xcf8   : > { %2756 = vadd.xlane.f32.xlu0 %v2755_v25 }
 0xcfc   : > { %2759 = vadd.xlane.f32.xlu0 %v2758_v27 }
 0xd00   : > { %2762 = vadd.xlane.f32.xlu0 %v2761_v29 }
 0xd04   : > { %2765 = vadd.xlane.f32.xlu0 %v2764_v31 }
 0xd31   : > { %2471 = vxpose.xlu0.b32.start.end [1/1] (short) (narrow) %v2393_v32, 8 }
 0xd35   : > { %2503 = vxpose.xlu0.b32.start.end [1/1] (short) (narrow) %v2394_v33, 8 }
 0xd4b   : > { %v2423_v34 = vpop.trf.xlu0 }
 0xd4c   : > { %v2779_v35 = vpack.c.bf16 %v2423_v34, %v2423_v34 }
 0xd4e   : > { %v2787_v36 = vsel %vm1489_vm4, %v2779_v35, 0 }
 0xd4f   : > { %5995 = vmatpush3.bf16.msra.mxu0 %v2787_v36  ;;  %v2455_v37 = vpop.trf.xlu1 }
 0xd50   : > { %v2780_v38 = vpack.c.bf16 %v2455_v37, %v2455_v37  ;;  %6006 = vmatprep.subr.bf16.mxu0 %v6317_v2 }
 0xd52   : > { %v2833_v39 = vsel %vm1489_vm4, %v2780_v38, 0 }
 0xd53   : > { %6001 = vmatpush3.bf16.msra.mxu1 %v2833_v39 }
 0xd54   : > { %6012 = vmatprep.subr.bf16.mxu1 %v6317_v2 }
 0xd85   : > { %v2757_v40 = vpop.xlane.xlu0 %2756 }
 0xd86   : > { %6263 = vrcp.f32 %v2757_v40 }
 0xd89   : > { %v2760_v41 = vpop.xlane.xlu0 %2759 }
 0xd8a   : > { %6265 = vrcp.f32 %v2760_v41 }
 0xd8d   : > { %v2763_v50 = vpop.xlane.xlu0 %2762 }
 0xd8e   : > { %6267 = vrcp.f32 %v2763_v50 }
 0xd90   : > { %v6264_v42 = vpop.eup %6263 }
 0xd91   : > { %v2771_v43 = vmul.f32 %v6264_v42, %v6256_v24  ;;  %v2766_v51 = vpop.xlane.xlu0 %2765 }
 0xd92   : > { %6269 = vrcp.f32 %v2766_v51 }
 0xd93   : > { %v2775_v44 = vpack.c.bf16 %v2771_v43, %v2771_v43  ;;  %v3215_v43 = vld [vmem:[%s6479_s22] sm:$0xff] }
 0xd94   : > { %v6266_v45 = vpop.eup %6265 }
 0xd95   : > { %v2772_v46 = vmul.f32 %v6266_v45, %v6258_v26  ;;  %5997 = vmatmul.mubr.msk.bf16.vlgmr.msra.gmra.mrb[32].mxu0 %vm1245_vm3, %v2775_v44  ;;  %v3223_v44 = vld [vmem:[%s6479_s22 + $0x40] sm:$0xff]  ;;  %v3216_v45 = vld [vmem:[%s6479_s22 + $0x8] sm:$0xff] }
 0xd96   : > { %6008 = vmatprep.mubr.msk.bf16.mxu0 %vm6318_vm1, %v6317_v2 }
 0xd97   : > { %v2776_v49 = vpack.c.bf16 %v2772_v46, %v2772_v46  ;;  %v5490_v46 = vcombine.high %v3215_v43, %v3223_v44 }
 0xd98   : > { %v6268_v52 = vpop.eup %6267 }
 0xd99   : > { %6003 = vmatmul.mubr.msk.bf16.vlgmr.msra.gmra.mrb[32].mxu1 %vm1245_vm3, %v2776_v49  ;;  %v2773_v55 = vmul.f32 %v6268_v52, %v6260_v28  ;;  %v3224_v49 = vld [vmem:[%s6479_s22 + $0x48] sm:$0xff]  ;;  %v3231_v52 = vld [vmem:[%s6479_s22 + $0x80] sm:$0xff] }
 0xd9a   : > { %6014 = vmatprep.mubr.msk.bf16.mxu1 %vm6318_vm1, %v6317_v2  ;;  %v5491_v50 = vcombine.low %v3216_v45, %v3224_v49  ;;  %v5492_v51 = vcombine.high %v3216_v45, %v3224_v49  ;;  %v3229_v45 = vld [vmem:[%s6479_s22 + $0x70] sm:$0xff]  ;;  %v3230_v49 = vld [vmem:[%s6479_s22 + $0x78] sm:$0xff] }
 0xd9b   : > { %v2777_v0 = vpack.c.bf16 %v2773_v55, %v2773_v55  ;;  %v3232_v55 = vld [vmem:[%s6479_s22 + $0x88] sm:$0xff] }
 0xd9c   : > { %v6270_v57 = vpop.eup %6269 }
 0xd9d   : > { %v2774_v61 = vmul.f32 %v6270_v57, %v6262_v30  ;;  %v6693_v30 = vsub.s32 2, %v6582_v21  ;;  %v3240_v57 = vld [vmem:[%s6479_s22 + $0xc8] sm:$0xff] }
 0xd9f   : > { %v2778_v3 = vpack.c.bf16 %v2774_v61, %v2774_v61  ;;  %v5508_v61 = vcombine.high %v3232_v55, %v3240_v57 }
 0xdb1   : > { %v2487_v53 = vpop.trf.xlu0 }
 0xdb2   : > { %v2781_v56 = vpack.c.bf16 %v2487_v53, %v2487_v53  ;;  %v3239_v53 = vld [vmem:[%s6479_s22 + $0xc0] sm:$0xff] }
 0xdb4   : > { %v2879_v59 = vsel %vm1489_vm4, %v2781_v56, 0  ;;  %v5506_v56 = vcombine.high %v3231_v52, %v3239_v53 }
 0xdb5   : > { %6007 = vmatpush3.bf16.msra.mxu0 %v2879_v59  ;;  %v2519_v60 = vpop.trf.xlu0  ;;  %v5505_v59 = vcombine.low %v3231_v52, %v3239_v53  ;;  %v3237_v53 = vld [vmem:[%s6479_s22 + $0xb0] sm:$0xff] }
 0xdb6   : > { %v2782_v62 = vpack.c.bf16 %v2519_v60, %v2519_v60  ;;  %6018 = vmatprep.subr.bf16.mxu0 %v6317_v2  ;;  %v5507_v60 = vcombine.low %v3232_v55, %v3240_v57  ;;  %v3245_v55 = vld [vmem:[%s6479_s22 + $0xf0] sm:$0xff]  ;;  %v3246_v57 = vld [vmem:[%s6479_s22 + $0xf8] sm:$0xff] }
 0xdb8   : > { %v2925_v1 = vsel %vm1489_vm4, %v2782_v62, 0  ;;  %6009 = vmatmul.mubr.msk.bf16.vlgmr.msra.gmra.mrb[36].mxu0 %vm1245_vm3, %v2777_v0  ;;  %v3217_v62 = vld [vmem:[%s6479_s22 + $0x10] sm:$0xff] }
 0xdb9   : > { %6013 = vmatpush3.bf16.msra.mxu1 %v2925_v1  ;;  %6022 = vmatprep.mubr.msk.bf16.mxu0 %vm6318_vm1, %v6317_v2  ;;  %v3225_v0 = vld [vmem:[%s6479_s22 + $0x50] sm:$0xff]  ;;  %v3218_v1 = vld [vmem:[%s6479_s22 + $0x18] sm:$0xff] }
 0xdba   : > { %6019 = vmatpush3.bf16.msra.mxu0 %v6107_v19  ;;  %3495 = vmatprep.subr.bf16.mxu1 %v5490_v46  ;;  %v3233_v19 = vld [vmem:[%s6479_s22 + $0x90] sm:$0xff]  ;;  %v3222_v46 = vld [vmem:[%s6479_s22 + $0x38] sm:$0xff] }
 0xdbb   : > { %6020 = vmatprep.subr.bf16.mxu0 %v6317_v2  ;;  %v3135_v2 = vrot.slane %v6588_v23, %v6693_v30  ;;  %v5504_v52 = vcombine.high %v3222_v46, %v3230_v49 }
 0xdbc   : > { %6015 = vmatmul.mubr.msk.bf16.vlgmr.msra.gmra.mrb[36].mxu1 %vm1245_vm3, %v2778_v3  ;;  %v5494_v3 = vcombine.high %v3217_v62, %v3225_v0 }
 0xdbe   : > { %6021 = vmatpush3.bf16.msra.mxu0 %v6108_v58  ;;  %v3234_v58 = vld [vmem:[%s6479_s22 + $0x98] sm:$0xff] }
 0xdbf   : > { %3536 = vmatprep.subr.bf16.mxu0 %v5492_v51 }
 0xe68   : > { %v2823_v4 = vpop.f32.mrb[32].mxu0 }
 0xe69   : > { %2967 = vxpose.xlu1.b32.start.end [1/1] (short) (narrow) %v2823_v4, 8  ;;  %v5998_v5 = vpop.f32.mrb[33].mxu0  ;;  %v3226_v4 = vld [vmem:[%s6479_s22 + $0x58] sm:$0xff] }
 0xe6a   : > { %v2826_v6 = vpop.f32.mrb[34].mxu0  ;;  %v6321_v5 = vmov 0  }
 0xe6b   : > { %v5999_v7 = vpop.f32.mrb[35].mxu0  ;;  %3527 = vmatprep.mubr.bf16.mxu1 %v6321_v5  ;;  %v5493_v6 = vcombine.low %v3217_v62, %v3225_v0  ;;  %v5517_v0 = vcombine.low %v3237_v53, %v3245_v55 }
 0xe6c   : > { %v2869_v9 = vpop.f32.mrb[32].mxu1  ;;  %v5495_v7 = vcombine.low %v3218_v1, %v3226_v4 }
 0xe6d   : > { %2999 = vxpose.xlu0.b32.start.end [1/1] (short) (narrow) %v2869_v9, 8  ;;  %v6004_v10 = vpop.f32.mrb[33].mxu1  ;;  %v5496_v9 = vcombine.high %v3218_v1, %v3226_v4  ;;  %v6110_v4 = vld [vmem:[%s6485_s24 + $0xc0] sm:$0xff]  }
 0xe6e   : > { %v2872_v11 = vpop.f32.mrb[34].mxu1 }
 0xe6f   : > { %v6005_v12 = vpop.f32.mrb[35].mxu1 }
 0xe8b   : > { %v2915_v13 = vpop.f32.mrb[36].mxu0 }
 0xe8c   : > { %3031 = vxpose.xlu1.b32.start.end [1/1] (short) (narrow) %v2915_v13, 8  ;;  %v6010_v14 = vpop.f32.mrb[37].mxu0  ;;  %v6715_v13 = vsub.s32 6, %v6582_v21 }
 0xe8d   : > { %v2918_v15 = vpop.f32.mrb[38].mxu0  ;;  %v6718_v14 = vsub.s32 7, %v6582_v21 }
 0xe8e   : > { %v6011_v16 = vpop.f32.mrb[39].mxu0  ;;  %v3208_v15 = vrot.slane %v6588_v23, %v6715_v13 }
 0xe8f   : > { %v2961_v17 = vpop.f32.mrb[36].mxu1 }
 0xe90   : > { %3063 = vxpose.xlu0.b32.start.end [1/1] (short) (narrow) %v2961_v17, 8  ;;  %v6016_v18 = vpop.f32.mrb[37].mxu1  ;;  %v3213_v17 = vrot.slane %v6588_v23, %v6718_v14  ;;  %v3228_v23 = vld [vmem:[%s6479_s22 + $0x68] sm:$0xff] }
 0xe91   : > { %v2964_v8 = vpop.f32.mrb[38].mxu1 }
 0xe92   : > { %v6017_v20 = vpop.f32.mrb[39].mxu1 }
 0xe93   : > { %v3241_v20 = vld [vmem:[%s6479_s22 + $0xd0] sm:$0xff] }
 0xee9   : > { %v2983_v24 = vpop.trf.xlu1 }
 0xeea   : > { %3095 = vxpose.xlu1.b32.start [1/4] (short) (narrow) %v2983_v24, 8  ;;  %v3242_v24 = vld [vmem:[%s6479_s22 + $0xd8] sm:$0xff] }
 0xeed   : > { %v3015_v25 = vpop.trf.xlu0 }
 0xeee   : > { %3096 = vxpose.xlu1.b32.cont [2/4] (short) (narrow) %v3015_v25, 8 }
 0xf0c   : > { %v3047_v26 = vpop.trf.xlu1 }
 0xf0d   : > { %3097 = vxpose.xlu1.b32.cont [3/4] (short) (narrow) %v3047_v26, 8 }
 0xf10   : > { %v3079_v27 = vpop.trf.xlu0 }
 0xf11   : > { %3098 = vxpose.xlu1.b32.end [4/4] (short) (narrow) %v3079_v27, 8  ;;  %v5510_v27 = vcombine.high %v3233_v19, %v3241_v20 }
 0xf85   : > { %v3111_v28 = vpop.trf.xlu1 }
 0xf86   : > { %v3131_v29 = vpack.c.bf16 %v3111_v28, %v3111_v28  ;;  %v5512_v28 = vcombine.high %v3234_v58, %v3242_v24 }
 0xf88   : > { %6023 = vmatmul.mubr.msk.bf16.vlgmr.msra.gmra.mrb[40].mxu0 %vm706_vm2, %v3131_v29  ;;  %v3219_v29 = vld [vmem:[%s6479_s22 + $0x20] sm:$0xff] }
 0xf89   : > { %3537 = vmatpush1.bf16.msra.mxu0 %v5491_v50  ;;  %3568 = vmatprep.mubr.bf16.mxu0 %v6321_v5 }
 0xf8a   : > { %3538 = vmatprep.subr.bf16.mxu0 %v5508_v61  ;;  %v5518_v61 = vcombine.high %v3237_v53, %v3245_v55 }
 0xf8d   : > { %3539 = vmatpush1.bf16.msra.mxu0 %v5507_v60  ;;  %v5503_v60 = vcombine.low %v3222_v46, %v3230_v49 }
 0xf8e   : > { %3618 = vmatprep.subr.bf16.mxu0 %v5496_v9  ;;  %v6113_v9 = vld [vmem:[%s6485_s24 + $0x48] sm:$0xff]  }
0x105b   : > { %v3185_v31 = vpop.f32.mrb[40].mxu0 }
0x105c   : > { %v3186_v32 = vadd.f32 %v3185_v31, %v3135_v2  ;;  %v6024_v33 = vpop.f32.mrb[41].mxu0  ;;  %v3227_v2 = vld [vmem:[%s6479_s22 + $0x60] sm:$0xff]  ;;  %v3220_v31 = vld [vmem:[%s6479_s22 + $0x28] sm:$0xff] }
0x105d   : > { %v3188_v34 = vpop.f32.mrb[42].mxu0  ;;  %v5511_v33 = vcombine.low %v3234_v58, %v3242_v24  ;;  %v6125_v58 = vld [vmem:[%s6485_s24 + $0x60] sm:$0xff]  }
0x105e   : > { %v6025_v35 = vpop.f32.mrb[43].mxu0  ;;  %v3191_v36 = vadd.f32 %v3186_v32, %v6621_v54  ;;  %v5489_v54 = vcombine.low %v3215_v43, %v3223_v44  ;;  %v5509_v32 = vcombine.low %v3233_v19, %v3241_v20  ;;  %v5498_v34 = vcombine.high %v3219_v29, %v3227_v2  ;;  %v3221_v44 = vld [vmem:[%s6479_s22 + $0x30] sm:$0xff]  ;;  %v6123_v19 = vld [vmem:[%s6485_s24 + $0x18] sm:$0xff]   ;;  %v6126_v24 = vld [vmem:[%s6485_s24 + $0xe0] sm:$0xff]  }
0x105f   : > { %v5500_v35 = vcombine.high %v3220_v31, %v3228_v23  ;;  %v5502_v51 = vcombine.high %v3221_v44, %v3229_v45  ;;  %v6124_v20 = vld [vmem:[%s6485_s24 + $0x98] sm:$0xff]  }
0x1060   : > { %v3192_v37 = vsel %vm706_vm2, %v3191_v36, 0.0  ;;  %3496 = vmatpush1.bf16.msra.mxu1 %v5489_v54 }
0x1061   : > { %3193 = vadd.xlane.f32.xlu0 %v3192_v37  ;;  %3497 = vmatprep.subr.bf16.mxu1 %v5506_v56  ;;  %v3243_v37 = vld [vmem:[%s6479_s22 + $0xe0] sm:$0xff]  ;;  %v3238_v56 = vld [vmem:[%s6479_s22 + $0xb8] sm:$0xff] }
0x1062   : > { %v5520_v62 = vcombine.high %v3238_v56, %v3246_v57  ;;  %v5519_v1 = vcombine.low %v3238_v56, %v3246_v57 }
0x1064   : > { %3498 = vmatpush1.bf16.msra.mxu1 %v5505_v59  ;;  %v5501_v59 = vcombine.low %v3221_v44, %v3229_v45 }
0x1065   : > { %3577 = vmatprep.subr.bf16.mxu1 %v5494_v3  ;;  %v6109_v3 = vld [vmem:[%s6485_s24 + $0x40] sm:$0xff]  }
0x10ee   : > { %v3194_v38 = vpop.xlane.xlu0 %3193 }
0x10ef   : > { %v3195_v39 = vmul.f32 0.03125, %v3194_v38  ;;  %v3236_v38 = vld [vmem:[%s6479_s22 + $0xa8] sm:$0xff] }
0x10f1   : > { %v3196_v40 = vsub.f32 %v3191_v36, %v3195_v39  ;;  %v3235_v36 = vld [vmem:[%s6479_s22 + $0xa0] sm:$0xff]  ;;  %v3244_v39 = vld [vmem:[%s6479_s22 + $0xe8] sm:$0xff] }
0x10f2   : > { %v5516_v43 = vcombine.high %v3236_v38, %v3244_v39  ;;  %v5513_v54 = vcombine.low %v3235_v36, %v3243_v37  ;;  %v5515_v50 = vcombine.low %v3236_v38, %v3244_v39  ;;  %v6140_v38 = vld [vmem:[%s6485_s24 + $0xb8] sm:$0xff]   ;;  %v6141_v39 = vld [vmem:[%s6485_s24 + $0x140] sm:$0xff]  }
0x10f3   : > { %v3197_v41 = vmul.f32 %v3196_v40, %v3196_v40 }
0x10f5   : > { %v3198_v42 = vsel %vm706_vm2, %v3197_v41, 0.0  ;;  %v5499_v41 = vcombine.low %v3220_v31, %v3228_v23  ;;  %v6132_v31 = vld [vmem:[%s6485_s24 + $0xa8] sm:$0xff]   ;;  %v6133_v23 = vld [vmem:[%s6485_s24 + $0x70] sm:$0xff]  }
0x10f6   : > { %3199 = vadd.xlane.f32.xlu1 %v3198_v42  ;;  %v5514_v42 = vcombine.high %v3235_v36, %v3243_v37  ;;  %v6138_v36 = vld [vmem:[%s6485_s24 + $0xf8] sm:$0xff]  }
0x10f7   : > { %v6139_v37 = vld [vmem:[%s6485_s24 + $0x38] sm:$0xff]  }
0x1183   : > { %v3200_v10 = vpop.xlane.xlu1 %3199 }
0x1184   : > { %v3201_v11 = vmul.f32 0.03125, %v3200_v10  ;;  %v6114_v10 = vld [vmem:[%s6485_s24 + $0xc8] sm:$0xff]  }
0x1186   : > { %v3202_v12 = vadd.f32 1e-05, %v3201_v11  ;;  %v6116_v11 = vld [vmem:[%s6485_s24 + $0x88] sm:$0xff]  }
0x1188   : > { %6271 = vrsqrt.f32 %v3202_v12  ;;  %v6117_v12 = vld [vmem:[%s6485_s24 + $0x50] sm:$0xff]  }
0x1192   : > { %v6272_v16 = vpop.eup %6271 }
0x1193   : > { %v3204_v18 = vmul.f32 %v6272_v16, %v3196_v40  ;;  %v5497_v40 = vcombine.low %v3219_v29, %v3227_v2  ;;  %v6119_v16 = vld [vmem:[%s6485_s24 + $0x10] sm:$0xff]   ;;  %v6130_v29 = vld [vmem:[%s6485_s24 + $0xe8] sm:$0xff]  }
0x1194   : > { %v6131_v2 = vld [vmem:[%s6485_s24 + $0x28] sm:$0xff]  }
0x1195   : > { %v3209_v8 = vmul.f32 %v3208_v15, %v3204_v18  ;;  %v6118_v15 = vld [vmem:[%s6485_s24 + $0xd0] sm:$0xff]   ;;  %v6121_v18 = vld [vmem:[%s6485_s24 + $0x58] sm:$0xff]  }
0x1197   : > { %v6728_v25 = vadd.f32 %v3213_v17, %v3209_v8  ;;  %v6120_v17 = vld [vmem:[%s6485_s24 + $0x90] sm:$0xff]   ;;  %v6122_v8 = vld [vmem:[%s6485_s24 + $0xd8] sm:$0xff]  }
0x1199   : > { %v6732_v26 = vpack.c.bf16 %v6728_v25, %v6728_v25 }
0x119b   : > { %5521 = vmatmul.mubr.msk.bf16.vlgmr.msra.gmra.mrb[40].mxu1 %vm706_vm2, %v6732_v26  ;;  %5522 = vmatmul.mubr.msk.bf16.vlgmr.msra.gmra.mrb[44].mxu0 %vm706_vm2, %v6732_v26 }
0x119c   : > { %3578 = vmatpush1.bf16.msra.mxu1 %v5493_v6  ;;  %3619 = vmatpush1.bf16.msra.mxu0 %v5495_v7  ;;  %v6111_v6 = vld [vmem:[%s6485_s24] sm:$0xff]  }
0x119d   : > { %3579 = vmatprep.subr.bf16.mxu1 %v5510_v27  ;;  %3620 = vmatprep.subr.bf16.mxu0 %v5512_v28  ;;  %v6112_v7 = vld [vmem:[%s6485_s24 + $0x80] sm:$0xff]   ;;  %v6129_v28 = vld [vmem:[%s6485_s24 + $0x68] sm:$0xff]  }
0x119e   : > { %3609 = vmatprep.mubr.bf16.mxu1 %v6321_v5  ;;  %3650 = vmatprep.mubr.bf16.mxu0 %v6321_v5  ;;  %v6128_v27 = vld [vmem:[%s6485_s24 + $0xa0] sm:$0xff]  }
0x11a0   : > { %3580 = vmatpush1.bf16.msra.mxu1 %v5509_v32  ;;  %3621 = vmatpush1.bf16.msra.mxu0 %v5511_v33  ;;  %v6134_v32 = vld [vmem:[%s6485_s24 + $0xf0] sm:$0xff]  }
0x11a1   : > { %3659 = vmatprep.subr.bf16.mxu1 %v5498_v34  ;;  %3700 = vmatprep.subr.bf16.mxu0 %v5500_v35  ;;  %v6135_v33 = vld [vmem:[%s6485_s24 + $0x30] sm:$0xff]   ;;  %v6137_v35 = vld [vmem:[%s6485_s24 + $0x78] sm:$0xff]  }
0x11a2   : > { %v6136_v34 = vld [vmem:[%s6485_s24 + $0xb0] sm:$0xff]  }
0x11a3   : > { %5523 = vmatmul.mubr.msk.bf16.vlgmr.msra.gmra.mrb[44].mxu1 %vm706_vm2, %v6732_v26  ;;  %5524 = vmatmul.mubr.msk.bf16.vlgmr.msra.gmra.mrb[48].mxu0 %vm706_vm2, %v6732_v26 }
0x11a4   : > { %3660 = vmatpush1.bf16.msra.mxu1 %v5497_v40  ;;  %3701 = vmatpush1.bf16.msra.mxu0 %v5499_v41  ;;  %v6142_v40 = vld [vmem:[%s6485_s24 + $0x1c0] sm:$0xff]  }
0x11a5   : > { %3661 = vmatprep.subr.bf16.mxu1 %v5514_v42  ;;  %3702 = vmatprep.subr.bf16.mxu0 %v5516_v43  ;;  %v6807_v41 = vld [vmem:[%s6474_s0] sm:$0xff]  ;;  %v6810_v42 = vsub.s32 3, %v6582_v21 }
0x11a6   : > { %3691 = vmatprep.mubr.bf16.mxu1 %v6321_v5  ;;  %3732 = vmatprep.mubr.bf16.mxu0 %v6321_v5  ;;  %v3255_v43 = vrot.slane %v6807_v41, %v6585_v22  ;;  %v3263_v44 = vrot.slane %v6807_v41, %v6693_v30  ;;  %v3259_v45 = vrot.slane %v6807_v41, %v6637_v63 }
0x11a7   : > { %v3267_v46 = vrot.slane %v6807_v41, %v6810_v42 }
0x11a8   : > { %3662 = vmatpush1.bf16.msra.mxu1 %v5513_v54  ;;  %3703 = vmatpush1.bf16.msra.mxu0 %v5515_v50 }
0x11a9   : > { %3741 = vmatprep.subr.bf16.mxu1 %v5502_v51  ;;  %3782 = vmatprep.subr.bf16.mxu0 %v5504_v52 }
0x11ab   : > { %5525 = vmatmul.mubr.msk.bf16.vlgmr.msra.gmra.mrb[48].mxu1 %vm706_vm2, %v6732_v26  ;;  %5526 = vmatmul.mubr.msk.bf16.vlgmr.msra.gmra.mrb[52].mxu0 %vm706_vm2, %v6732_v26 }
0x11ac   : > { %3742 = vmatpush1.bf16.msra.mxu1 %v5501_v59  ;;  %3783 = vmatpush1.bf16.msra.mxu0 %v5503_v60 }
0x11ad   : > { %3743 = vmatprep.subr.bf16.mxu1 %v5518_v61  ;;  %3784 = vmatprep.subr.bf16.mxu0 %v5520_v62 }
0x11ae   : > { %3773 = vmatprep.mubr.bf16.mxu1 %v6321_v5  ;;  %3814 = vmatprep.mubr.bf16.mxu0 %v6321_v5  ;;  %v6115_v5 = vld [vmem:[%s6485_s24 + $0x8] sm:$0xff]  }
0x11b0   : > { %3744 = vmatpush1.bf16.msra.mxu1 %v5517_v0  ;;  %3785 = vmatpush1.bf16.msra.mxu0 %v5519_v1 }
0x11b1   : > { %5714 = vmatprep.subr.bf16.mxu1 %v6109_v3  ;;  %5736 = vmatprep.subr.bf16.mxu0 %v6110_v4 }
0x11b3   : > { %5527 = vmatmul.mubr.msk.bf16.vlgmr.msra.gmra.mrb[52].mxu1 %vm706_vm2, %v6732_v26  ;;  %5528 = vmatmul.mubr.msk.bf16.vlgmr.msra.gmra.mrb[56].mxu0 %vm706_vm2, %v6732_v26  ;;  %v6127_v26 = vld [vmem:[%s6485_s24 + $0x20] sm:$0xff]  }
0x11b4   : > { %5715 = vmatpush3.bf16.msra.mxu1 %v6111_v6  ;;  %5737 = vmatpush3.bf16.msra.mxu0 %v6112_v7  ;;  %v3275_v6 = vrot.slane %v6807_v41, %v6615_v48  ;;  %v3283_v7 = vrot.slane %v6807_v41, %v6718_v14 }
0x11b5   : > { %5716 = vmatprep.subr.bf16.mxu1 %v6113_v9  ;;  %5738 = vmatprep.subr.bf16.mxu0 %v6114_v10  ;;  %v6143_v9 = vld [vmem:[%s6485_s24 + $0x100] sm:$0xff]  }
0x11b6   : > { %v6144_v10 = vld [vmem:[%s6485_s24 + $0x180] sm:$0xff]  }
0x11b8   : > { %5717 = vmatpush3.bf16.msra.mxu1 %v6115_v5  ;;  %5739 = vmatpush3.bf16.msra.mxu0 %v6116_v11 }
0x11b9   : > { %5718 = vmatprep.subr.bf16.mxu1 %v6117_v12  ;;  %5740 = vmatprep.subr.bf16.mxu0 %v6118_v15  ;;  %v6145_v12 = vld [vmem:[%s6485_s24 + $0x148] sm:$0xff]  }
0x11ba   : > { %v6146_v15 = vld [vmem:[%s6485_s24 + $0x1c8] sm:$0xff]  }
0x11bc   : > { %5719 = vmatpush3.bf16.msra.mxu1 %v6119_v16  ;;  %5741 = vmatpush3.bf16.msra.mxu0 %v6120_v17 }
0x11bd   : > { %5720 = vmatprep.subr.bf16.mxu1 %v6121_v18  ;;  %5742 = vmatprep.subr.bf16.mxu0 %v6122_v8 }
0x11c0   : > { %5721 = vmatpush3.bf16.msra.mxu1 %v6123_v19  ;;  %5743 = vmatpush3.bf16.msra.mxu0 %v6124_v20 }
0x11c1   : > { %5722 = vmatprep.subr.bf16.mxu1 %v6125_v58  ;;  %5744 = vmatprep.subr.bf16.mxu0 %v6126_v24 }
0x11c4   : > { %5723 = vmatpush3.bf16.msra.mxu1 %v6127_v26  ;;  %5745 = vmatpush3.bf16.msra.mxu0 %v6128_v27  ;;  %v6147_v26 = vld [vmem:[%s6485_s24 + $0x108] sm:$0xff]  }
0x11c5   : > { %5724 = vmatprep.subr.bf16.mxu1 %v6129_v28  ;;  %5746 = vmatprep.subr.bf16.mxu0 %v6130_v29  ;;  %v6148_v27 = vld [vmem:[%s6485_s24 + $0x188] sm:$0xff]  }
0x11c8   : > { %5725 = vmatpush3.bf16.msra.mxu1 %v6131_v2  ;;  %5747 = vmatpush3.bf16.msra.mxu0 %v6132_v31  ;;  %v6149_v2 = vld [vmem:[%s6485_s24 + $0x150] sm:$0xff]  }
0x11c9   : > { %5726 = vmatprep.subr.bf16.mxu1 %v6133_v23  ;;  %5748 = vmatprep.subr.bf16.mxu0 %v6134_v32  ;;  %v6150_v31 = vld [vmem:[%s6485_s24 + $0x1d0] sm:$0xff]  }
0x11cc   : > { %5727 = vmatpush3.bf16.msra.mxu1 %v6135_v33  ;;  %5749 = vmatpush3.bf16.msra.mxu0 %v6136_v34 }
0x11cd   : > { %5728 = vmatprep.subr.bf16.mxu1 %v6137_v35  ;;  %5750 = vmatprep.subr.bf16.mxu0 %v6138_v36  ;;  %v6151_v35 = vld [vmem:[%s6485_s24 + $0x110] sm:$0xff]  }
0x11ce   : > { %v6152_v36 = vld [vmem:[%s6485_s24 + $0x190] sm:$0xff]  }
0x11d0   : > { %5729 = vmatpush3.bf16.msra.mxu1 %v6139_v37  ;;  %5751 = vmatpush3.bf16.msra.mxu0 %v6140_v38  ;;  %v6153_v37 = vld [vmem:[%s6485_s24 + $0x158] sm:$0xff]  }
0x11d1   : > { %5758 = vmatprep.subr.bf16.mxu1 %v6141_v39  ;;  %5780 = vmatprep.subr.bf16.mxu0 %v6142_v40  ;;  %v6154_v38 = vld [vmem:[%s6485_s24 + $0x1d8] sm:$0xff]  }
0x126e   : > { %v3529_v49 = vpop.f32.mrb[40].mxu1  ;;  %v3570_v54 = vpop.f32.mrb[44].mxu0 }
0x126f   : > { %v3530_v50 = vadd.f32 %v3529_v49, %v3255_v43  ;;  %v3571_v51 = vadd.f32 %v3570_v54, %v3263_v44  ;;  %v3531_v52 = vpop.f32.mrb[41].mxu1  ;;  %v3572_v21 = vpop.f32.mrb[45].mxu0  ;;  %v6155_v49 = vld [vmem:[%s6485_s24 + $0x118] sm:$0xff]  }
0x1270   : > { %v3532_v53 = vadd.f32 %v3531_v52, %v3259_v45  ;;  %v3573_v55 = vadd.f32 %v3572_v21, %v3267_v46  ;;  %v3533_v56 = vpop.f32.mrb[42].mxu1  ;;  %v3574_v57 = vpop.f32.mrb[46].mxu0  ;;  %v6156_v54 = vld [vmem:[%s6485_s24 + $0x198] sm:$0xff]   ;;  %v6157_v52 = vld [vmem:[%s6485_s24 + $0x160] sm:$0xff]  }
0x1271   : > { %v3823_v59 = vmax.f32 %v3530_v50, 0.0  ;;  %v3825_v60 = vmax.f32 %v3571_v51, 0.0  ;;  %v3534_v61 = vpop.f32.mrb[43].mxu1  ;;  %v3575_v62 = vpop.f32.mrb[47].mxu0  ;;  %v6158_v21 = vld [vmem:[%s6485_s24 + $0x1e0] sm:$0xff]  }
0x1272   : > { %v3824_v0 = vmax.f32 %v3532_v53, 0.0  ;;  %v3826_v1 = vmax.f32 %v3573_v55, 0.0  ;;  %v6849_v53 = vld [vmem:[%s6474_s0 + $0x8] sm:$0xff]  ;;  %v6159_v56 = vld [vmem:[%s6485_s24 + $0x120] sm:$0xff]  }
0x1273   : > { %v3839_v5 = vpack.c.bf16 %v3823_v59, %v3823_v59  ;;  %v3841_v11 = vpack.c.bf16 %v3825_v60, %v3825_v60  ;;  %v3311_v55 = vrot.slane %v6849_v53, %v6715_v13  ;;  %v6160_v57 = vld [vmem:[%s6485_s24 + $0x1a0] sm:$0xff]   ;;  %v6161_v59 = vld [vmem:[%s6485_s24 + $0x168] sm:$0xff]  }
0x1274   : > { %v3840_v3 = vpack.c.bf16 %v3824_v0, %v3824_v0  ;;  %v3842_v4 = vpack.c.bf16 %v3826_v1, %v3826_v1  ;;  %v6162_v60 = vld [vmem:[%s6485_s24 + $0x1e8] sm:$0xff]  }
0x1276   : > { %v6828_v16 = vpop.f32.mrb[44].mxu1  ;;  %v6830_v17 = vpop.f32.mrb[48].mxu0  ;;  %4915 = vmatprep.mubr.bf16.mxu1 %v3840_v3  ;;  %4955 = vmatprep.mubr.bf16.mxu0 %v3842_v4 }
0x1277   : > { %v3613_v18 = vpop.f32.mrb[45].mxu1  ;;  %v3654_v8 = vpop.f32.mrb[49].mxu0  ;;  %4916 = vmatmul.mubr.bf16.vlgmr.msra.gmra.mrb[56].mxu1 %v3839_v5  ;;  %4956 = vmatmul.mubr.bf16.vlgmr.msra.gmra.mrb[60].mxu0 %v3841_v11  ;;  %v3279_v5 = vrot.slane %v6807_v41, %v6715_v13  ;;  %v6168_v13 = vld [vmem:[%s6485_s24 + $0x1b0] sm:$0xff]  }
0x1278   : > { %v3614_v19 = vadd.f32 %v3613_v18, %v3275_v6  ;;  %v3655_v20 = vadd.f32 %v3654_v8, %v3283_v7  ;;  %5759 = vmatpush3.bf16.msra.mxu1 %v6143_v9  ;;  %5781 = vmatpush3.bf16.msra.mxu0 %v6144_v10  ;;  %v3615_v58 = vpop.f32.mrb[46].mxu1  ;;  %v3656_v24 = vpop.f32.mrb[50].mxu0  ;;  %v6163_v7 = vld [vmem:[%s6485_s24 + $0x128] sm:$0xff]   ;;  %v3271_v10 = vrot.slane %v6807_v41, %v6612_v47  ;;  %v6166_v18 = vld [vmem:[%s6485_s24 + $0x1f0] sm:$0xff]  }
0x1279   : > { %v3616_v28 = vpop.f32.mrb[47].mxu1  ;;  %v3657_v29 = vpop.f32.mrb[51].mxu0  ;;  %5760 = vmatprep.subr.bf16.mxu1 %v6145_v12  ;;  %5782 = vmatprep.subr.bf16.mxu0 %v6146_v15  ;;  %v6164_v9 = vld [vmem:[%s6485_s24 + $0x1a8] sm:$0xff]   ;;  %v6165_v15 = vld [vmem:[%s6485_s24 + $0x170] sm:$0xff]   ;;  %v3291_v8 = vrot.slane %v6849_v53, %v6637_v63  ;;  %v3653_v58 = vadd.f32 %v6830_v17, %v3279_v5  ;;  %v6169_v24 = vld [vmem:[%s6485_s24 + $0x178] sm:$0xff]  }
0x127a   : > { %v3828_v23 = vmax.f32 %v3614_v19, 0.0  ;;  %v3830_v32 = vmax.f32 %v3655_v20, 0.0  ;;  %v3299_v19 = vrot.slane %v6849_v53, %v6810_v42  ;;  %v6167_v20 = vld [vmem:[%s6485_s24 + $0x130] sm:$0xff]   ;;  %v3612_v41 = vadd.f32 %v6828_v16, %v3271_v10  ;;  %v6171_v29 = vld [vmem:[%s6485_s24 + $0x138] sm:$0xff]   ;;  %v6173_v16 = vld [vmem:[%s6485_s24 + $0x240] sm:$0xff]  }
0x127b   : > { %v6174_v17 = vld [vmem:[%s6485_s24 + $0x2c0] sm:$0xff]   ;;  %v3287_v10 = vrot.slane %v6849_v53, %v6585_v22  ;;  %v6196_v5 = vld [vmem:[%s6485_s24 + $0x2a8] sm:$0xff]  }
0x127c   : > { %v3844_v33 = vpack.c.bf16 %v3828_v23, %v3828_v23  ;;  %v3846_v34 = vpack.c.bf16 %v3830_v32, %v3830_v32  ;;  %5761 = vmatpush3.bf16.msra.mxu1 %v6147_v26  ;;  %5783 = vmatpush3.bf16.msra.mxu0 %v6148_v27  ;;  %v6170_v26 = vld [vmem:[%s6485_s24 + $0x1f8] sm:$0xff]   ;;  %v3829_v23 = vmax.f32 %v3653_v58, 0.0 }
0x127d   : > { %5762 = vmatprep.subr.bf16.mxu1 %v6149_v2  ;;  %5784 = vmatprep.subr.bf16.mxu0 %v6150_v31  ;;  %v6172_v2 = vld [vmem:[%s6485_s24 + $0x1b8] sm:$0xff]   ;;  %v3827_v31 = vmax.f32 %v3612_v41, 0.0 }
0x127e   : > { %v6840_v39 = vpop.f32.mrb[48].mxu1  ;;  %v6842_v40 = vpop.f32.mrb[52].mxu0  ;;  %4995 = vmatprep.mubr.bf16.mxu1 %v3844_v33  ;;  %5035 = vmatprep.mubr.bf16.mxu0 %v3846_v34  ;;  %v6175_v34 = vld [vmem:[%s6485_s24 + $0x200] sm:$0xff]   ;;  %v6202_v58 = vld [vmem:[%s6485_s24 + $0x2f8] sm:$0xff]  }
0x127f   : > { %v3695_v43 = vpop.f32.mrb[49].mxu1  ;;  %v3736_v44 = vpop.f32.mrb[53].mxu0 }
0x1280   : > { %5763 = vmatpush3.bf16.msra.mxu1 %v6151_v35  ;;  %5785 = vmatpush3.bf16.msra.mxu0 %v6152_v36  ;;  %v3697_v45 = vpop.f32.mrb[50].mxu1  ;;  %v3738_v46 = vpop.f32.mrb[54].mxu0  ;;  %v3696_v27 = vadd.f32 %v3695_v43, %v3291_v8  ;;  %v3737_v28 = vadd.f32 %v3736_v44, %v3299_v19  ;;  %v3843_v35 = vpack.c.bf16 %v3827_v31, %v3827_v31  ;;  %v6177_v43 = vld [vmem:[%s6485_s24 + $0x248] sm:$0xff]   ;;  %v6199_v19 = vld [vmem:[%s6485_s24 + $0x230] sm:$0xff]  }
0x1281   : > { %v3698_v50 = vpop.f32.mrb[51].mxu1  ;;  %v3739_v51 = vpop.f32.mrb[55].mxu0  ;;  %5764 = vmatprep.subr.bf16.mxu1 %v6153_v37  ;;  %5786 = vmatprep.subr.bf16.mxu0 %v6154_v38  ;;  %v3845_v36 = vpack.c.bf16 %v3829_v23, %v3829_v23  ;;  %v6176_v37 = vld [vmem:[%s6485_s24 + $0x280] sm:$0xff]   ;;  %v6178_v44 = vld [vmem:[%s6485_s24 + $0x2c8] sm:$0xff]   ;;  %v3315_v8 = vrot.slane %v6849_v53, %v6718_v14 }
0x1282   : > { %v3832_v32 = vmax.f32 %v3696_v27, 0.0  ;;  %v3834_v33 = vmax.f32 %v3737_v28, 0.0  ;;  %v6179_v46 = vld [vmem:[%s6485_s24 + $0x208] sm:$0xff]   ;;  %v6182_v50 = vld [vmem:[%s6485_s24 + $0x2d0] sm:$0xff]   ;;  %v6205_v27 = vld [vmem:[%s6485_s24 + $0x340] sm:$0xff]  }
0x1283   : > { %v6183_v51 = vld [vmem:[%s6485_s24 + $0x210] sm:$0xff]  }
0x1284   : > { %5765 = vmatpush3.bf16.msra.mxu1 %v6155_v49  ;;  %5787 = vmatpush3.bf16.msra.mxu0 %v6156_v54  ;;  %v3848_v38 = vpack.c.bf16 %v3832_v32, %v3832_v32  ;;  %v3850_v45 = vpack.c.bf16 %v3834_v33, %v3834_v33  ;;  %v6180_v49 = vld [vmem:[%s6485_s24 + $0x288] sm:$0xff]   ;;  %v6181_v54 = vld [vmem:[%s6485_s24 + $0x250] sm:$0xff]  }
0x1285   : > { %5766 = vmatprep.subr.bf16.mxu1 %v6157_v52  ;;  %5788 = vmatprep.subr.bf16.mxu0 %v6158_v21  ;;  %v6184_v52 = vld [vmem:[%s6485_s24 + $0x290] sm:$0xff]   ;;  %v6185_v21 = vld [vmem:[%s6485_s24 + $0x258] sm:$0xff]   ;;  %v6210_v32 = vld [vmem:[%s6485_s24 + $0x3c8] sm:$0xff]  }
0x1286   : > { %v6857_v61 = vpop.f32.mrb[52].mxu1  ;;  %v3816_v62 = vpop.f32.mrb[56].mxu0 }
0x1287   : > { %v6859_v0 = vadd.f32 %v3816_v62, %v3311_v55  ;;  %v6861_v1 = vpop.f32.mrb[53].mxu1  ;;  %v6863_v3 = vpop.f32.mrb[57].mxu0  ;;  %v6186_v55 = vld [vmem:[%s6485_s24 + $0x2d8] sm:$0xff]   ;;  %v6191_v62 = vld [vmem:[%s6485_s24 + $0x220] sm:$0xff]  }
0x1288   : > { %5767 = vmatpush3.bf16.msra.mxu1 %v6159_v56  ;;  %5789 = vmatpush3.bf16.msra.mxu0 %v6160_v57  ;;  %v3779_v4 = vpop.f32.mrb[54].mxu1  ;;  %v3820_v6 = vpop.f32.mrb[58].mxu0  ;;  %v6187_v56 = vld [vmem:[%s6485_s24 + $0x218] sm:$0xff]   ;;  %v3819_v14 = vadd.f32 %v6863_v3, %v3315_v8  ;;  %v6208_v3 = vld [vmem:[%s6485_s24 + $0x380] sm:$0xff]  }
0x1289   : > { %v3780_v11 = vpop.f32.mrb[55].mxu1  ;;  %v3821_v12 = vpop.f32.mrb[59].mxu0  ;;  %5768 = vmatprep.subr.bf16.mxu1 %v6161_v59  ;;  %5790 = vmatprep.subr.bf16.mxu0 %v6162_v60  ;;  %v6188_v57 = vld [vmem:[%s6485_s24 + $0x298] sm:$0xff]   ;;  %v6189_v59 = vld [vmem:[%s6485_s24 + $0x260] sm:$0xff]   ;;  %v6193_v6 = vld [vmem:[%s6485_s24 + $0x268] sm:$0xff]  }
0x128a   : > { %v6190_v60 = vld [vmem:[%s6485_s24 + $0x2e0] sm:$0xff]   ;;  %v6197_v11 = vld [vmem:[%s6485_s24 + $0x270] sm:$0xff]   ;;  %v3295_v12 = vrot.slane %v6849_v53, %v6693_v30  ;;  %v6201_v30 = vld [vmem:[%s6485_s24 + $0x278] sm:$0xff]  }
0x128b   : > { %v6192_v4 = vld [vmem:[%s6485_s24 + $0x2a0] sm:$0xff]  }
0x128c   : > { %5769 = vmatpush3.bf16.msra.mxu1 %v6163_v7  ;;  %5791 = vmatpush3.bf16.msra.mxu0 %v6164_v9  ;;  %v6194_v7 = vld [vmem:[%s6485_s24 + $0x2e8] sm:$0xff]   ;;  %v3735_v41 = vadd.f32 %v6842_v40, %v3295_v12  ;;  %v6206_v40 = vld [vmem:[%s6485_s24 + $0x3c0] sm:$0xff]  }
0x128d   : > { %5770 = vmatprep.subr.bf16.mxu1 %v6165_v15  ;;  %5792 = vmatprep.subr.bf16.mxu0 %v6166_v18  ;;  %v6195_v9 = vld [vmem:[%s6485_s24 + $0x228] sm:$0xff]   ;;  %v6198_v15 = vld [vmem:[%s6485_s24 + $0x2f0] sm:$0xff]   ;;  %v3307_v18 = vrot.slane %v6849_v53, %v6615_v48  ;;  %v6276_v8 = vld [vmem:[%s6490_s27] sm:$0xff] }
0x128e   : > { %v3833_v28 = vmax.f32 %v3735_v41, 0.0 }
0x128f   : > { %v3778_v48 = vadd.f32 %v6861_v1, %v3307_v18  ;;  %v6207_v1 = vld [vmem:[%s6485_s24 + $0x300] sm:$0xff]  }
0x1290   : > { %5771 = vmatpush3.bf16.msra.mxu1 %v6167_v20  ;;  %5793 = vmatpush3.bf16.msra.mxu0 %v6168_v13  ;;  %v3694_v20 = vadd.f32 %v6840_v39, %v3287_v10  ;;  %v6200_v13 = vld [vmem:[%s6485_s24 + $0x2b0] sm:$0xff]   ;;  %v6204_v39 = vld [vmem:[%s6485_s24 + $0x2b8] sm:$0xff]   ;;  %v3849_v23 = vpack.c.bf16 %v3833_v28, %v3833_v28 }
0x1291   : > { %5772 = vmatprep.subr.bf16.mxu1 %v6169_v24  ;;  %5794 = vmatprep.subr.bf16.mxu0 %v6170_v26  ;;  %v6203_v24 = vld [vmem:[%s6485_s24 + $0x238] sm:$0xff]  }
0x1292   : > { %v3831_v26 = vmax.f32 %v3694_v20, 0.0  ;;  %v6234_v10 = vld [vmem:[%s6485_s24 + $0x3f8] sm:$0xff]  }
0x1294   : > { %5773 = vmatpush3.bf16.msra.mxu1 %v6171_v29  ;;  %5795 = vmatpush3.bf16.msra.mxu0 %v6172_v2  ;;  %v3836_v29 = vmax.f32 %v3778_v48, 0.0  ;;  %v3838_v2 = vmax.f32 %v3819_v14, 0.0  ;;  %v3847_v31 = vpack.c.bf16 %v3831_v26, %v3831_v26 }
0x1295   : > { %5802 = vmatprep.subr.bf16.mxu1 %v6173_v16  ;;  %5824 = vmatprep.subr.bf16.mxu0 %v6174_v17  ;;  %v6209_v16 = vld [vmem:[%s6485_s24 + $0x348] sm:$0xff]  }
0x1296   : > { %v3852_v17 = vpack.c.bf16 %v3836_v29, %v3836_v29  ;;  %v3854_v33 = vpack.c.bf16 %v3838_v2, %v3838_v2 }
0x1297   : > { %4996 = vmatmul.mubr.bf16.vlgmr.msra.gmra.mrb[60].mxu1 %v3843_v35  ;;  %5036 = vmatmul.mubr.bf16.vlgmr.msra.gmra.mrb[64].mxu0 %v3845_v36  ;;  %v6212_v35 = vld [vmem:[%s6485_s24 + $0x388] sm:$0xff]   ;;  %v6213_v36 = vld [vmem:[%s6485_s24 + $0x350] sm:$0xff]  }
0x1298   : > { %5803 = vmatpush3.bf16.msra.mxu1 %v6175_v34  ;;  %5075 = vmatprep.mubr.bf16.mxu1 %v3848_v38  ;;  %v6211_v34 = vld [vmem:[%s6485_s24 + $0x308] sm:$0xff]   ;;  %v6215_v38 = vld [vmem:[%s6485_s24 + $0x310] sm:$0xff]  }
0x1299   : > { %5825 = vmatpush3.bf16.msra.mxu0 %v6176_v37  ;;  %5115 = vmatprep.mubr.bf16.mxu0 %v3850_v45  ;;  %v6214_v37 = vld [vmem:[%s6485_s24 + $0x3d0] sm:$0xff]   ;;  %v6218_v45 = vld [vmem:[%s6485_s24 + $0x3d8] sm:$0xff]  }
0x129a   : > { %5804 = vmatprep.subr.bf16.mxu1 %v6177_v43  ;;  %5826 = vmatprep.subr.bf16.mxu0 %v6178_v44  ;;  %v6216_v43 = vld [vmem:[%s6485_s24 + $0x390] sm:$0xff]   ;;  %v6217_v44 = vld [vmem:[%s6485_s24 + $0x358] sm:$0xff]  }
0x129c   : > { %5805 = vmatpush3.bf16.msra.mxu1 %v6179_v46  ;;  %v6219_v46 = vld [vmem:[%s6485_s24 + $0x318] sm:$0xff]  }
0x129d   : > { %5827 = vmatpush3.bf16.msra.mxu0 %v6180_v49  ;;  %5806 = vmatprep.subr.bf16.mxu1 %v6181_v54  ;;  %v6220_v49 = vld [vmem:[%s6485_s24 + $0x398] sm:$0xff]   ;;  %v6221_v54 = vld [vmem:[%s6485_s24 + $0x360] sm:$0xff]  }
0x129e   : > { %5828 = vmatprep.subr.bf16.mxu0 %v6182_v50  ;;  %v6222_v50 = vld [vmem:[%s6485_s24 + $0x3e0] sm:$0xff]  }
0x12a0   : > { %5807 = vmatpush3.bf16.msra.mxu1 %v6183_v51  ;;  %v6223_v51 = vld [vmem:[%s6485_s24 + $0x320] sm:$0xff]  }
0x12a1   : > { %5829 = vmatpush3.bf16.msra.mxu0 %v6184_v52  ;;  %5808 = vmatprep.subr.bf16.mxu1 %v6185_v21  ;;  %v6224_v52 = vld [vmem:[%s6485_s24 + $0x3a0] sm:$0xff]   ;;  %v6225_v21 = vld [vmem:[%s6485_s24 + $0x368] sm:$0xff]  }
0x12a2   : > { %5830 = vmatprep.subr.bf16.mxu0 %v6186_v55  ;;  %v6226_v55 = vld [vmem:[%s6485_s24 + $0x3e8] sm:$0xff]  }
0x12a4   : > { %5809 = vmatpush3.bf16.msra.mxu1 %v6187_v56  ;;  %v6227_v56 = vld [vmem:[%s6485_s24 + $0x328] sm:$0xff]  }
0x12a5   : > { %5831 = vmatpush3.bf16.msra.mxu0 %v6188_v57  ;;  %5810 = vmatprep.subr.bf16.mxu1 %v6189_v59  ;;  %v3303_v57 = vrot.slane %v6849_v53, %v6612_v47  ;;  %v6228_v59 = vld [vmem:[%s6485_s24 + $0x3a8] sm:$0xff]   ;;  %v6235_v47 = vld [vmem:[%s6485_s24 + $0x338] sm:$0xff]  }
0x12a6   : > { %5832 = vmatprep.subr.bf16.mxu0 %v6190_v60  ;;  %v6229_v60 = vld [vmem:[%s6485_s24 + $0x370] sm:$0xff]  }
0x12a8   : > { %5811 = vmatpush3.bf16.msra.mxu1 %v6191_v62  ;;  %v6230_v62 = vld [vmem:[%s6485_s24 + $0x3f0] sm:$0xff]  }
0x12a9   : > { %5833 = vmatpush3.bf16.msra.mxu0 %v6192_v4  ;;  %5812 = vmatprep.subr.bf16.mxu1 %v6193_v6  ;;  %v6231_v4 = vld [vmem:[%s6485_s24 + $0x330] sm:$0xff]   ;;  %v3776_v6 = vadd.f32 %v6857_v61, %v3303_v57 }
0x12aa   : > { %5834 = vmatprep.subr.bf16.mxu0 %v6194_v7  ;;  %v6232_v7 = vld [vmem:[%s6485_s24 + $0x3b0] sm:$0xff]  }
0x12ab   : > { %v3835_v53 = vmax.f32 %v3776_v6, 0.0 }
0x12ac   : > { %5813 = vmatpush3.bf16.msra.mxu1 %v6195_v9  ;;  %v6233_v9 = vld [vmem:[%s6485_s24 + $0x378] sm:$0xff]  }
0x12ad   : > { %5835 = vmatpush3.bf16.msra.mxu0 %v6196_v5  ;;  %5814 = vmatprep.subr.bf16.mxu1 %v6197_v11  ;;  %v6236_v5 = vld [vmem:[%s6485_s24 + $0x3b8] sm:$0xff]   ;;  %v3837_v11 = vmax.f32 %v6859_v0, 0.0  ;;  %v3851_v12 = vpack.c.bf16 %v3835_v53, %v3835_v53 }
0x12ae   : > { %5836 = vmatprep.subr.bf16.mxu0 %v6198_v15 }
0x12af   : > { %v3853_v61 = vpack.c.bf16 %v3837_v11, %v3837_v11 }
0x12b0   : > { %5815 = vmatpush3.bf16.msra.mxu1 %v6199_v19  ;;  %v4114_v19 = vrot.slane %v6276_v8, %v6810_v42 }
0x12b1   : > { %5837 = vmatpush3.bf16.msra.mxu0 %v6200_v13  ;;  %5816 = vmatprep.subr.bf16.mxu1 %v6201_v30 }
0x12b2   : > { %5838 = vmatprep.subr.bf16.mxu0 %v6202_v58 }
0x12b4   : > { %5817 = vmatpush3.bf16.msra.mxu1 %v6203_v24 }
0x12b5   : > { %5839 = vmatpush3.bf16.msra.mxu0 %v6204_v39  ;;  %5846 = vmatprep.subr.bf16.mxu1 %v6205_v27 }
0x12b6   : > { %5868 = vmatprep.subr.bf16.mxu0 %v6206_v40 }
0x12b7   : > { %5076 = vmatmul.mubr.bf16.vlgmr.msra.gmra.mrb[64].mxu1 %v3847_v31 }
0x12b8   : > { %5116 = vmatmul.mubr.bf16.vlgmr.msra.gmra.mrb[68].mxu0 %v3849_v23  ;;  %5847 = vmatpush3.bf16.msra.mxu1 %v6207_v1 }
0x12b9   : > { %5155 = vmatprep.mubr.bf16.mxu1 %v3852_v17  ;;  %5869 = vmatpush3.bf16.msra.mxu0 %v6208_v3 }
0x12ba   : > { %5195 = vmatprep.mubr.bf16.mxu0 %v3854_v33  ;;  %5848 = vmatprep.subr.bf16.mxu1 %v6209_v16 }
0x12bb   : > { %5870 = vmatprep.subr.bf16.mxu0 %v6210_v32 }
0x12bc   : > { %5849 = vmatpush3.bf16.msra.mxu1 %v6211_v34 }
0x12bd   : > { %5871 = vmatpush3.bf16.msra.mxu0 %v6212_v35  ;;  %5850 = vmatprep.subr.bf16.mxu1 %v6213_v36 }
0x12be   : > { %5872 = vmatprep.subr.bf16.mxu0 %v6214_v37 }
0x12c0   : > { %5851 = vmatpush3.bf16.msra.mxu1 %v6215_v38 }
0x12c1   : > { %5873 = vmatpush3.bf16.msra.mxu0 %v6216_v43  ;;  %5852 = vmatprep.subr.bf16.mxu1 %v6217_v44 }
0x12c2   : > { %5874 = vmatprep.subr.bf16.mxu0 %v6218_v45 }
0x12c4   : > { %5853 = vmatpush3.bf16.msra.mxu1 %v6219_v46 }
0x12c5   : > { %5875 = vmatpush3.bf16.msra.mxu0 %v6220_v49  ;;  %5854 = vmatprep.subr.bf16.mxu1 %v6221_v54 }
0x12c6   : > { %5876 = vmatprep.subr.bf16.mxu0 %v6222_v50 }
0x12c8   : > { %5855 = vmatpush3.bf16.msra.mxu1 %v6223_v51 }
0x12c9   : > { %5877 = vmatpush3.bf16.msra.mxu0 %v6224_v52  ;;  %5856 = vmatprep.subr.bf16.mxu1 %v6225_v21 }
0x12ca   : > { %5878 = vmatprep.subr.bf16.mxu0 %v6226_v55 }
0x12cc   : > { %5857 = vmatpush3.bf16.msra.mxu1 %v6227_v56 }
0x12cd   : > { %5879 = vmatpush3.bf16.msra.mxu0 %v6228_v59  ;;  %5858 = vmatprep.subr.bf16.mxu1 %v6229_v60 }
0x12ce   : > { %5880 = vmatprep.subr.bf16.mxu0 %v6230_v62 }
0x12d0   : > { %5859 = vmatpush3.bf16.msra.mxu1 %v6231_v4 }
0x12d1   : > { %5881 = vmatpush3.bf16.msra.mxu0 %v6232_v7  ;;  %5860 = vmatprep.subr.bf16.mxu1 %v6233_v9 }
0x12d2   : > { %5882 = vmatprep.subr.bf16.mxu0 %v6234_v10 }
0x12d4   : > { %5861 = vmatpush3.bf16.msra.mxu1 %v6235_v47 }
0x12d5   : > { %5883 = vmatpush3.bf16.msra.mxu0 %v6236_v5 }
0x12d7   : > { %5156 = vmatmul.mubr.bf16.vlgmr.msra.gmra.mrb[68].mxu1 %v3851_v12 }
0x12d8   : > { %5196 = vmatmul.mubr.bf16.vlgmr.msra.gmra.mrb[72].mxu0 %v3853_v61  ;;  %v681_v61 = vld [vmem:[%s6490_s27 + $0x8] sm:$0x3] }
0x134a   : > { %v5730_v15 = vpop.f32.mrb[56].mxu1  ;;  %v5752_v18 = vpop.f32.mrb[60].mxu0 }
0x134b   : > { %v5731_v20 = vpop.f32.mrb[57].mxu1  ;;  %v5753_v13 = vpop.f32.mrb[61].mxu0 }
0x134c   : > { %v5732_v30 = vadd.f32 %v5731_v20, %v5730_v15  ;;  %v5754_v41 = vadd.f32 %v5753_v13, %v5752_v18  ;;  %v5733_v58 = vpop.f32.mrb[58].mxu1  ;;  %v5755_v48 = vpop.f32.mrb[62].mxu0  ;;  %v5220_v15 = vrot.slane %v681_v61, %v6585_v22 }
0x134d   : > { %v5734_v14 = vpop.f32.mrb[59].mxu1  ;;  %v5756_v0 = vpop.f32.mrb[63].mxu0 }
0x134e   : > { %v4918_v24 = vadd.f32 %v5732_v30, %v4114_v19 }
0x1350   : > { %v4958_v26 = vadd.f32 %v5754_v41, %v4918_v24 }
0x136a   : > { %v5774_v39 = vpop.f32.mrb[60].mxu1  ;;  %v5796_v27 = vpop.f32.mrb[64].mxu0 }
0x136b   : > { %v5775_v28 = vpop.f32.mrb[61].mxu1  ;;  %v5797_v40 = vpop.f32.mrb[65].mxu0 }
0x136c   : > { %v5776_v29 = vadd.f32 %v5775_v28, %v5774_v39  ;;  %v5798_v2 = vadd.f32 %v5797_v40, %v5796_v27  ;;  %v5777_v1 = vpop.f32.mrb[62].mxu1  ;;  %v5799_v31 = vpop.f32.mrb[66].mxu0 }
0x136d   : > { %v5778_v3 = vpop.f32.mrb[63].mxu1  ;;  %v5800_v42 = vpop.f32.mrb[67].mxu0 }
0x136e   : > { %v4998_v23 = vadd.f32 %v5776_v29, %v4958_v26 }
0x1370   : > { %v5038_v16 = vadd.f32 %v5798_v2, %v4998_v23 }
0x138a   : > { %v5818_v17 = vpop.f32.mrb[64].mxu1 }
0x138b   : > { %v5840_v32 = vpop.f32.mrb[68].mxu0  ;;  %v5819_v33 = vpop.f32.mrb[65].mxu1 }
0x138c   : > { %v5820_v34 = vadd.f32 %v5819_v33, %v5818_v17  ;;  %v5841_v35 = vpop.f32.mrb[69].mxu0  ;;  %v5821_v36 = vpop.f32.mrb[66].mxu1 }
0x138d   : > { %v5842_v37 = vadd.f32 %v5841_v35, %v5840_v32  ;;  %v5843_v38 = vpop.f32.mrb[70].mxu0  ;;  %v5822_v43 = vpop.f32.mrb[67].mxu1 }
0x138e   : > { %v5078_v44 = vadd.f32 %v5820_v34, %v5038_v16  ;;  %v5844_v45 = vpop.f32.mrb[71].mxu0 }
0x1390   : > { %v5118_v46 = vadd.f32 %v5842_v37, %v5078_v44 }
0x13aa   : > { %v5862_v49 = vpop.f32.mrb[68].mxu1 }
0x13ab   : > { %v5884_v54 = vpop.f32.mrb[72].mxu0  ;;  %v5863_v50 = vpop.f32.mrb[69].mxu1 }
0x13ac   : > { %v5864_v51 = vadd.f32 %v5863_v50, %v5862_v49  ;;  %v5885_v52 = vpop.f32.mrb[73].mxu0  ;;  %v5865_v21 = vpop.f32.mrb[70].mxu1 }
0x13ad   : > { %v5886_v55 = vadd.f32 %v5885_v52, %v5884_v54  ;;  %v5887_v56 = vpop.f32.mrb[74].mxu0  ;;  %v5866_v57 = vpop.f32.mrb[71].mxu1 }
0x13ae   : > { %v5158_v59 = vadd.f32 %v5864_v51, %v5118_v46  ;;  %v5888_v60 = vpop.f32.mrb[75].mxu0 }
0x13b0   : > { %v5198_v62 = vadd.f32 %v5886_v55, %v5158_v59 }
0x13b2   : > { %v5203_v4 = vadd.f32 %v5198_v62, %v6728_v25  ;;  %v5225_v25 = vrot.slane %v681_v61, %v6637_v63 }
0x13b4   : > { %v5204_v6 = vsel %vm706_vm2, %v5203_v4, 0.0 }
0x13b5   : > { %5205 = vadd.xlane.f32.xlu0 %v5204_v6 }
0x1442   : > { %v5206_v7 = vpop.xlane.xlu0 %5205 }
0x1443   : > { %v5207_v9 = vmul.f32 0.03125, %v5206_v7 }
0x1445   : > { %v5208_v10 = vsub.f32 %v5203_v4, %v5207_v9 }
0x1447   : > { %v5209_v47 = vmul.f32 %v5208_v10, %v5208_v10 }
0x1449   : > { %v5210_v53 = vsel %vm706_vm2, %v5209_v47, 0.0 }
0x144a   : > { %5211 = vadd.xlane.f32.xlu0 %v5210_v53 }
0x14d7   : > { %v5212_v5 = vpop.xlane.xlu0 %5211 }
0x14d8   : > { %v5213_v11 = vmul.f32 0.03125, %v5212_v5 }
0x14da   : > { %v5214_v12 = vadd.f32 1e-05, %v5213_v11 }
0x14dc   : > { %6273 = vrsqrt.f32 %v5214_v12 }
0x14e6   : > { %v6274_v18 = vpop.eup %6273 }
0x14e7   : > { %v5216_v8 = vmul.f32 %v6274_v18, %v5208_v10 }
0x14e9   : > { %v5221_v19 = vmul.f32 %v5220_v15, %v5216_v8 }
0x14eb   : > { %v5226_v20 = vadd.f32 %v5225_v25, %v5221_v19 }
0x14ed   : > { %5227 = vst.msk [vmem:[%s6496_s4] sm:$0xff] %vm706_vm2, %v5226_v20 }
0x14ee PF: > { %s7035_s15 = sld [smem:[#allocation5_spill]]  ;;  %s7036_s25 = sld [smem:[#allocation3_spill]] }
0x14ef   : > { %s7037_s26 = sld [smem:[#allocation4_spill]]  ;;  %s7038_s27 = sld [smem:[#allocation6_spill]] }
0x14f0   : > { %s7039_s28 = sld [smem:[#allocation7_spill]] }
0x14f4   : > { %s23_s29 = sadd.s32 1, %s7035_s15  }
0x14f5   : > { %p20_p8 = scmp.ge.s32.totalorder %s23_s29, 6  }
0x14f7   :  { %22 = sbr.rel (!%p20_p8) target bundleno = 9 (0x9), region = 142 }

</bundles_post_ra>
